<compile_context>
chip_gen: v7x
topology: tpu7x:2x2x1
jax: 0.10.0
libtpu: 0.0.40
codegen_flags: <defaults>
</compile_context>

<pallas_src>
import functools
import math

import jax
import jax.numpy as jnp
from jax.experimental import pallas as pl
from jax.experimental.pallas import tpu as pltpu


def _traj_attn_kernel(x_ref, pe_ref, wqk_ref, bqk_ref, wv_ref, bv_ref, wf_ref,
                      bf_ref, hw_ref, adj_ref, n1w_ref, n1b_ref, w1_ref,
                      b1_ref, w2_ref, b2_ref, o_ref, *, num_heads, depth,
                      n_traj, t_len, tb):
    H, dk, N, T = num_heads, depth, n_traj, t_len
    D = H * dk
    TD = T * D                      # lane width of the token layout (256 here)
    Tdk = T * dk                    # lanes per head (64 here)
    R = tb * N                      # token rows in this block
    f32, bf16 = jnp.float32, jnp.bfloat16

    x3 = x_ref[...]                                 # (tb, N, TD) bf16
    xpe3 = x3 + pe_ref[...]                         # pe (N, TD) broadcasts over samples
    x = x3.reshape(R, TD)                           # free leading-dim merges
    xpe = xpe3.reshape(R, TD)

    # Fused lane-dense projections: Q||K from x+pe (attention scale folded into
    # the Q half of the weights/bias), V from x.  Contraction depth TD fills a
    # full MXU pass; output columns are ordered (head, time, dk) so each head
    # is a contiguous T*dk lane slice (no split_heads relayout).
    qk = jnp.dot(xpe, wqk_ref[...], preferred_element_type=f32) + bqk_ref[...]   # (R, 2TD)
    v = jnp.dot(x, wv_ref[...], preferred_element_type=f32) + bv_ref[...]        # (R, TD)
    qk = qk.astype(bf16)
    v = v.astype(bf16)
    adj_b = adj_ref[...].astype(bf16)               # (H, N, N), never TB-expanded

    # Attention per sample (no batch-folded (R,R) scores / block-diag mask) and
    # per head (contiguous 64-lane slices).
    sample_rows = []
    for b in range(tb):
        r0 = b * N
        head_outs = []
        for h in range(H):
            c0 = h * Tdk
            qh = qk[r0:r0 + N, c0:c0 + Tdk]                      # (N, Tdk)
            kh = qk[r0:r0 + N, TD + c0:TD + c0 + Tdk]            # (N, Tdk)
            vh = v[r0:r0 + N, c0:c0 + Tdk]                       # (N, Tdk)
            s = jax.lax.dot_general(qh, kh, (((1,), (1,)), ((), ())),
                                    preferred_element_type=f32)  # (N, N)
            s = s - jnp.max(s, axis=-1, keepdims=True)
            e = jnp.exp(s)
            p = e * pl.reciprocal(jnp.sum(e, axis=-1, keepdims=True), approx=True)
            # head_weight*softmax and the tiny att_map_adjuster hit V as two
            # separate f32-accumulated terms, so adj (~1e-6) is not rounded
            # away when the probabilities are cast to bf16.
            a = jnp.dot((p * hw_ref[h]).astype(bf16), vh,
                        preferred_element_type=f32)              # (N, Tdk)
            a = a + jnp.dot(adj_b[h], vh, preferred_element_type=f32)
            head_outs.append(a)
        sample_rows.append(jnp.concatenate(head_outs, axis=1))   # (N, TD)
    attended = (jnp.concatenate(sample_rows, axis=0)
                if tb > 1 else sample_rows[0])                   # (R, TD) f32

    # Final linear: single lane-dense (R, TD)@(TD, TD) matmul against the
    # (head,time,dk)->(time,D) block-diag-over-time weight.
    attn_lin = jnp.dot(attended.astype(bf16), wf_ref[...],
                       preferred_element_type=f32) + bf_ref[...]
    # dropout1: identity (inference)
    y = x.astype(f32) + attn_lin                                 # residual 1

    # LayerNorm([N, T, D]): per-sample stats over the whole (N, T*D) slab,
    # two-pass (mean, then centered variance) in f32.
    y3 = y.reshape(tb, N, TD)
    inv_m = f32(1.0 / (N * TD))
    mu = jnp.sum(y3, axis=(1, 2), keepdims=True) * inv_m
    d = y3 - mu
    var = jnp.sum(d * d, axis=(1, 2), keepdims=True) * inv_m
    yn3 = d * jax.lax.rsqrt(var + 1e-5) * n1w_ref[...] + n1b_ref[...]
    yn = yn3.reshape(R, TD)

    # Feed-forward with time-block-diagonal weights: stays in the lane-dense
    # (R, T*D) token layout (no (L, D) relayout); output store is lane-dense.
    h1 = jnp.dot(yn.astype(bf16), w1_ref[...], preferred_element_type=f32) + b1_ref[...]
    h1 = jnp.maximum(h1, 0.0)
    ff = jnp.dot(h1.astype(bf16), w2_ref[...], preferred_element_type=f32) + b2_ref[...]
    # dropout2: identity (inference)

    o_ref[...] = (yn + ff).reshape(tb, N, TD)                    # residual 2


def init_params(key, D, T, N, H):
    """Deterministic synthetic parameters in PyTorch layout (weight = (out, in))."""
    ks = jax.random.split(key, 8)

    def linear(k, fan_in, fan_out):
        kw, kb = jax.random.split(k)
        bound = 1.0 / math.sqrt(fan_in)
        w = jax.random.uniform(kw, (fan_out, fan_in), jnp.float32, -bound, bound)
        b = jax.random.uniform(kb, (fan_out,), jnp.float32, -bound, bound)
        return w, b

    wq, bq = linear(ks[0], D, D)
    wk, bk = linear(ks[1], D, D)
    wv, bv = linear(ks[2], D, D)
    wf, bf = linear(ks[3], D, D)
    w1, b1 = linear(ks[4], D, 4 * D)
    w2, b2 = linear(ks[5], 4 * D, D)
    return dict(
        wq=wq, bq=bq, wk=wk, bk=bk, wv=wv, bv=bv, wf=wf, bf=bf,
        w1=w1, b1=b1, w2=w2, b2=b2,
        n1_w=jnp.ones((N, T, D), jnp.float32),
        n1_b=jnp.zeros((N, T, D), jnp.float32),
        adj=jax.random.uniform(ks[6], (1, H, N, N), jnp.float32, -1e-6, 1e-6),
        head_weight=jnp.ones((1, H, 1, 1), jnp.float32),
        pe=jax.random.normal(ks[7], (1, N, 1, D), dtype=jnp.float32),
    )


def prepare_params(p, *, D, T, N, H):
    """One-time weight transforms (parameter-build time, not per call):
    expand all per-token linears to block-diagonal-over-time matrices in the
    lane-dense (time, channel) token layout, order projection outputs as
    (head, time, dk), fold the attention scale into Wq/bq, cast matmul weights
    to bf16.  The att_map_adjuster is NOT pre-expanded (stays (H, N, N))."""
    dk = D // H
    TD = T * D
    Tdk = T * dk
    scale = float((dk * T) ** -0.5)
    eyeT = jnp.eye(T, dtype=jnp.float32)

    def proj_big(w, s=1.0):
        # torch (out, in) -> (T*D, H*T*dk): rows (t_in, c), cols (h, t_out, d)
        wt = (jnp.transpose(w, (1, 0)) * s).reshape(D, H, dk)          # [c, h, d]
        return jnp.einsum('ab,chd->achbd', eyeT, wt).reshape(TD, H * Tdk)

    def proj_bias(b, s=1.0):
        bb = (b * s).reshape(H, 1, dk)
        return jnp.broadcast_to(bb, (H, T, dk)).reshape(1, H * Tdk).astype(jnp.float32)

    wqk = jnp.concatenate([proj_big(p['wq'], scale), proj_big(p['wk'])],
                          axis=1).astype(jnp.bfloat16)                 # (TD, 2TD)
    bqk = jnp.concatenate([proj_bias(p['bq'], scale), proj_bias(p['bk'])], axis=1)
    wv = proj_big(p['wv']).astype(jnp.bfloat16)
    bv = proj_bias(p['bv'])

    # final linear: rows ordered (h, t, dk) [attended layout], cols (t, c) [token layout]
    wft = jnp.transpose(p['wf'], (1, 0)).reshape(H, dk, D)             # [h, d, c]
    wf = jnp.einsum('ab,hdc->hadbc', eyeT, wft).reshape(H * Tdk, TD).astype(jnp.bfloat16)
    bf = jnp.broadcast_to(p['bf'].reshape(1, D), (T, D)).reshape(1, TD).astype(jnp.float32)

    hw = p['head_weight'].reshape(H).astype(jnp.float32)               # SMEM scalars
    adj = p['adj'][0].astype(jnp.float32)                              # (H, N, N)

    pe = jnp.broadcast_to(p['pe'][0, :, 0, :][:, None, :],
                          (N, T, D)).reshape(N, TD).astype(jnp.bfloat16)
    n1w = p['n1_w'].reshape(N, TD).astype(jnp.float32)
    n1b = p['n1_b'].reshape(N, TD).astype(jnp.float32)

    w1t = jnp.transpose(p['w1'], (1, 0))                               # (D, 4D)
    w1 = jnp.einsum('ab,cj->acbj', eyeT, w1t).reshape(TD, T * 4 * D).astype(jnp.bfloat16)
    b1 = jnp.broadcast_to(p['b1'].reshape(1, 4 * D),
                          (T, 4 * D)).reshape(1, T * 4 * D).astype(jnp.float32)
    w2t = jnp.transpose(p['w2'], (1, 0))                               # (4D, D)
    w2 = jnp.einsum('ab,jc->ajbc', eyeT, w2t).reshape(T * 4 * D, TD).astype(jnp.bfloat16)
    b2 = jnp.broadcast_to(p['b2'].reshape(1, D), (T, D)).reshape(1, TD).astype(jnp.float32)

    return (pe, wqk, bqk, wv, bv, wf, bf, hw, adj, n1w, n1b, w1, b1, w2, b2)


def _pick_block_batch(B, N):
    """Largest TB dividing B with an even grid of >= 2 steps (pipelining + both
    v7x TensorCores) and TB*N <= 256 rows of attention tokens per block."""
    best = None
    for tbc in range(1, B + 1):
        if B % tbc == 0 and B // tbc >= 2 and (B // tbc) % 2 == 0 and tbc * N <= 256:
            best = tbc
    if best is None:
        for tbc in range(1, B + 1):
            if B % tbc == 0 and B // tbc >= 2 and tbc * N <= 256:
                best = tbc
    return best if best is not None else B


def trajectory_self_attention(x, kparams, *, num_heads, temporal_length, n_traj,
                              block_batch=None):
    """x: (B, D, T, N) as in the PyTorch module.  Returns (B, D, T, N) float32."""
    B, D, T, N = x.shape
    assert T == temporal_length and N == n_traj
    assert D % num_heads == 0
    TD = T * D
    TB = _pick_block_batch(B, N) if block_batch is None else block_batch
    assert B % TB == 0
    assert kparams[1].shape == (TD, 2 * TD), "kparams prepared for different T/D"

    # (B, D, T, N) -> (B, N, T, D) -> lane-dense (B, N, T*D) tokens, bf16.
    # TODO(synk): when stacking layers, keep activations in this token-major
    # layout between layers instead of paying this HBM transpose per call.
    x_tok = jnp.transpose(x, (0, 3, 2, 1)).reshape(B, N, TD).astype(jnp.bfloat16)

    kernel = functools.partial(_traj_attn_kernel, num_heads=num_heads,
                               depth=D // num_heads, n_traj=N, t_len=T, tb=TB)

    in_specs = [pl.BlockSpec((TB, N, TD), lambda i: (i, 0, 0))]
    for a in kparams:
        if a.ndim == 1:   # head_weight scalars live in SMEM
            in_specs.append(pl.BlockSpec(memory_space=pltpu.MemorySpace.SMEM))
        else:             # resident full-array VMEM blocks
            in_specs.append(pl.BlockSpec(a.shape, lambda i, _n=a.ndim: (0,) * _n))

    out = pl.pallas_call(
        kernel,
        out_shape=jax.ShapeDtypeStruct((B, N, TD), jnp.float32),
        grid=(B // TB,),
        in_specs=in_specs,
        out_specs=pl.BlockSpec((TB, N, TD), lambda i: (i, 0, 0)),
        compiler_params=pltpu.CompilerParams(dimension_semantics=("parallel",)),
    )(x_tok, *kparams)

    # (B, N, T*D) -> (B, N, T, D) -> (B, D, T, N)
    return jnp.transpose(out.reshape(B, N, T, D), (0, 3, 2, 1))


def _reference_forward(x, p, *, num_heads, temporal_length, n_traj):
    """Pure-JAX reference mirroring the PyTorch module, consuming the same
    bf16-quantized inputs/weights as the kernel (f32 math)."""
    H, T, N = num_heads, temporal_length, n_traj
    B, D = x.shape[0], x.shape[1]
    dk = D // H
    f = lambda a: a.astype(jnp.bfloat16).astype(jnp.float32)

    xr = jnp.transpose(f(x), (0, 3, 2, 1))                      # (B, N, T, D)
    pe = f(p['pe'][0, :, 0, :])                                 # (N, D)
    x_pe = xr + pe[None, :, None, :]

    lin = lambda a, w, b: a @ f(w).T + b
    Q, K, V = lin(x_pe, p['wq'], p['bq']), lin(x_pe, p['wk'], p['bk']), lin(xr, p['wv'], p['bv'])
    split = lambda a: a.reshape(B, N, T, H, dk).transpose(0, 3, 1, 2, 4).reshape(B, H, N, T * dk)
    Qh, Kh, Vh = split(Q), split(K), split(V)

    s = jnp.einsum('bhnk,bhmk->bhnm', Qh, Kh) * ((dk * T) ** -0.5)
    w = jax.nn.softmax(s, axis=-1)
    w = w * p['head_weight'] + p['adj']
    att = jnp.einsum('bhnm,bhmk->bhnk', w, Vh)
    att = att.reshape(B, H, N, T, dk).transpose(0, 2, 3, 1, 4).reshape(B, N, T, D)
    att = att @ f(p['wf']).T + p['bf']

    y = xr + att
    mu = y.mean(axis=(1, 2, 3), keepdims=True)
    var = y.var(axis=(1, 2, 3), keepdims=True)
    yn = (y - mu) / jnp.sqrt(var + 1e-5) * p['n1_w'] + p['n1_b']
    h1 = jnp.maximum(yn @ f(p['w1']).T + p['b1'], 0.0)
    out = yn + (h1 @ f(p['w2']).T + p['b2'])
    return jnp.transpose(out, (0, 3, 2, 1))                     # (B, D, T, N)


if __name__ == "__main__":
    # small shapes consistent with the module: x is (B, D=input_channels, T, N)
    B, D, T, N, H = 2, 32, 8, 16, 4

    key = jax.random.PRNGKey(0)
    kx, kp = jax.random.split(key)
    x = jax.random.normal(kx, (B, D, T, N), dtype=jnp.float32)

    params = init_params(kp, D, T, N, H)
    kparams = prepare_params(params, D=D, T=T, N=N, H=H)         # one-time transforms

    out = trajectory_self_attention(x, kparams, num_heads=H,
                                    temporal_length=T, n_traj=N)
    out = jax.block_until_ready(out)

    assert out.shape == (B, D, T, N), out.shape
    assert bool(jnp.all(jnp.isfinite(out)))

    # Sanity check vs a pure-JAX reference using the same bf16 weights
    # (coarse tolerance because the kernel runs its matmuls in bf16).
    ref = _reference_forward(x, params, num_heads=H, temporal_length=T, n_traj=N)
    max_err = float(jnp.max(jnp.abs(out - ref)))
    assert max_err < 0.5, max_err

    print("KERNEL_OK")
</pallas_src>

<mosaic_0001>
module attributes {stable_mosaic.version = 11 : i64} {
  func.func @_traj_attn_kernel(%arg0: i32, %arg1: memref<1x16x256xbf16, #tpu.memory_space<vmem>>, %arg2: memref<16x256xbf16, #tpu.memory_space<vmem>>, %arg3: memref<256x512xbf16, #tpu.memory_space<vmem>>, %arg4: memref<1x512xf32, #tpu.memory_space<vmem>>, %arg5: memref<256x256xbf16, #tpu.memory_space<vmem>>, %arg6: memref<1x256xf32, #tpu.memory_space<vmem>>, %arg7: memref<256x256xbf16, #tpu.memory_space<vmem>>, %arg8: memref<1x256xf32, #tpu.memory_space<vmem>>, %arg9: memref<4xf32, #tpu.memory_space<smem>>, %arg10: memref<4x16x16xf32, #tpu.memory_space<vmem>>, %arg11: memref<16x256xf32, #tpu.memory_space<vmem>>, %arg12: memref<16x256xf32, #tpu.memory_space<vmem>>, %arg13: memref<256x1024xbf16, #tpu.memory_space<vmem>>, %arg14: memref<1x1024xf32, #tpu.memory_space<vmem>>, %arg15: memref<1024x256xbf16, #tpu.memory_space<vmem>>, %arg16: memref<1x256xf32, #tpu.memory_space<vmem>>, %arg17: memref<1x16x256xf32, #tpu.memory_space<vmem>>) attributes {dimension_semantics = [#tpu.dimension_semantics<parallel>], iteration_bounds = array<i64: 2>, scalar_prefetch = 0 : i64, scratch_operands = 0 : i64, tpu.core_type = #tpu.core_type<tc>, window_params = [{transform_indices = @transform_0, window_bounds = array<i64: 1, 16, 256>}, {pipeline_mode = #tpu.pipeline_mode<synchronous>, transform_indices = @transform_1, window_bounds = array<i64: 16, 256>}, {pipeline_mode = #tpu.pipeline_mode<synchronous>, transform_indices = @transform_2, window_bounds = array<i64: 256, 512>}, {pipeline_mode = #tpu.pipeline_mode<synchronous>, transform_indices = @transform_3, window_bounds = array<i64: 1, 512>}, {pipeline_mode = #tpu.pipeline_mode<synchronous>, transform_indices = @transform_4, window_bounds = array<i64: 256, 256>}, {pipeline_mode = #tpu.pipeline_mode<synchronous>, transform_indices = @transform_5, window_bounds = array<i64: 1, 256>}, {pipeline_mode = #tpu.pipeline_mode<synchronous>, transform_indices = @transform_6, window_bounds = array<i64: 256, 256>}, {pipeline_mode = #tpu.pipeline_mode<synchronous>, transform_indices = @transform_7, window_bounds = array<i64: 1, 256>}, {transform_indices = @transform_8, window_bounds = array<i64: 4>}, {pipeline_mode = #tpu.pipeline_mode<synchronous>, transform_indices = @transform_9, window_bounds = array<i64: 4, 16, 16>}, {pipeline_mode = #tpu.pipeline_mode<synchronous>, transform_indices = @transform_10, window_bounds = array<i64: 16, 256>}, {pipeline_mode = #tpu.pipeline_mode<synchronous>, transform_indices = @transform_11, window_bounds = array<i64: 16, 256>}, {pipeline_mode = #tpu.pipeline_mode<synchronous>, transform_indices = @transform_12, window_bounds = array<i64: 256, 1024>}, {pipeline_mode = #tpu.pipeline_mode<synchronous>, transform_indices = @transform_13, window_bounds = array<i64: 1, 1024>}, {pipeline_mode = #tpu.pipeline_mode<synchronous>, transform_indices = @transform_14, window_bounds = array<i64: 1024, 256>}, {pipeline_mode = #tpu.pipeline_mode<synchronous>, transform_indices = @transform_15, window_bounds = array<i64: 1, 256>}, {transform_indices = @transform_16, window_bounds = array<i64: 1, 16, 256>}]} {
    %c0 = arith.constant 0 : index
    %c0_0 = arith.constant 0 : index
    %c0_1 = arith.constant 0 : index
    %0 = vector.load %arg1[%c0, %c0_0, %c0_1] : memref<1x16x256xbf16, #tpu.memory_space<vmem>>, vector<1x16x256xbf16>
    %c0_2 = arith.constant 0 : index
    %c0_3 = arith.constant 0 : index
    %1 = vector.load %arg2[%c0_2, %c0_3] : memref<16x256xbf16, #tpu.memory_space<vmem>>, vector<16x256xbf16>
    %2 = vector.shape_cast %1 : vector<16x256xbf16> to vector<1x16x256xbf16>
    %3 = arith.addf %0, %2 : vector<1x16x256xbf16>
    %4 = vector.shape_cast %0 : vector<1x16x256xbf16> to vector<16x256xbf16>
    %5 = vector.shape_cast %3 : vector<1x16x256xbf16> to vector<16x256xbf16>
    %c0_4 = arith.constant 0 : index
    %c0_5 = arith.constant 0 : index
    %6 = vector.load %arg3[%c0_4, %c0_5] : memref<256x512xbf16, #tpu.memory_space<vmem>>, vector<256x512xbf16>
    %cst = arith.constant dense<0.000000e+00> : vector<16x512xf32>
    %7 = tpu.matmul %5, %6, %cst {dimension_numbers = #tpu.dot_dimension_numbers<[1], [0], [0], [1], [0, 0, 1, 1], [], []>} : vector<16x256xbf16>, vector<256x512xbf16>, vector<16x512xf32> -> vector<16x512xf32>
    %c0_6 = arith.constant 0 : index
    %c0_7 = arith.constant 0 : index
    %8 = vector.load %arg4[%c0_6, %c0_7] : memref<1x512xf32, #tpu.memory_space<vmem>>, vector<1x512xf32>
    %9 = vector.broadcast %8 : vector<1x512xf32> to vector<16x512xf32>
    %10 = arith.addf %7, %9 : vector<16x512xf32>
    %c0_8 = arith.constant 0 : index
    %c0_9 = arith.constant 0 : index
    %11 = vector.load %arg5[%c0_8, %c0_9] : memref<256x256xbf16, #tpu.memory_space<vmem>>, vector<256x256xbf16>
    %cst_10 = arith.constant dense<0.000000e+00> : vector<16x256xf32>
    %12 = tpu.matmul %4, %11, %cst_10 {dimension_numbers = #tpu.dot_dimension_numbers<[1], [0], [0], [1], [0, 0, 1, 1], [], []>} : vector<16x256xbf16>, vector<256x256xbf16>, vector<16x256xf32> -> vector<16x256xf32>
    %c0_11 = arith.constant 0 : index
    %c0_12 = arith.constant 0 : index
    %13 = vector.load %arg6[%c0_11, %c0_12] : memref<1x256xf32, #tpu.memory_space<vmem>>, vector<1x256xf32>
    %14 = vector.broadcast %13 : vector<1x256xf32> to vector<16x256xf32>
    %15 = arith.addf %12, %14 : vector<16x256xf32>
    %16 = arith.truncf %10 : vector<16x512xf32> to vector<16x512xbf16>
    %17 = arith.truncf %15 : vector<16x256xf32> to vector<16x256xbf16>
    %c0_13 = arith.constant 0 : index
    %c0_14 = arith.constant 0 : index
    %c0_15 = arith.constant 0 : index
    %18 = vector.load %arg10[%c0_13, %c0_14, %c0_15] : memref<4x16x16xf32, #tpu.memory_space<vmem>>, vector<4x16x16xf32>
    %19 = arith.truncf %18 : vector<4x16x16xf32> to vector<4x16x16xbf16>
    %20 = vector.extract_strided_slice %16 {offsets = [0, 0], sizes = [16, 64], strides = [1, 1]} : vector<16x512xbf16> to vector<16x64xbf16>
    %21 = vector.extract_strided_slice %16 {offsets = [0, 256], sizes = [16, 64], strides = [1, 1]} : vector<16x512xbf16> to vector<16x64xbf16>
    %22 = vector.extract_strided_slice %17 {offsets = [0, 0], sizes = [16, 64], strides = [1, 1]} : vector<16x256xbf16> to vector<16x64xbf16>
    %cst_16 = arith.constant dense<0.000000e+00> : vector<16x16xf32>
    %23 = tpu.matmul %20, %21, %cst_16 {dimension_numbers = #tpu.dot_dimension_numbers<[1], [1], [0], [0], [0, 0, 1, 0], [], []>} : vector<16x64xbf16>, vector<16x64xbf16>, vector<16x16xf32> -> vector<16x16xf32>
    %cst_17 = arith.constant dense<0xFF800000> : vector<16xf32>
    %24 = vector.multi_reduction <maximumf>, %23, %cst_17 [1] : vector<16x16xf32> to vector<16xf32>
    %25 = vector.shape_cast %24 : vector<16xf32> to vector<16x1xf32>
    %26 = vector.broadcast %25 : vector<16x1xf32> to vector<16x16xf32>
    %27 = arith.subf %23, %26 : vector<16x16xf32>
    %28 = math.exp %27 : vector<16x16xf32>
    %cst_18 = arith.constant dense<0.000000e+00> : vector<16xf32>
    %29 = vector.multi_reduction <add>, %28, %cst_18 [1] : vector<16x16xf32> to vector<16xf32>
    %30 = vector.shape_cast %29 : vector<16xf32> to vector<16x1xf32>
    %31 = tpu.reciprocal %30 {approx = true} : vector<16x1xf32> -> vector<16x1xf32>
    %32 = vector.broadcast %31 : vector<16x1xf32> to vector<16x16xf32>
    %33 = arith.mulf %28, %32 : vector<16x16xf32>
    %c0_19 = arith.constant 0 : index
    %34 = memref.load %arg9[%c0_19] : memref<4xf32, #tpu.memory_space<smem>>
    %35 = vector.broadcast %34 : f32 to vector<16x16xf32>
    %36 = arith.mulf %33, %35 : vector<16x16xf32>
    %37 = arith.truncf %36 : vector<16x16xf32> to vector<16x16xbf16>
    %cst_20 = arith.constant dense<0.000000e+00> : vector<16x64xf32>
    %38 = tpu.matmul %37, %22, %cst_20 {dimension_numbers = #tpu.dot_dimension_numbers<[1], [0], [0], [1], [0, 0, 1, 1], [], []>} : vector<16x16xbf16>, vector<16x64xbf16>, vector<16x64xf32> -> vector<16x64xf32>
    %39 = vector.extract_strided_slice %19 {offsets = [0, 0, 0], sizes = [1, 16, 16], strides = [1, 1, 1]} : vector<4x16x16xbf16> to vector<1x16x16xbf16>
    %40 = vector.shape_cast %39 : vector<1x16x16xbf16> to vector<16x16xbf16>
    %cst_21 = arith.constant dense<0.000000e+00> : vector<16x64xf32>
    %41 = tpu.matmul %40, %22, %cst_21 {dimension_numbers = #tpu.dot_dimension_numbers<[1], [0], [0], [1], [0, 0, 1, 1], [], []>} : vector<16x16xbf16>, vector<16x64xbf16>, vector<16x64xf32> -> vector<16x64xf32>
    %42 = arith.addf %38, %41 : vector<16x64xf32>
    %43 = vector.extract_strided_slice %16 {offsets = [0, 64], sizes = [16, 64], strides = [1, 1]} : vector<16x512xbf16> to vector<16x64xbf16>
    %44 = vector.extract_strided_slice %16 {offsets = [0, 320], sizes = [16, 64], strides = [1, 1]} : vector<16x512xbf16> to vector<16x64xbf16>
    %45 = vector.extract_strided_slice %17 {offsets = [0, 64], sizes = [16, 64], strides = [1, 1]} : vector<16x256xbf16> to vector<16x64xbf16>
    %cst_22 = arith.constant dense<0.000000e+00> : vector<16x16xf32>
    %46 = tpu.matmul %43, %44, %cst_22 {dimension_numbers = #tpu.dot_dimension_numbers<[1], [1], [0], [0], [0, 0, 1, 0], [], []>} : vector<16x64xbf16>, vector<16x64xbf16>, vector<16x16xf32> -> vector<16x16xf32>
    %cst_23 = arith.constant dense<0xFF800000> : vector<16xf32>
    %47 = vector.multi_reduction <maximumf>, %46, %cst_23 [1] : vector<16x16xf32> to vector<16xf32>
    %48 = vector.shape_cast %47 : vector<16xf32> to vector<16x1xf32>
    %49 = vector.broadcast %48 : vector<16x1xf32> to vector<16x16xf32>
    %50 = arith.subf %46, %49 : vector<16x16xf32>
    %51 = math.exp %50 : vector<16x16xf32>
    %cst_24 = arith.constant dense<0.000000e+00> : vector<16xf32>
    %52 = vector.multi_reduction <add>, %51, %cst_24 [1] : vector<16x16xf32> to vector<16xf32>
    %53 = vector.shape_cast %52 : vector<16xf32> to vector<16x1xf32>
    %54 = tpu.reciprocal %53 {approx = true} : vector<16x1xf32> -> vector<16x1xf32>
    %55 = vector.broadcast %54 : vector<16x1xf32> to vector<16x16xf32>
    %56 = arith.mulf %51, %55 : vector<16x16xf32>
    %c1 = arith.constant 1 : index
    %57 = memref.load %arg9[%c1] : memref<4xf32, #tpu.memory_space<smem>>
    %58 = vector.broadcast %57 : f32 to vector<16x16xf32>
    %59 = arith.mulf %56, %58 : vector<16x16xf32>
    %60 = arith.truncf %59 : vector<16x16xf32> to vector<16x16xbf16>
    %cst_25 = arith.constant dense<0.000000e+00> : vector<16x64xf32>
    %61 = tpu.matmul %60, %45, %cst_25 {dimension_numbers = #tpu.dot_dimension_numbers<[1], [0], [0], [1], [0, 0, 1, 1], [], []>} : vector<16x16xbf16>, vector<16x64xbf16>, vector<16x64xf32> -> vector<16x64xf32>
    %62 = vector.extract_strided_slice %19 {offsets = [1, 0, 0], sizes = [1, 16, 16], strides = [1, 1, 1]} : vector<4x16x16xbf16> to vector<1x16x16xbf16>
    %63 = vector.shape_cast %62 : vector<1x16x16xbf16> to vector<16x16xbf16>
    %cst_26 = arith.constant dense<0.000000e+00> : vector<16x64xf32>
    %64 = tpu.matmul %63, %45, %cst_26 {dimension_numbers = #tpu.dot_dimension_numbers<[1], [0], [0], [1], [0, 0, 1, 1], [], []>} : vector<16x16xbf16>, vector<16x64xbf16>, vector<16x64xf32> -> vector<16x64xf32>
    %65 = arith.addf %61, %64 : vector<16x64xf32>
    %66 = vector.extract_strided_slice %16 {offsets = [0, 128], sizes = [16, 64], strides = [1, 1]} : vector<16x512xbf16> to vector<16x64xbf16>
    %67 = vector.extract_strided_slice %16 {offsets = [0, 384], sizes = [16, 64], strides = [1, 1]} : vector<16x512xbf16> to vector<16x64xbf16>
    %68 = vector.extract_strided_slice %17 {offsets = [0, 128], sizes = [16, 64], strides = [1, 1]} : vector<16x256xbf16> to vector<16x64xbf16>
    %cst_27 = arith.constant dense<0.000000e+00> : vector<16x16xf32>
    %69 = tpu.matmul %66, %67, %cst_27 {dimension_numbers = #tpu.dot_dimension_numbers<[1], [1], [0], [0], [0, 0, 1, 0], [], []>} : vector<16x64xbf16>, vector<16x64xbf16>, vector<16x16xf32> -> vector<16x16xf32>
    %cst_28 = arith.constant dense<0xFF800000> : vector<16xf32>
    %70 = vector.multi_reduction <maximumf>, %69, %cst_28 [1] : vector<16x16xf32> to vector<16xf32>
    %71 = vector.shape_cast %70 : vector<16xf32> to vector<16x1xf32>
    %72 = vector.broadcast %71 : vector<16x1xf32> to vector<16x16xf32>
    %73 = arith.subf %69, %72 : vector<16x16xf32>
    %74 = math.exp %73 : vector<16x16xf32>
    %cst_29 = arith.constant dense<0.000000e+00> : vector<16xf32>
    %75 = vector.multi_reduction <add>, %74, %cst_29 [1] : vector<16x16xf32> to vector<16xf32>
    %76 = vector.shape_cast %75 : vector<16xf32> to vector<16x1xf32>
    %77 = tpu.reciprocal %76 {approx = true} : vector<16x1xf32> -> vector<16x1xf32>
    %78 = vector.broadcast %77 : vector<16x1xf32> to vector<16x16xf32>
    %79 = arith.mulf %74, %78 : vector<16x16xf32>
    %c2 = arith.constant 2 : index
    %80 = memref.load %arg9[%c2] : memref<4xf32, #tpu.memory_space<smem>>
    %81 = vector.broadcast %80 : f32 to vector<16x16xf32>
    %82 = arith.mulf %79, %81 : vector<16x16xf32>
    %83 = arith.truncf %82 : vector<16x16xf32> to vector<16x16xbf16>
    %cst_30 = arith.constant dense<0.000000e+00> : vector<16x64xf32>
    %84 = tpu.matmul %83, %68, %cst_30 {dimension_numbers = #tpu.dot_dimension_numbers<[1], [0], [0], [1], [0, 0, 1, 1], [], []>} : vector<16x16xbf16>, vector<16x64xbf16>, vector<16x64xf32> -> vector<16x64xf32>
    %85 = vector.extract_strided_slice %19 {offsets = [2, 0, 0], sizes = [1, 16, 16], strides = [1, 1, 1]} : vector<4x16x16xbf16> to vector<1x16x16xbf16>
    %86 = vector.shape_cast %85 : vector<1x16x16xbf16> to vector<16x16xbf16>
    %cst_31 = arith.constant dense<0.000000e+00> : vector<16x64xf32>
    %87 = tpu.matmul %86, %68, %cst_31 {dimension_numbers = #tpu.dot_dimension_numbers<[1], [0], [0], [1], [0, 0, 1, 1], [], []>} : vector<16x16xbf16>, vector<16x64xbf16>, vector<16x64xf32> -> vector<16x64xf32>
    %88 = arith.addf %84, %87 : vector<16x64xf32>
    %89 = vector.extract_strided_slice %16 {offsets = [0, 192], sizes = [16, 64], strides = [1, 1]} : vector<16x512xbf16> to vector<16x64xbf16>
    %90 = vector.extract_strided_slice %16 {offsets = [0, 448], sizes = [16, 64], strides = [1, 1]} : vector<16x512xbf16> to vector<16x64xbf16>
    %91 = vector.extract_strided_slice %17 {offsets = [0, 192], sizes = [16, 64], strides = [1, 1]} : vector<16x256xbf16> to vector<16x64xbf16>
    %cst_32 = arith.constant dense<0.000000e+00> : vector<16x16xf32>
    %92 = tpu.matmul %89, %90, %cst_32 {dimension_numbers = #tpu.dot_dimension_numbers<[1], [1], [0], [0], [0, 0, 1, 0], [], []>} : vector<16x64xbf16>, vector<16x64xbf16>, vector<16x16xf32> -> vector<16x16xf32>
    %cst_33 = arith.constant dense<0xFF800000> : vector<16xf32>
    %93 = vector.multi_reduction <maximumf>, %92, %cst_33 [1] : vector<16x16xf32> to vector<16xf32>
    %94 = vector.shape_cast %93 : vector<16xf32> to vector<16x1xf32>
    %95 = vector.broadcast %94 : vector<16x1xf32> to vector<16x16xf32>
    %96 = arith.subf %92, %95 : vector<16x16xf32>
    %97 = math.exp %96 : vector<16x16xf32>
    %cst_34 = arith.constant dense<0.000000e+00> : vector<16xf32>
    %98 = vector.multi_reduction <add>, %97, %cst_34 [1] : vector<16x16xf32> to vector<16xf32>
    %99 = vector.shape_cast %98 : vector<16xf32> to vector<16x1xf32>
    %100 = tpu.reciprocal %99 {approx = true} : vector<16x1xf32> -> vector<16x1xf32>
    %101 = vector.broadcast %100 : vector<16x1xf32> to vector<16x16xf32>
    %102 = arith.mulf %97, %101 : vector<16x16xf32>
    %c3 = arith.constant 3 : index
    %103 = memref.load %arg9[%c3] : memref<4xf32, #tpu.memory_space<smem>>
    %104 = vector.broadcast %103 : f32 to vector<16x16xf32>
    %105 = arith.mulf %102, %104 : vector<16x16xf32>
    %106 = arith.truncf %105 : vector<16x16xf32> to vector<16x16xbf16>
    %cst_35 = arith.constant dense<0.000000e+00> : vector<16x64xf32>
    %107 = tpu.matmul %106, %91, %cst_35 {dimension_numbers = #tpu.dot_dimension_numbers<[1], [0], [0], [1], [0, 0, 1, 1], [], []>} : vector<16x16xbf16>, vector<16x64xbf16>, vector<16x64xf32> -> vector<16x64xf32>
    %108 = vector.extract_strided_slice %19 {offsets = [3, 0, 0], sizes = [1, 16, 16], strides = [1, 1, 1]} : vector<4x16x16xbf16> to vector<1x16x16xbf16>
    %109 = vector.shape_cast %108 : vector<1x16x16xbf16> to vector<16x16xbf16>
    %cst_36 = arith.constant dense<0.000000e+00> : vector<16x64xf32>
    %110 = tpu.matmul %109, %91, %cst_36 {dimension_numbers = #tpu.dot_dimension_numbers<[1], [0], [0], [1], [0, 0, 1, 1], [], []>} : vector<16x16xbf16>, vector<16x64xbf16>, vector<16x64xf32> -> vector<16x64xf32>
    %111 = arith.addf %107, %110 : vector<16x64xf32>
    %112 = tpu.concatenate %42, %65, %88, %111 in 1 : vector<16x64xf32>, vector<16x64xf32>, vector<16x64xf32>, vector<16x64xf32> -> vector<16x256xf32>
    %113 = arith.truncf %112 : vector<16x256xf32> to vector<16x256xbf16>
    %c0_37 = arith.constant 0 : index
    %c0_38 = arith.constant 0 : index
    %114 = vector.load %arg7[%c0_37, %c0_38] : memref<256x256xbf16, #tpu.memory_space<vmem>>, vector<256x256xbf16>
    %cst_39 = arith.constant dense<0.000000e+00> : vector<16x256xf32>
    %115 = tpu.matmul %113, %114, %cst_39 {dimension_numbers = #tpu.dot_dimension_numbers<[1], [0], [0], [1], [0, 0, 1, 1], [], []>} : vector<16x256xbf16>, vector<256x256xbf16>, vector<16x256xf32> -> vector<16x256xf32>
    %c0_40 = arith.constant 0 : index
    %c0_41 = arith.constant 0 : index
    %116 = vector.load %arg8[%c0_40, %c0_41] : memref<1x256xf32, #tpu.memory_space<vmem>>, vector<1x256xf32>
    %117 = vector.broadcast %116 : vector<1x256xf32> to vector<16x256xf32>
    %118 = arith.addf %115, %117 : vector<16x256xf32>
    %119 = arith.extf %4 : vector<16x256xbf16> to vector<16x256xf32>
    %120 = arith.addf %119, %118 : vector<16x256xf32>
    %121 = vector.shape_cast %120 : vector<16x256xf32> to vector<1x16x256xf32>
    %cst_42 = arith.constant dense<0.000000e+00> : vector<1xf32>
    %122 = vector.multi_reduction <add>, %121, %cst_42 [1, 2] : vector<1x16x256xf32> to vector<1xf32>
    %123 = vector.shape_cast %122 : vector<1xf32> to vector<1x1x1xf32>
    %cst_43 = arith.constant 2.44140625E-4 : f32
    %124 = vector.broadcast %cst_43 : f32 to vector<1x1x1xf32>
    %125 = arith.mulf %123, %124 : vector<1x1x1xf32>
    %126 = vector.broadcast %125 : vector<1x1x1xf32> to vector<1x16x256xf32>
    %127 = arith.subf %121, %126 : vector<1x16x256xf32>
    %128 = arith.mulf %127, %127 : vector<1x16x256xf32>
    %cst_44 = arith.constant dense<0.000000e+00> : vector<1xf32>
    %129 = vector.multi_reduction <add>, %128, %cst_44 [1, 2] : vector<1x16x256xf32> to vector<1xf32>
    %130 = vector.shape_cast %129 : vector<1xf32> to vector<1x1x1xf32>
    %cst_45 = arith.constant 2.44140625E-4 : f32
    %131 = vector.broadcast %cst_45 : f32 to vector<1x1x1xf32>
    %132 = arith.mulf %130, %131 : vector<1x1x1xf32>
    %cst_46 = arith.constant 9.99999974E-6 : f32
    %133 = vector.broadcast %cst_46 : f32 to vector<1x1x1xf32>
    %134 = arith.addf %132, %133 : vector<1x1x1xf32>
    %135 = math.rsqrt %134 : vector<1x1x1xf32>
    %136 = vector.broadcast %135 : vector<1x1x1xf32> to vector<1x16x256xf32>
    %137 = arith.mulf %127, %136 : vector<1x16x256xf32>
    %c0_47 = arith.constant 0 : index
    %c0_48 = arith.constant 0 : index
    %138 = vector.load %arg11[%c0_47, %c0_48] : memref<16x256xf32, #tpu.memory_space<vmem>>, vector<16x256xf32>
    %139 = vector.shape_cast %138 : vector<16x256xf32> to vector<1x16x256xf32>
    %140 = arith.mulf %137, %139 : vector<1x16x256xf32>
    %c0_49 = arith.constant 0 : index
    %c0_50 = arith.constant 0 : index
    %141 = vector.load %arg12[%c0_49, %c0_50] : memref<16x256xf32, #tpu.memory_space<vmem>>, vector<16x256xf32>
    %142 = vector.shape_cast %141 : vector<16x256xf32> to vector<1x16x256xf32>
    %143 = arith.addf %140, %142 : vector<1x16x256xf32>
    %144 = vector.shape_cast %143 : vector<1x16x256xf32> to vector<16x256xf32>
    %145 = arith.truncf %144 : vector<16x256xf32> to vector<16x256xbf16>
    %c0_51 = arith.constant 0 : index
    %c0_52 = arith.constant 0 : index
    %146 = vector.load %arg13[%c0_51, %c0_52] : memref<256x1024xbf16, #tpu.memory_space<vmem>>, vector<256x1024xbf16>
    %cst_53 = arith.constant dense<0.000000e+00> : vector<16x1024xf32>
    %147 = tpu.matmul %145, %146, %cst_53 {dimension_numbers = #tpu.dot_dimension_numbers<[1], [0], [0], [1], [0, 0, 1, 1], [], []>} : vector<16x256xbf16>, vector<256x1024xbf16>, vector<16x1024xf32> -> vector<16x1024xf32>
    %c0_54 = arith.constant 0 : index
    %c0_55 = arith.constant 0 : index
    %148 = vector.load %arg14[%c0_54, %c0_55] : memref<1x1024xf32, #tpu.memory_space<vmem>>, vector<1x1024xf32>
    %149 = vector.broadcast %148 : vector<1x1024xf32> to vector<16x1024xf32>
    %150 = arith.addf %147, %149 : vector<16x1024xf32>
    %cst_56 = arith.constant 0.000000e+00 : f32
    %151 = vector.broadcast %cst_56 : f32 to vector<16x1024xf32>
    %152 = arith.maximumf %150, %151 : vector<16x1024xf32>
    %153 = arith.truncf %152 : vector<16x1024xf32> to vector<16x1024xbf16>
    %c0_57 = arith.constant 0 : index
    %c0_58 = arith.constant 0 : index
    %154 = vector.load %arg15[%c0_57, %c0_58] : memref<1024x256xbf16, #tpu.memory_space<vmem>>, vector<1024x256xbf16>
    %cst_59 = arith.constant dense<0.000000e+00> : vector<16x256xf32>
    %155 = tpu.matmul %153, %154, %cst_59 {dimension_numbers = #tpu.dot_dimension_numbers<[1], [0], [0], [1], [0, 0, 1, 1], [], []>} : vector<16x1024xbf16>, vector<1024x256xbf16>, vector<16x256xf32> -> vector<16x256xf32>
    %c0_60 = arith.constant 0 : index
    %c0_61 = arith.constant 0 : index
    %156 = vector.load %arg16[%c0_60, %c0_61] : memref<1x256xf32, #tpu.memory_space<vmem>>, vector<1x256xf32>
    %157 = vector.broadcast %156 : vector<1x256xf32> to vector<16x256xf32>
    %158 = arith.addf %155, %157 : vector<16x256xf32>
    %159 = arith.addf %144, %158 : vector<16x256xf32>
    %160 = vector.shape_cast %159 : vector<16x256xf32> to vector<1x16x256xf32>
    %c0_62 = arith.constant 0 : index
    %c0_63 = arith.constant 0 : index
    %c0_64 = arith.constant 0 : index
    %161 = vector.load %arg17[%c0_62, %c0_63, %c0_64] : memref<1x16x256xf32, #tpu.memory_space<vmem>>, vector<1x16x256xf32>
    tpu.vector_store %arg17[%c0_62, %c0_63, %c0_64], %160 {strides = array<i32>} : memref<1x16x256xf32, #tpu.memory_space<vmem>>, vector<1x16x256xf32>,
    return
  }
  func.func @transform_0(%arg0: i32) -> (i32, i32, i32) {
    %c0_i32 = arith.constant 0 : i32
    %c0_i32_0 = arith.constant 0 : i32
    %c0_i32_1 = arith.constant 0 : i32
    return %arg0, %c0_i32, %c0_i32_0 : i32, i32, i32
  }
  func.func @transform_1(%arg0: i32) -> (i32, i32) {
    %c0_i32 = arith.constant 0 : i32
    %c0_i32_0 = arith.constant 0 : i32
    %c0_i32_1 = arith.constant 0 : i32
    return %c0_i32, %c0_i32_0 : i32, i32
  }
  func.func @transform_2(%arg0: i32) -> (i32, i32) {
    %c0_i32 = arith.constant 0 : i32
    %c0_i32_0 = arith.constant 0 : i32
    %c0_i32_1 = arith.constant 0 : i32
    return %c0_i32, %c0_i32_0 : i32, i32
  }
  func.func @transform_3(%arg0: i32) -> (i32, i32) {
    %c0_i32 = arith.constant 0 : i32
    %c0_i32_0 = arith.constant 0 : i32
    %c0_i32_1 = arith.constant 0 : i32
    return %c0_i32, %c0_i32_0 : i32, i32
  }
  func.func @transform_4(%arg0: i32) -> (i32, i32) {
    %c0_i32 = arith.constant 0 : i32
    %c0_i32_0 = arith.constant 0 : i32
    %c0_i32_1 = arith.constant 0 : i32
    return %c0_i32, %c0_i32_0 : i32, i32
  }
  func.func @transform_5(%arg0: i32) -> (i32, i32) {
    %c0_i32 = arith.constant 0 : i32
    %c0_i32_0 = arith.constant 0 : i32
    %c0_i32_1 = arith.constant 0 : i32
    return %c0_i32, %c0_i32_0 : i32, i32
  }
  func.func @transform_6(%arg0: i32) -> (i32, i32) {
    %c0_i32 = arith.constant 0 : i32
    %c0_i32_0 = arith.constant 0 : i32
    %c0_i32_1 = arith.constant 0 : i32
    return %c0_i32, %c0_i32_0 : i32, i32
  }
  func.func @transform_7(%arg0: i32) -> (i32, i32) {
    %c0_i32 = arith.constant 0 : i32
    %c0_i32_0 = arith.constant 0 : i32
    %c0_i32_1 = arith.constant 0 : i32
    return %c0_i32, %c0_i32_0 : i32, i32
  }
  func.func @transform_8(%arg0: i32) -> i32 {
    %c0_i32 = arith.constant 0 : i32
    %c0_i32_0 = arith.constant 0 : i32
    return %c0_i32 : i32
  }
  func.func @transform_9(%arg0: i32) -> (i32, i32, i32) {
    %c0_i32 = arith.constant 0 : i32
    %c0_i32_0 = arith.constant 0 : i32
    %c0_i32_1 = arith.constant 0 : i32
    %c0_i32_2 = arith.constant 0 : i32
    return %c0_i32, %c0_i32_0, %c0_i32_1 : i32, i32, i32
  }
  func.func @transform_10(%arg0: i32) -> (i32, i32) {
    %c0_i32 = arith.constant 0 : i32
    %c0_i32_0 = arith.constant 0 : i32
    %c0_i32_1 = arith.constant 0 : i32
    return %c0_i32, %c0_i32_0 : i32, i32
  }
  func.func @transform_11(%arg0: i32) -> (i32, i32) {
    %c0_i32 = arith.constant 0 : i32
    %c0_i32_0 = arith.constant 0 : i32
    %c0_i32_1 = arith.constant 0 : i32
    return %c0_i32, %c0_i32_0 : i32, i32
  }
  func.func @transform_12(%arg0: i32) -> (i32, i32) {
    %c0_i32 = arith.constant 0 : i32
    %c0_i32_0 = arith.constant 0 : i32
    %c0_i32_1 = arith.constant 0 : i32
    return %c0_i32, %c0_i32_0 : i32, i32
  }
  func.func @transform_13(%arg0: i32) -> (i32, i32) {
    %c0_i32 = arith.constant 0 : i32
    %c0_i32_0 = arith.constant 0 : i32
    %c0_i32_1 = arith.constant 0 : i32
    return %c0_i32, %c0_i32_0 : i32, i32
  }
  func.func @transform_14(%arg0: i32) -> (i32, i32) {
    %c0_i32 = arith.constant 0 : i32
    %c0_i32_0 = arith.constant 0 : i32
    %c0_i32_1 = arith.constant 0 : i32
    return %c0_i32, %c0_i32_0 : i32, i32
  }
  func.func @transform_15(%arg0: i32) -> (i32, i32) {
    %c0_i32 = arith.constant 0 : i32
    %c0_i32_0 = arith.constant 0 : i32
    %c0_i32_1 = arith.constant 0 : i32
    return %c0_i32, %c0_i32_0 : i32, i32
  }
  func.func @transform_16(%arg0: i32) -> (i32, i32, i32) {
    %c0_i32 = arith.constant 0 : i32
    %c0_i32_0 = arith.constant 0 : i32
    %c0_i32_1 = arith.constant 0 : i32
    return %arg0, %c0_i32, %c0_i32_0 : i32, i32, i32
  }
}

</mosaic_0001>

<bundles_post_ra>
// kernel: tpu_custom_call.1
= control target key start
LH: loop header
LB: loop body
LE: loop exit
PB: predicated region body
PF: predicated region fallthrough
CT: control target
= control target key end

     0   :  { %s7136_s0 = inlined_call_operand.hbm [shape: bf16[2,16,256], index: 0, kind: input, shape index: {}]   ;;  %s7137_s1 = inlined_call_operand.hbm [shape: bf16[16,256], index: 1, kind: input, shape index: {}]   ;;  %s7138_s2 = inlined_call_operand.hbm [shape: bf16[256,512], index: 2, kind: input, shape index: {}]   ;;  %s7139_s3 = inlined_call_operand.hbm [shape: f32[1,512], index: 3, kind: input, shape index: {}]   ;;  %s7140_s4 = inlined_call_operand.hbm [shape: bf16[256,256], index: 4, kind: input, shape index: {}]   ;;  %s7141_s5 = inlined_call_operand.hbm [shape: f32[1,256], index: 5, kind: input, shape index: {}]   ;;  %s7142_s6 = inlined_call_operand.hbm [shape: bf16[256,256], index: 6, kind: input, shape index: {}]   ;;  %s7143_s7 = inlined_call_operand.hbm [shape: f32[1,256], index: 7, kind: input, shape index: {}]   ;;  %s7144_s8 = inlined_call_operand.vmem [shape: f32[4], index: 8, kind: input, shape index: {}]   ;;  %s7145_s9 = inlined_call_operand.hbm [shape: f32[4,16,16], index: 9, kind: input, shape index: {}]   ;;  %s7146_s10 = inlined_call_operand.vmem [shape: f32[16,256], index: 10, kind: input, shape index: {}]   ;;  %s7147_s11 = inlined_call_operand.hbm [shape: f32[16,256], index: 11, kind: input, shape index: {}]   ;;  %s7148_s12 = inlined_call_operand.hbm [shape: bf16[256,1024], index: 12, kind: input, shape index: {}]   ;;  %s7149_s13 = inlined_call_operand.vmem [shape: f32[1,1024], index: 13, kind: input, shape index: {}]   ;;  %s7150_s14 = inlined_call_operand.hbm [shape: bf16[1024,256], index: 14, kind: input, shape index: {}]   ;;  %s7151_s15 = inlined_call_operand.vmem [shape: f32[1,256], index: 15, kind: input, shape index: {}]   ;;  %s7152_s16 = inlined_call_operand.hbm [shape: f32[2,16,256], index: 16, kind: output, shape index: {}]  }
   0x1   :  { %7167 = sst [smem:[#allocation38_spill]] %s7136_s0 }
   0x2   :  { %7168 = sst [smem:[#allocation39_spill]] %s7137_s1 }
   0x3   :  { %7169 = sst [smem:[#allocation40_spill]] %s7138_s2 }
   0x4   :  { %7170 = sst [smem:[#allocation41_spill]] %s7139_s3 }
   0x5   :  { %7171 = sst [smem:[#allocation42_spill]] %s7146_s10 }
   0x6   :  { %7172 = sst [smem:[#allocation43_spill]] %s7149_s13 }
   0x7   :  { %7173 = sst [smem:[#allocation44_spill]] %s7151_s15 }
   0x8   :  { %7174 = sst [smem:[#allocation45_spill]] %s7152_s16 }
   0x9   :  { %21 = vsyncpa [#allocation3], 0 }
   0xa   :  { %23 = vsyncpa [#allocation3 + $0x1], 0 }
   0xb   :  { %24 = vsyncpa [#allocation7], 0 }
   0xc   :  { %25 = vsyncpa [#allocation10], 0 }
   0xd   :  { %26 = vsyncpa [#allocation13], 0 }
   0xe   :  { %27 = vsyncpa [#allocation16], 0 }
   0xf   :  { %28 = vsyncpa [#allocation5], 0 }
  0x10   :  { %29 = vsyncpa [#allocation20], 0 }
  0x11   :  { %30 = vsyncpa [#allocation23], 0 }
  0x12   :  { %31 = vsyncpa [#allocation4], 0 }
  0x13   :  { %33 = vsyncpa [#allocation4 + $0x1], 0  ;;  %s6409_s21 = smov 0   ;;  %s6411_s22 = smov 0  }
  0x14   :  { %s6413_s23 = smov 0   ;;  %s6415_s24 = smov 0  }
  0x15 LB: > { %7175 = sst [smem:[#allocation35_spill]] %s6285_s21  ;;  %s6299_s25 = smov [#allocation6]   ;;  %s6297_s24 = sphi %s6415_s24, %s7224_s24   ;;  %s6293_s23 = sphi %s6413_s23, %s7223_s23   ;;  %s6289_s22 = sphi %s6411_s22, %s7222_s22   ;;  %s6285_s21 = sphi %s6409_s21, %s7221_s21  }
  0x16   : > { %s423_s26 = sshll.u32 %s6299_s25, 4  ;;  %s6430_s27 = sadd.s32 4294967295, %s6297_s24   ;;  %s6435_s26 = int_to_ptr.vmem [resolvable:$true] %s423_s26 }
  0x17   : > { %7176 = sst [smem:[#allocation36_spill]] %s6430_s27  ;;  %p4666_p0 = scmp.ge.s32.totalorder %s6297_s24, 1 }
  0x18   : > { %p7160_p1 = scmp.eq.s32.totalorder %s6430_s27, 0  ;;  %p411_p2 = scmp.lt.s32.totalorder %s6297_s24, 3 }
  0x19   : > { %s6300_s29 = smov [#allocation9]   ;;  %s6301_s17 = smov [#allocation12]  }
  0x1a   : > { %p6437_p3 = pnand %p4666_p0, %p411_p2  ;;  %s450_s30 = sshll.u32 %s6300_s29, 4  ;;  %s6450_s30 = int_to_ptr.vmem [resolvable:$true] %s450_s30 }
  0x1b   : > { %s474_s18 = sshll.u32 %s6301_s17, 4  ;;  %s7180_s1 = sld [smem:[#allocation39_spill]]  ;;  %s6452_s18 = int_to_ptr.vmem [resolvable:$true] %s474_s18 }
  0x1c   : > { %s7177_s28 = scalar_select %p6437_p3, 1, 0 }
  0x1d   : > { %p5288_p5 = pneg %p6437_p3 }
  0x1e   : > { %7178 = sst [smem:[#allocation37_spill]] %s7177_s28 }
  0x1f   : > { %p6446_p6 = pnand %p5288_p5, %p7160_p1 }
  0x21   : > { %s5846_s25 = scalar_lea.hbm %s7180_s1, 256  ;;  %p6462_p8 = pneg %p6446_p6 }
  0x22   : > { %p5847_p7 = scmp.ne.s32.totalorder %s7180_s1, %s5846_s25  ;;  %p5853_p11 = scmp.lt.u32.totalorder %s5846_s25, %s7180_s1 }
  0x24   : > { %p5849_p9 = pnand %p6462_p8, %p5847_p7 }
  0x26   : > { %p5850_p10 = pneg %p5849_p9 }
  0x28   : > { %p5855_p12 = pnand %p5853_p11, %p5850_p10 }
  0x2a   : > { %5858 = shalt.err (!%p5855_p12)
}
  0x2b   : > { %s5859_s15 = scalar_lea.vmem %s6435_s26, 256  ;;  %p5867_p5 = scmp.lt.s32.totalorder %s6435_s26, %s6435_s26 }
  0x2c   : > { %p5860_p13 = scmp.ne.s32.totalorder %s6435_s26, %s5859_s15  ;;  %p5868_p4 = scmp.lt.s32.totalorder %s5859_s15, %s5859_s15 }
  0x2e   : > { %p5862_p0 = pnand %p5860_p13, %p6462_p8  ;;  %p5869_p7 = por %p5868_p4, %p5867_p5 }
  0x30   : > { %p5863_p2 = pneg %p5862_p0 }
  0x32   : > { %p5870_p9 = pnand %p5869_p7, %p5863_p2 }
  0x34   : > { %5873 = shalt.err (!%p5870_p9)
}
  0x35   : > { %s7162_s16 = smov 128   ;;  %s7164_s13 = smov 8  }
  0x36   : > { %5291 = dma.hbm_to_vmem [thread:$0]  (!%p6446_p6), %s7180_s1, 256, %s6435_s26, [#allocation7], %s7162_s16, %s7162_s16, %s7164_s13  }
  0x37   : > { %s7182_s3 = sld [smem:[#allocation41_spill]] }
  0x3d   : > { %s5874_s15 = scalar_lea.hbm %s7182_s3, 64 }
  0x3e   : > { %p5875_p4 = scmp.ne.s32.totalorder %s7182_s3, %s5874_s15  ;;  %p5881_p12 = scmp.lt.u32.totalorder %s5874_s15, %s7182_s3 }
  0x40   : > { %p5877_p10 = pnand %p5875_p4, %p6462_p8 }
  0x42   : > { %p5878_p11 = pneg %p5877_p10 }
  0x44   : > { %p5883_p13 = pnand %p5881_p12, %p5878_p11 }
  0x46   : > { %5886 = shalt.err (!%p5883_p13)
}
  0x47   : > { %s5887_s26 = scalar_lea.vmem %s6450_s30, 64  ;;  %p5895_p7 = scmp.lt.s32.totalorder %s6450_s30, %s6450_s30 }
  0x48   : > { %p5888_p0 = scmp.ne.s32.totalorder %s6450_s30, %s5887_s26  ;;  %p5896_p9 = scmp.lt.s32.totalorder %s5887_s26, %s5887_s26 }
  0x4a   : > { %p5890_p2 = pnand %p5888_p0, %p6462_p8  ;;  %p5897_p4 = por %p5896_p9, %p5895_p7 }
  0x4c   : > { %p5891_p5 = pneg %p5890_p2 }
  0x4e   : > { %p5898_p10 = pnand %p5897_p4, %p5891_p5 }
  0x50   : > { %5901 = shalt.err (!%p5898_p10)
}
  0x51   : > { %5297 = dma.hbm_to_vmem [thread:$0]  (!%p6446_p6), %s7182_s3, 64, %s6450_s30, [#allocation10]  }
  0x52   : > { %s5902_s19 = scalar_lea.hbm %s7141_s5, 32 }
  0x53   : > { %p5903_p11 = scmp.ne.s32.totalorder %s7141_s5, %s5902_s19  ;;  %p5909_p0 = scmp.lt.u32.totalorder %s5902_s19, %s7141_s5 }
  0x55   : > { %p5905_p12 = pnand %p5903_p11, %p6462_p8 }
  0x57   : > { %p5906_p13 = pneg %p5905_p12 }
  0x59   : > { %p5911_p2 = pnand %p5909_p0, %p5906_p13 }
  0x5b   : > { %5914 = shalt.err (!%p5911_p2)
}
  0x5c   : > { %s5915_s30 = scalar_lea.vmem %s6452_s18, 32  ;;  %p5923_p4 = scmp.lt.s32.totalorder %s6452_s18, %s6452_s18 }
  0x5d   : > { %p5916_p5 = scmp.ne.s32.totalorder %s6452_s18, %s5915_s30  ;;  %p5924_p10 = scmp.lt.s32.totalorder %s5915_s30, %s5915_s30 }
  0x5f   : > { %p5918_p7 = pnand %p5916_p5, %p6462_p8  ;;  %p5925_p11 = por %p5924_p10, %p5923_p4 }
  0x61   : > { %p5919_p9 = pneg %p5918_p7 }
  0x63   : > { %p5926_p12 = pnand %p5925_p11, %p5919_p9 }
  0x65   : > { %5929 = shalt.err (!%p5926_p12)
}
  0x66   : > { %5303 = dma.hbm_to_vmem [thread:$0]  (!%p6446_p6), %s7141_s5, 32, %s6452_s18, [#allocation13]  }
  0x67   : > { %s6304_s21 = smov [#allocation15]   ;;  %s5930_s20 = scalar_lea.hbm %s7143_s7, 32 }
  0x68   : > { %s498_s27 = sshll.u32 %s6304_s21, 4  ;;  %p5931_p13 = scmp.ne.s32.totalorder %s7143_s7, %s5930_s20  ;;  %s499_s27 = int_to_ptr.vmem [resolvable:$true] %s498_s27 }
  0x69   : > { %p5937_p5 = scmp.lt.u32.totalorder %s5930_s20, %s7143_s7 }
  0x6a   : > { %p5933_p0 = pnand %p5931_p13, %p6462_p8 }
  0x6c   : > { %p5934_p2 = pneg %p5933_p0 }
  0x6e   : > { %p5939_p7 = pnand %p5937_p5, %p5934_p2 }
  0x70   : > { %5942 = shalt.err (!%p5939_p7)
}
  0x71   : > { %s5943_s18 = scalar_lea.vmem %s499_s27, 32  ;;  %p5951_p11 = scmp.lt.s32.totalorder %s499_s27, %s499_s27 }
  0x72   : > { %p5944_p9 = scmp.ne.s32.totalorder %s499_s27, %s5943_s18  ;;  %p5952_p12 = scmp.lt.s32.totalorder %s5943_s18, %s5943_s18 }
  0x74   : > { %p5946_p4 = pnand %p5944_p9, %p6462_p8  ;;  %p5953_p1 = por %p5952_p12, %p5951_p11 }
  0x76   : > { %p5947_p10 = pneg %p5946_p4 }
  0x78   : > { %p5954_p3 = pnand %p5953_p1, %p5947_p10 }
  0x7a   : > { %5957 = shalt.err (!%p5954_p3)
}
  0x7b   : > { %5309 = dma.hbm_to_vmem [thread:$0]  (!%p6446_p6), %s7143_s7, 32, %s499_s27, [#allocation16]  }
  0x7c   : > { %s6305_s21 = smov [#allocation19]   ;;  %s6306_s19 = smov [#allocation8]  }
  0x7d   : > { %s535_s28 = sshll.u32 %s6305_s21, 4  ;;  %s436_s20 = sshll.u32 %s6306_s19, 4  ;;  %s536_s28 = int_to_ptr.vmem [resolvable:$true] %s535_s28  ;;  %s6550_s20 = int_to_ptr.vmem [resolvable:$true] %s436_s20 }
  0x7e   : > { %s5958_s15 = scalar_lea.hbm %s7147_s11, 512 }
  0x7f   : > { %p5959_p1 = scmp.ne.s32.totalorder %s7147_s11, %s5958_s15  ;;  %p5965_p0 = scmp.lt.u32.totalorder %s5958_s15, %s7147_s11 }
  0x81   : > { %p5961_p3 = pnand %p5959_p1, %p6462_p8 }
  0x83   : > { %p5962_p13 = pneg %p5961_p3 }
  0x85   : > { %p5967_p2 = pnand %p5965_p0, %p5962_p13 }
  0x87   : > { %5970 = shalt.err (!%p5967_p2)
}
  0x88   : > { %s5971_s10 = scalar_lea.vmem %s536_s28, 512  ;;  %p5979_p4 = scmp.lt.s32.totalorder %s536_s28, %s536_s28 }
  0x89   : > { %p5972_p5 = scmp.ne.s32.totalorder %s536_s28, %s5971_s10  ;;  %p5980_p10 = scmp.lt.s32.totalorder %s5971_s10, %s5971_s10 }
  0x8b   : > { %p5974_p7 = pnand %p5972_p5, %p6462_p8  ;;  %p5981_p11 = por %p5980_p10, %p5979_p4 }
  0x8d   : > { %p5975_p9 = pneg %p5974_p7 }
  0x8f   : > { %p5982_p12 = pnand %p5981_p11, %p5975_p9 }
  0x91   : > { %5985 = shalt.err (!%p5982_p12)
}
  0x92   : > { %s6307_s21 = smov 256   ;;  %s6308_s19 = smov 16  }
  0x93   : > { %5318 = dma.hbm_to_vmem [thread:$0]  (!%p6446_p6), %s7147_s11, 512, %s536_s28, [#allocation20], %s6307_s21, %s6307_s21, %s6308_s19  }
  0x94   : > { %s7183_s2 = sld [smem:[#allocation40_spill]] }
  0x9a   : > { %s5986_s18 = scalar_lea.hbm %s7183_s2, 8192 }
  0x9b   : > { %p5987_p1 = scmp.ne.s32.totalorder %s7183_s2, %s5986_s18  ;;  %p5993_p0 = scmp.lt.u32.totalorder %s5986_s18, %s7183_s2 }
  0x9d   : > { %p5989_p3 = pnand %p5987_p1, %p6462_p8 }
  0x9f   : > { %p5990_p13 = pneg %p5989_p3 }
  0xa1   : > { %p5995_p2 = pnand %p5993_p0, %p5990_p13 }
  0xa3   : > { %5998 = shalt.err (!%p5995_p2)
}
  0xa4   : > { %s5999_s28 = scalar_lea.vmem %s6550_s20, 8192  ;;  %p6007_p4 = scmp.lt.s32.totalorder %s6550_s20, %s6550_s20 }
  0xa5   : > { %p6000_p5 = scmp.ne.s32.totalorder %s6550_s20, %s5999_s28  ;;  %p6008_p10 = scmp.lt.s32.totalorder %s5999_s28, %s5999_s28 }
  0xa7   : > { %p6002_p7 = pnand %p6000_p5, %p6462_p8  ;;  %p6009_p11 = por %p6008_p10, %p6007_p4 }
  0xa9   : > { %p6003_p9 = pneg %p6002_p7 }
  0xab   : > { %p6010_p12 = pnand %p6009_p11, %p6003_p9 }
  0xad   : > { %6013 = shalt.err (!%p6010_p12)
}
  0xae   : > { %5294 = dma.hbm_to_vmem [thread:$0]  (!%p6446_p6), %s7183_s2, 8192, %s6550_s20, [#allocation7], %s6307_s21, %s6307_s21, %s6308_s19  }
  0xaf   : > { %s6309_s17 = smov [#allocation11]   ;;  %s6310_s30 = smov [#allocation14]  }
  0xb0   : > { %s460_s15 = sshll.u32 %s6309_s17, 4  ;;  %s484_s18 = sshll.u32 %s6310_s30, 4  ;;  %s461_s15 = int_to_ptr.vmem [resolvable:$true] %s460_s15  ;;  %s6593_s18 = int_to_ptr.vmem [resolvable:$true] %s484_s18 }
  0xb1   : > { %s6014_s10 = scalar_lea.hbm %s7140_s4, 4096 }
  0xb2   : > { %p6015_p1 = scmp.ne.s32.totalorder %s7140_s4, %s6014_s10  ;;  %p6021_p0 = scmp.lt.u32.totalorder %s6014_s10, %s7140_s4 }
  0xb4   : > { %p6017_p3 = pnand %p6015_p1, %p6462_p8 }
  0xb6   : > { %p6018_p13 = pneg %p6017_p3 }
  0xb8   : > { %p6023_p2 = pnand %p6021_p0, %p6018_p13 }
  0xba   : > { %6026 = shalt.err (!%p6023_p2)
}
  0xbb   : > { %s6027_s21 = scalar_lea.vmem %s461_s15, 4096  ;;  %p6035_p4 = scmp.lt.s32.totalorder %s461_s15, %s461_s15 }
  0xbc   : > { %p6028_p5 = scmp.ne.s32.totalorder %s461_s15, %s6027_s21  ;;  %p6036_p10 = scmp.lt.s32.totalorder %s6027_s21, %s6027_s21 }
  0xbe   : > { %p6030_p7 = pnand %p6028_p5, %p6462_p8  ;;  %p6037_p11 = por %p6036_p10, %p6035_p4 }
  0xc0   : > { %p6031_p9 = pneg %p6030_p7 }
  0xc2   : > { %p6038_p12 = pnand %p6037_p11, %p6031_p9 }
  0xc4   : > { %6041 = shalt.err (!%p6038_p12)
}
  0xc5   : > { %s7184_s13 = smov 8   ;;  %s7185_s19 = smov 128  }
  0xc6   : > { %5300 = dma.hbm_to_vmem [thread:$0]  (!%p6446_p6), %s7140_s4, 4096, %s461_s15, [#allocation10], %s7185_s19, %s7185_s19, %s7184_s13  }
  0xc7   : > { %s6042_s27 = scalar_lea.hbm %s7142_s6, 4096 }
  0xc8   : > { %p6043_p1 = scmp.ne.s32.totalorder %s7142_s6, %s6042_s27  ;;  %p6049_p0 = scmp.lt.u32.totalorder %s6042_s27, %s7142_s6 }
  0xca   : > { %p6045_p3 = pnand %p6043_p1, %p6462_p8 }
  0xcc   : > { %p6046_p13 = pneg %p6045_p3 }
  0xce   : > { %p6051_p2 = pnand %p6049_p0, %p6046_p13 }
  0xd0   : > { %6054 = shalt.err (!%p6051_p2)
}
  0xd1   : > { %s6055_s15 = scalar_lea.vmem %s6593_s18, 4096  ;;  %p6063_p4 = scmp.lt.s32.totalorder %s6593_s18, %s6593_s18 }
  0xd2   : > { %p6056_p5 = scmp.ne.s32.totalorder %s6593_s18, %s6055_s15  ;;  %p6064_p10 = scmp.lt.s32.totalorder %s6055_s15, %s6055_s15 }
  0xd4   : > { %p6058_p7 = pnand %p6056_p5, %p6462_p8  ;;  %p6065_p11 = por %p6064_p10, %p6063_p4 }
  0xd6   : > { %p6059_p9 = pneg %p6058_p7 }
  0xd8   : > { %p6066_p12 = pnand %p6065_p11, %p6059_p9 }
  0xda   : > { %6069 = shalt.err (!%p6066_p12)
}
  0xdb   : > { %5306 = dma.hbm_to_vmem [thread:$0]  (!%p6446_p6), %s7142_s6, 4096, %s6593_s18, [#allocation13], %s7185_s19, %s7185_s19, %s7184_s13  }
  0xdc   : > { %s509_s26 = sshll.u32 %s7144_s8, 4  ;;  %s510_s26 = int_to_ptr.vmem [resolvable:$true] %s509_s26 }
  0xdd   : > { %s6070_s27 = scalar_lea.vmem %s510_s26, 16  ;;  %p6078_p0 = scmp.lt.s32.totalorder %s510_s26, %s510_s26 }
  0xde   : > { %p6071_p1 = scmp.ne.s32.totalorder %s510_s26, %s6070_s27  ;;  %p6079_p2 = scmp.lt.s32.totalorder %s6070_s27, %s6070_s27 }
  0xe0   : > { %p6073_p3 = pnand %p6071_p1, %p6462_p8  ;;  %p6080_p5 = por %p6079_p2, %p6078_p0 }
  0xe2   : > { %p6074_p13 = pneg %p6073_p3 }
  0xe4   : > { %p6081_p7 = pnand %p6080_p5, %p6074_p13 }
  0xe6   : > { %6084 = shalt.err (!%p6081_p7)
}
  0xe7   : > { %s6311_s10 = smov [#allocation17]   ;;  %s6312_s18 = smov [#allocation18]  }
  0xe8   : > { %5312 = dma.vmem_to_smem (!%p6446_p6), %s510_s26, 16, %s6311_s10, [#allocation5]  }
  0xe9   : > { %s519_s28 = sshll.u32 %s6312_s18, 4  ;;  %s6313_s16 = smov [#allocation21]   ;;  %s520_s28 = int_to_ptr.vmem [resolvable:$true] %s519_s28 }
  0xea   : > { %s548_s20 = sshll.u32 %s6313_s16, 4  ;;  %s6085_s25 = scalar_lea.hbm %s7145_s9, 1024  ;;  %s549_s20 = int_to_ptr.vmem [resolvable:$true] %s548_s20 }
  0xeb   : > { %p6086_p9 = scmp.ne.s32.totalorder %s7145_s9, %s6085_s25  ;;  %p6092_p11 = scmp.lt.u32.totalorder %s6085_s25, %s7145_s9 }
  0xed   : > { %p6088_p4 = pnand %p6086_p9, %p6462_p8 }
  0xef   : > { %p6089_p10 = pneg %p6088_p4 }
  0xf1   : > { %p6094_p12 = pnand %p6092_p11, %p6089_p10 }
  0xf3   : > { %6097 = shalt.err (!%p6094_p12)
}
  0xf4   : > { %s6098_s26 = scalar_lea.vmem %s520_s28, 1024  ;;  %p6106_p0 = scmp.lt.s32.totalorder %s520_s28, %s520_s28 }
  0xf5   : > { %p6099_p1 = scmp.ne.s32.totalorder %s520_s28, %s6098_s26  ;;  %p6107_p2 = scmp.lt.s32.totalorder %s6098_s26, %s6098_s26 }
  0xf7   : > { %p6101_p3 = pnand %p6099_p1, %p6462_p8  ;;  %p6108_p5 = por %p6107_p2, %p6106_p0 }
  0xf9   : > { %p6102_p13 = pneg %p6101_p3 }
  0xfb   : > { %p6109_p7 = pnand %p6108_p5, %p6102_p13 }
  0xfd   : > { %6112 = shalt.err (!%p6109_p7)
}
  0xfe   : > { %5315 = dma.hbm_to_vmem [thread:$0]  (!%p6446_p6), %s7145_s9, 1024, %s520_s28, [#allocation16], %s7185_s19, %s7185_s19, %s7184_s13  }
  0xff   : > { %s6113_s15 = scalar_lea.hbm %s7148_s12, 16384 }
 0x100   : > { %p6114_p9 = scmp.ne.s32.totalorder %s7148_s12, %s6113_s15  ;;  %p6120_p11 = scmp.lt.u32.totalorder %s6113_s15, %s7148_s12 }
 0x102   : > { %p6116_p4 = pnand %p6114_p9, %p6462_p8 }
 0x104   : > { %p6117_p10 = pneg %p6116_p4 }
 0x106   : > { %p6122_p12 = pnand %p6120_p11, %p6117_p10 }
 0x108   : > { %6125 = shalt.err (!%p6122_p12)
}
 0x109   : > { %s6126_s27 = scalar_lea.vmem %s549_s20, 16384  ;;  %p6134_p0 = scmp.lt.s32.totalorder %s549_s20, %s549_s20 }
 0x10a   : > { %p6127_p1 = scmp.ne.s32.totalorder %s549_s20, %s6126_s27  ;;  %p6135_p2 = scmp.lt.s32.totalorder %s6126_s27, %s6126_s27 }
 0x10c   : > { %p6129_p3 = pnand %p6127_p1, %p6462_p8  ;;  %p6136_p5 = por %p6135_p2, %p6134_p0 }
 0x10e   : > { %p6130_p13 = pneg %p6129_p3 }
 0x110   : > { %p6137_p7 = pnand %p6136_p5, %p6130_p13 }
 0x112   : > { %6140 = shalt.err (!%p6137_p7)
}
 0x113   : > { %s6314_s28 = smov 512   ;;  %s6315_s26 = smov 32  }
 0x114   : > { %5321 = dma.hbm_to_vmem [thread:$0]  (!%p6446_p6), %s7148_s12, 16384, %s549_s20, [#allocation20], %s6314_s28, %s6314_s28, %s6315_s26  }
 0x115   : > { %s6316_s18 = smov [#allocation22]   ;;  %s6141_s25 = scalar_lea.hbm %s7150_s14, 16384 }
 0x116   : > { %s564_s16 = sshll.u32 %s6316_s18, 4  ;;  %p6142_p9 = scmp.ne.s32.totalorder %s7150_s14, %s6141_s25  ;;  %s565_s16 = int_to_ptr.vmem [resolvable:$true] %s564_s16 }
 0x117   : > { %p6148_p11 = scmp.lt.u32.totalorder %s6141_s25, %s7150_s14 }
 0x118   : > { %p6144_p4 = pnand %p6142_p9, %p6462_p8 }
 0x11a   : > { %p6145_p10 = pneg %p6144_p4 }
 0x11c   : > { %p6150_p12 = pnand %p6148_p11, %p6145_p10 }
 0x11e   : > { %6153 = shalt.err (!%p6150_p12)
}
 0x11f   : > { %s6154_s20 = scalar_lea.vmem %s565_s16, 16384  ;;  %p6162_p0 = scmp.lt.s32.totalorder %s565_s16, %s565_s16 }
 0x120   : > { %p6155_p1 = scmp.ne.s32.totalorder %s565_s16, %s6154_s20  ;;  %p6163_p2 = scmp.lt.s32.totalorder %s6154_s20, %s6154_s20 }
 0x122   : > { %p6157_p3 = pnand %p6155_p1, %p6462_p8  ;;  %p6164_p5 = por %p6163_p2, %p6162_p0 }
 0x124   : > { %p6158_p13 = pneg %p6157_p3 }
 0x126   : > { %p6165_p7 = pnand %p6164_p5, %p6158_p13 }
 0x128   : > { %6168 = shalt.err (!%p6165_p7)
}
 0x129   : > { %s7186_s29 = sld [smem:[#allocation35_spill]]  ;;  %s7187_s26 = sld [smem:[#allocation36_spill]] }
 0x12a   : > { %5324 = dma.hbm_to_vmem [thread:$0]  (!%p6446_p6), %s7150_s14, 16384, %s565_s16, [#allocation23], %s7185_s19, %s7185_s19, %s7184_s13  }
 0x12b   : > { %s4665_s0 = sadd.s32 4294967294, %s6297_s24   ;;  %s6711_s1 = sadd.s32 1, %s6297_s24  }
 0x12c   : > { %s43_s10 = ssub.s32 %s6297_s24, %s6711_s1  ;;  %s46_s18 = sadd.s32 1, %s6293_s23 }
 0x12d   : > { %p44_p8 = scmp.eq.s32.totalorder %s43_s10, 0  ;;  %p53_p9 = scmp.ne.s32.totalorder %s6293_s23, %s6289_s22 }
 0x12e   : > { %p54_p4 = scmp.eq.s32.totalorder %s6297_s24, 0  ;;  %p404_p3 = scmp.eq.s32.totalorder %s4665_s0, 1 }
 0x12f   : > { %p59_p10 = scmp.ne.s32.totalorder %s6289_s22, %s7186_s29  ;;  %p7189_p12 = scmp.eq.s32.totalorder %s7187_s26, 0 }
 0x130   : > { %s6722_s15 = scalar_select %p44_p8, %s6293_s23, %s46_s18  }
 0x131   : > { %p6724_p11 = por %p54_p4, %p53_p9  ;;  %p6730_p6 = por %p7189_p12, %p59_p10 }
 0x132   : > { %p398_p1 = scmp.eq.s32.totalorder %s7187_s26, 1  ;;  %p5345_p13 = scmp.lt.s32.totalorder %s6297_s24, 2 }
 0x133   : > { %s581_s25 = sand.u32 1, %s6293_s23   ;;  %p6741_p2 = por %p404_p3, %p59_p10 }
 0x134   : > { %p6737_p0 = por %p398_p1, %p53_p9  ;;  %s4680_s27 = sshll.u32 %s581_s25, 4 }
 0x135   : > { %s7192_s30 = scalar_select %p6741_p2, 1, 0 }
 0x136   : > { %s7191_s17 = scalar_select %p6737_p0, 1, 0 }
 0x137   : > { %s5106_s20 = sshll.u32 %s6297_s24, 8  ;;  %s7193_s29 = sld [smem:[#allocation38_spill]] }
 0x138   : > { %s585_s26 = scalar_lea.vmem [#allocation2], %s4680_s27  ;;  %p6755_p5 = pnand %p5345_p13, %p6724_p11 }
 0x139   : > { %s592_s0 = sshll.u32 %s585_s26, 4  ;;  %s6759_s3 = scalar_lea.sflag [#allocation3], %s581_s25  ;;  %s6751_s0 = int_to_ptr.vmem [resolvable:$true] %s592_s0 }
 0x13a   : > { %p6171_p8 = pneg %p6755_p5 }
 0x13d   : > { %s6749_s10 = scalar_lea.hbm %s7193_s29, %s5106_s20  ;;  %s6174_s21 = scalar_lea.hbm %s7193_s29, 512 }
 0x13e   : > { %s6169_s2 = scalar_lea.hbm %s6749_s10, 256  ;;  %p6175_p10 = scmp.lt.u32.totalorder %s6749_s10, %s7193_s29 }
 0x13f   : > { %p6170_p7 = scmp.ne.s32.totalorder %s6749_s10, %s6169_s2  ;;  %p6176_p11 = scmp.lt.u32.totalorder %s6174_s21, %s6169_s2 }
 0x140   : > { %p6178_p1 = scmp.lt.u32.totalorder %s6169_s2, %s6749_s10 }
 0x141   : > { %p6172_p9 = pnand %p6171_p8, %p6170_p7  ;;  %p6177_p12 = por %p6176_p11, %p6175_p10 }
 0x143   : > { %p6173_p4 = pneg %p6172_p9  ;;  %p6179_p3 = por %p6178_p1, %p6177_p12 }
 0x145   : > { %p6180_p13 = pnand %p6179_p3, %p6173_p4 }
 0x147   : > { %6183 = shalt.err (!%p6180_p13)
}
 0x148   : > { %s6184_s25 = scalar_lea.vmem %s6751_s0, 256  ;;  %s6317_s27 = smov [#allocation2]  }
 0x149   : > { %p6185_p7 = scmp.ne.s32.totalorder %s6751_s0, %s6184_s25  ;;  %s6189_s20 = sshll.u32 %s6317_s27, 4  ;;  %s6190_s20 = int_to_ptr.vmem [resolvable:$false] %s6189_s20 }
 0x14a   : > { %s6191_s28 = scalar_lea.vmem %s6190_s20, 512  ;;  %p6192_p0 = scmp.lt.s32.totalorder %s6751_s0, %s6190_s20 }
 0x14b   : > { %p6187_p9 = pnand %p6185_p7, %p6171_p8  ;;  %p6193_p10 = scmp.lt.s32.totalorder %s6191_s28, %s6184_s25 }
 0x14d   : > { %p6188_p2 = pneg %p6187_p9  ;;  %p6194_p11 = por %p6193_p10, %p6192_p0 }
 0x14f   : > { %p6195_p12 = pnand %p6194_p11, %p6188_p2 }
 0x151   : > { %6198 = shalt.err (!%p6195_p12)
}
 0x152   : > { %5328 = dma.hbm_to_vmem [thread:$0]  (!%p6755_p5), %s6749_s10, 256, %s6751_s0, %s6759_s3, %s7185_s19, %s7185_s19, %s7184_s13  }
 0x153   : > { %s7195_s2 = sld [smem:[#allocation37_spill]] }
 0x159   : > { %p7196_p8 = scmp.ne.s32.totalorder %s7195_s2, 0 }
 0x15a   : > { %s6793_s21 = sand.u32 (!%p7196_p8), 1, %s6289_s22  }
 0x15b   : > { %604 = sbr.rel (%p7196_p8) target bundleno = 3371 (0xd2b), region = 84  ;;  %s4684_s26 = sshll.u32 (!%p7196_p8), %s6793_s21, 4 }
 0x15c   : > { %s607_s25 = scalar_lea.sflag (!%p7196_p8), [#allocation3], %s6793_s21  ;;  %s6797_s27 = scalar_lea.vmem (!%p7196_p8), [#allocation2], %s4684_s26 }
 0x162   : > { %6244 = dma.done.wait (%p6730_p6), %s607_s25, 256  }
 0x163   : > { %6246 = vsyncadd (%p6730_p6), %s607_s25, 4294967040  ;;  %s7197_s18 = sld [smem:[#allocation36_spill]] }
 0x169   : > { %p7198_p0 = scmp.eq.s32.totalorder %s7197_s18, 0 }
 0x16b   : > { %6248 = dma.done.wait (%p7198_p0), [#allocation7], 8448   ;;  %p7199_p2 = pmov %p7198_p0 }
 0x16c   : > { %p7200_p5 = pmov %p7198_p0 }
 0x16d   : > { %6250 = vsyncadd (%p7199_p2), [#allocation7], 4294958848 }
 0x16e   : > { %6252 = dma.done.wait (%p7200_p5), [#allocation10], 4160   ;;  %p7201_p4 = pmov %p7198_p0 }
 0x16f   : > { %p7202_p1 = pmov %p7198_p0 }
 0x170   : > { %6254 = vsyncadd (%p7201_p4), [#allocation10], 4294963136 }
 0x171   : > { %6256 = dma.done.wait (%p7202_p1), [#allocation13], 4128   ;;  %p7203_p3 = pmov %p7198_p0 }
 0x172   : > { %p7204_p6 = pmov %p7198_p0 }
 0x173   : > { %6258 = vsyncadd (%p7203_p3), [#allocation13], 4294963168 }
 0x174   : > { %6260 = dma.done.wait (%p7204_p6), [#allocation16], 32   ;;  %p7205_p13 = pmov %p7198_p0 }
 0x175   : > { %p7206_p7 = pmov %p7198_p0 }
 0x176   : > { %6262 = vsyncadd (%p7205_p13), [#allocation16], 4294967264 }
 0x177   : > { %6264 = dma.done.wait (%p7206_p7), [#allocation5], 16   ;;  %p7207_p9 = pmov %p7198_p0 }
 0x178   : > { %p7208_p10 = pmov %p7198_p0 }
 0x179   : > { %6266 = vsyncadd (%p7207_p9), [#allocation5], 4294967280 }
 0x17a   : > { %6268 = dma.done.wait (%p7208_p10), [#allocation16], 1024   ;;  %p7209_p11 = pmov %p7198_p0 }
 0x17b   : > { %p7210_p12 = pmov %p7198_p0 }
 0x17c   : > { %6270 = vsyncadd (%p7209_p11), [#allocation16], 4294966272 }
 0x17d   : > { %6272 = dma.done.wait (%p7210_p12), [#allocation20], 16896   ;;  %p7211_p8 = pmov %p7198_p0 }
 0x17f   : > { %6274 = vsyncadd (%p7211_p8), [#allocation20], 4294950400 }
 0x180   : > { %6276 = dma.done.wait (%p7198_p0), [#allocation23], 16384   ;;  %p7212_p2 = pmov %p7198_p0 }
 0x182   : > { %6278 = vsyncadd (%p7212_p2), [#allocation23], 4294950912 }
 0x183   : > { %663 = sfence }
 0x184   : > { %v5424_v0 = vld [vmem:[#allocation8 + $0x4] ss:$16 sps:$4 sm:$0xff]   ;;  %v5426_v1 = vld [vmem:[#allocation8] ss:$16 sps:$4 sm:$0xff]   ;;  %v6839_v14 = vld [vmem:[%s6797_s27 + $0x8] sm:$0xff]  ;;  %vm6319_vm0 = vmmov 0  }
 0x185   : > { %1131 = vmatprep.subr.bf16.mxu1 %v5424_v0  ;;  %v5427_v2 = vld [vmem:[#allocation8 + $0x24] ss:$16 sps:$4 sm:$0xff]   ;;  %v5429_v3 = vld [vmem:[#allocation8 + $0x20] ss:$16 sps:$4 sm:$0xff]   ;;  %v712_v16 = vld [vmem:[#allocation6 + $0x8] sm:$0xff]  ;;  %vm1492_vm1 = vcmask 523264  }
 0x186   : > { %1132 = vmatpush1.bf16.msra.mxu1 %v5426_v1  ;;  %v5430_v4 = vld [vmem:[#allocation8 + $0x44] ss:$16 sps:$4 sm:$0xff]   ;;  %v5432_v5 = vld [vmem:[#allocation8 + $0x40] ss:$16 sps:$4 sm:$0xff]   ;;  %v714_v19 = vadd.bf16 %v712_v16, %v6839_v14  ;;  %v5474_v39 = vld [vmem:[#allocation8 + $0xc] ss:$16 sps:$4 sm:$0xff]  }
 0x187   : > { %1133 = vmatprep.subr.bf16.mxu1 %v5427_v2  ;;  %v5433_v6 = vld [vmem:[#allocation8 + $0x64] ss:$16 sps:$4 sm:$0xff]   ;;  %v5435_v7 = vld [vmem:[#allocation8 + $0x60] ss:$16 sps:$4 sm:$0xff]   ;;  %v5472_v40 = vld [vmem:[#allocation8 + $0x8] ss:$16 sps:$4 sm:$0xff]  }
 0x188   : > { %v5436_v8 = vld [vmem:[#allocation8 + $0x84] ss:$16 sps:$4 sm:$0xff]   ;;  %v5438_v9 = vld [vmem:[#allocation8 + $0x80] ss:$16 sps:$4 sm:$0xff]   ;;  %v5477_v42 = vld [vmem:[#allocation8 + $0x2c] ss:$16 sps:$4 sm:$0xff]  }
 0x189   : > { %v5439_v10 = vld [vmem:[#allocation8 + $0xa4] ss:$16 sps:$4 sm:$0xff]   ;;  %v5441_v11 = vld [vmem:[#allocation8 + $0xa0] ss:$16 sps:$4 sm:$0xff]   ;;  %v5475_v43 = vld [vmem:[#allocation8 + $0x28] ss:$16 sps:$4 sm:$0xff]  }
 0x18a   : > { %1134 = vmatpush1.bf16.msra.mxu1 %v5429_v3  ;;  %v5442_v12 = vld [vmem:[#allocation8 + $0xc4] ss:$16 sps:$4 sm:$0xff]   ;;  %v5444_v17 = vld [vmem:[#allocation8 + $0xc0] ss:$16 sps:$4 sm:$0xff]   ;;  %v5480_v44 = vld [vmem:[#allocation8 + $0x4c] ss:$16 sps:$4 sm:$0xff]  }
 0x18b   : > { %1135 = vmatprep.subr.bf16.mxu1 %v5430_v4  ;;  %v6836_v13 = vld [vmem:[%s6797_s27] sm:$0xff]  ;;  %v5478_v45 = vld [vmem:[#allocation8 + $0x48] ss:$16 sps:$4 sm:$0xff]   ;;  %v5483_v46 = vld [vmem:[#allocation8 + $0x6c] ss:$16 sps:$4 sm:$0xff]   ;;  %s6320_s3 = smov 64  }
 0x18c   : > { %v711_v15 = vld [vmem:[#allocation6] sm:$0xff]  ;;  %v5481_v47 = vld [vmem:[#allocation8 + $0x68] ss:$16 sps:$4 sm:$0xff]   ;;  %v5486_v48 = vld [vmem:[#allocation8 + $0x8c] ss:$16 sps:$4 sm:$0xff]   ;;  %vm1540_vm2 = vcmask 130048  }
 0x18d   : > { %v713_v18 = vadd.bf16 %v711_v15, %v6836_v13  ;;  %v5445_v20 = vld [vmem:[#allocation8 + $0xe4] ss:$16 sps:$4 sm:$0xff]   ;;  %v5447_v22 = vld [vmem:[#allocation8 + $0xe0] ss:$16 sps:$4 sm:$0xff]   ;;  %v5484_v49 = vld [vmem:[#allocation8 + $0x88] ss:$16 sps:$4 sm:$0xff]  }
 0x18e   : > { %1136 = vmatpush1.bf16.msra.mxu1 %v5432_v5  ;;  %v5448_v23 = vld [vmem:[#allocation8 + $0x104] ss:$16 sps:$4 sm:$0xff]   ;;  %v5450_v24 = vld [vmem:[#allocation8 + $0x100] ss:$16 sps:$4 sm:$0xff]   ;;  %v5489_v50 = vld [vmem:[#allocation8 + $0xac] ss:$16 sps:$4 sm:$0xff]  }
 0x18f   : > { %1137 = vmatprep.subr.bf16.mxu1 %v5433_v6  ;;  %v4699_v21 = vcombine.high %v713_v18, %v714_v19  ;;  %v5451_v25 = vld [vmem:[#allocation8 + $0x124] ss:$16 sps:$4 sm:$0xff]   ;;  %v5453_v26 = vld [vmem:[#allocation8 + $0x120] ss:$16 sps:$4 sm:$0xff]   ;;  %v6843_v41 = vcombine.low %v713_v18, %v714_v19  ;;  %v5487_v51 = vld [vmem:[#allocation8 + $0xa8] ss:$16 sps:$4 sm:$0xff]  }
 0x190   : > { %v5454_v27 = vld [vmem:[#allocation8 + $0x144] ss:$16 sps:$4 sm:$0xff]   ;;  %v5456_v28 = vld [vmem:[#allocation8 + $0x140] ss:$16 sps:$4 sm:$0xff]   ;;  %v5492_v52 = vld [vmem:[#allocation8 + $0xcc] ss:$16 sps:$4 sm:$0xff]  }
 0x191   : > { %1163 = vmatprep.mubr.bf16.mxu1 %v4699_v21  ;;  %v5457_v29 = vld [vmem:[#allocation8 + $0x164] ss:$16 sps:$4 sm:$0xff]   ;;  %v5459_v30 = vld [vmem:[#allocation8 + $0x160] ss:$16 sps:$4 sm:$0xff]   ;;  %v5490_v53 = vld [vmem:[#allocation8 + $0xc8] ss:$16 sps:$4 sm:$0xff]  }
 0x192   : > { %1138 = vmatpush1.bf16.msra.mxu1 %v5435_v7  ;;  %v5460_v31 = vld [vmem:[#allocation8 + $0x184] ss:$16 sps:$4 sm:$0xff]   ;;  %v5462_v32 = vld [vmem:[#allocation8 + $0x180] ss:$16 sps:$4 sm:$0xff]   ;;  %v5495_v54 = vld [vmem:[#allocation8 + $0xec] ss:$16 sps:$4 sm:$0xff]  }
 0x193   : > { %1139 = vmatprep.subr.bf16.mxu1 %v5436_v8  ;;  %v5463_v33 = vld [vmem:[#allocation8 + $0x1a4] ss:$16 sps:$4 sm:$0xff]   ;;  %v5465_v34 = vld [vmem:[#allocation8 + $0x1a0] ss:$16 sps:$4 sm:$0xff]   ;;  %v5493_v55 = vld [vmem:[#allocation8 + $0xe8] ss:$16 sps:$4 sm:$0xff]  }
 0x194   : > { %v5466_v35 = vld [vmem:[#allocation8 + $0x1c4] ss:$16 sps:$4 sm:$0xff]   ;;  %v5468_v36 = vld [vmem:[#allocation8 + $0x1c0] ss:$16 sps:$4 sm:$0xff]   ;;  %v5498_v56 = vld [vmem:[#allocation8 + $0x10c] ss:$16 sps:$4 sm:$0xff]  }
 0x195   : > { %v5469_v37 = vld [vmem:[#allocation8 + $0x1e4] ss:$16 sps:$4 sm:$0xff]   ;;  %v5471_v38 = vld [vmem:[#allocation8 + $0x1e0] ss:$16 sps:$4 sm:$0xff]   ;;  %v5496_v57 = vld [vmem:[#allocation8 + $0x108] ss:$16 sps:$4 sm:$0xff]  }
 0x196   : > { %1140 = vmatpush1.bf16.msra.mxu1 %v5438_v9  ;;  %v5501_v58 = vld [vmem:[#allocation8 + $0x12c] ss:$16 sps:$4 sm:$0xff]   ;;  %v5499_v59 = vld [vmem:[#allocation8 + $0x128] ss:$16 sps:$4 sm:$0xff]   ;;  %v6318_v8 = vmov 0.0   ;;  %s1563_s13 = sld [smem:[#allocation17]] }
 0x197   : > { %1141 = vmatprep.subr.bf16.mxu1 %v5439_v10  ;;  %v5504_v60 = vld [vmem:[#allocation8 + $0x14c] ss:$16 sps:$4 sm:$0xff]   ;;  %v5502_v61 = vld [vmem:[#allocation8 + $0x148] ss:$16 sps:$4 sm:$0xff]   ;;  %5132 = vmatprep.subr.bf16.mxu0 %v6318_v8  ;;  %s4802_s19 = sld [smem:[#allocation17 + $0x1]]  ;;  %s4810_s16 = sld [smem:[#allocation17 + $0x3]] }
 0x198   : > { %v5507_v62 = vld [vmem:[#allocation8 + $0x16c] ss:$16 sps:$4 sm:$0xff]   ;;  %v5505_v63 = vld [vmem:[#allocation8 + $0x168] ss:$16 sps:$4 sm:$0xff]   ;;  %5134 = vmatprep.mubr.msk.bf16.mxu0 %vm6319_vm0, %v6318_v8  ;;  %s4806_s10 = sld [smem:[#allocation17 + $0x2]]  ;;  %s7213_s28 = sld [smem:[#allocation42_spill]] }
 0x199   : > { %v5510_v0 = vld [vmem:[#allocation8 + $0x18c] ss:$16 sps:$4 sm:$0xff]   ;;  %v5508_v1 = vld [vmem:[#allocation8 + $0x188] ss:$16 sps:$4 sm:$0xff]   ;;  %s7215_s2 = sld [smem:[#allocation44_spill]]  ;;  %s4697_s26 = sshll.u32 %s6793_s21, 5 }
 0x19a   : > { %1142 = vmatpush1.bf16.msra.mxu1 %v5441_v11  ;;  %v5513_v2 = vld [vmem:[#allocation8 + $0x1ac] ss:$16 sps:$4 sm:$0xff]   ;;  %v5511_v3 = vld [vmem:[#allocation8 + $0x1a8] ss:$16 sps:$4 sm:$0xff]   ;;  %v4765_v11 = vcombine.high %v6836_v13, %v6839_v14  ;;  %s707_s25 = scalar_lea.vmem [#allocation24], %s4697_s26  ;;  %p7217_p4 = scmp.ne.s32.totalorder %s7191_s17, 0 }
 0x19b   : > { %1143 = vmatprep.subr.bf16.mxu1 %v5442_v12  ;;  %v5516_v4 = vld [vmem:[#allocation8 + $0x1cc] ss:$16 sps:$4 sm:$0xff]   ;;  %v5514_v5 = vld [vmem:[#allocation8 + $0x1c8] ss:$16 sps:$4 sm:$0xff]   ;;  %s6321_s20 = smov [#allocation24]  }
 0x19c   : > { %v5519_v6 = vld [vmem:[#allocation8 + $0x1ec] ss:$16 sps:$4 sm:$0xff]   ;;  %v5517_v7 = vld [vmem:[#allocation8 + $0x1e8] ss:$16 sps:$4 sm:$0xff]  }
 0x19d   : > { %v5520_v9 = vld [vmem:[#allocation11] ss:$8 sps:$4 sm:$0xff]   ;;  %v5522_v10 = vld [vmem:[#allocation11 + $0x4] ss:$8 sps:$4 sm:$0xff]   ;;  %v5525_v12 = vld [vmem:[#allocation11 + $0x14] ss:$8 sps:$4 sm:$0xff]  }
 0x19e   : > { %1144 = vmatpush1.bf16.msra.mxu1 %v5444_v17  ;;  %v5523_v15 = vld [vmem:[#allocation11 + $0x10] ss:$8 sps:$4 sm:$0xff]   ;;  %v5528_v16 = vld [vmem:[#allocation11 + $0x24] ss:$8 sps:$4 sm:$0xff]   ;;  %v5526_v17 = vld [vmem:[#allocation11 + $0x20] ss:$8 sps:$4 sm:$0xff]  }
 0x19f   : > { %1145 = vmatprep.subr.bf16.mxu1 %v5445_v20  ;;  %v5531_v18 = vld [vmem:[#allocation11 + $0x34] ss:$8 sps:$4 sm:$0xff]   ;;  %v5529_v19 = vld [vmem:[#allocation11 + $0x30] ss:$8 sps:$4 sm:$0xff]   ;;  %v5534_v20 = vld [vmem:[#allocation11 + $0x44] ss:$8 sps:$4 sm:$0xff]  }
 0x1a2   : > { %1146 = vmatpush1.bf16.msra.mxu1 %v5447_v22  ;;  %v5537_v22 = vld [vmem:[#allocation11 + $0x54] ss:$8 sps:$4 sm:$0xff]  }
 0x1a3   : > { %1147 = vmatprep.subr.bf16.mxu1 %v5448_v23  ;;  %v5535_v23 = vld [vmem:[#allocation11 + $0x50] ss:$8 sps:$4 sm:$0xff]  }
 0x1a6   : > { %1148 = vmatpush1.bf16.msra.mxu1 %v5450_v24  ;;  %v5540_v24 = vld [vmem:[#allocation11 + $0x64] ss:$8 sps:$4 sm:$0xff]  }
 0x1a7   : > { %1149 = vmatprep.subr.bf16.mxu1 %v5451_v25  ;;  %v5538_v25 = vld [vmem:[#allocation11 + $0x60] ss:$8 sps:$4 sm:$0xff]  }
 0x1aa   : > { %1150 = vmatpush1.bf16.msra.mxu1 %v5453_v26  ;;  %v5543_v26 = vld [vmem:[#allocation11 + $0x74] ss:$8 sps:$4 sm:$0xff]  }
 0x1ab   : > { %1151 = vmatprep.subr.bf16.mxu1 %v5454_v27  ;;  %v5541_v27 = vld [vmem:[#allocation11 + $0x70] ss:$8 sps:$4 sm:$0xff]  }
 0x1ae   : > { %1152 = vmatpush1.bf16.msra.mxu1 %v5456_v28  ;;  %v5546_v28 = vld [vmem:[#allocation11 + $0x84] ss:$8 sps:$4 sm:$0xff]  }
 0x1af   : > { %1153 = vmatprep.subr.bf16.mxu1 %v5457_v29  ;;  %v5544_v29 = vld [vmem:[#allocation11 + $0x80] ss:$8 sps:$4 sm:$0xff]  }
 0x1b2   : > { %1154 = vmatpush1.bf16.msra.mxu1 %v5459_v30  ;;  %v5549_v30 = vld [vmem:[#allocation11 + $0x94] ss:$8 sps:$4 sm:$0xff]  }
 0x1b3   : > { %1155 = vmatprep.subr.bf16.mxu1 %v5460_v31  ;;  %v781_v31 = vlaneseq }
 0x1b6   : > { %1156 = vmatpush1.bf16.msra.mxu1 %v5462_v32  ;;  %v5547_v32 = vld [vmem:[#allocation11 + $0x90] ss:$8 sps:$4 sm:$0xff]  }
 0x1b7   : > { %1157 = vmatprep.subr.bf16.mxu1 %v5463_v33  ;;  %v5552_v33 = vld [vmem:[#allocation11 + $0xa4] ss:$8 sps:$4 sm:$0xff]  }
 0x1ba   : > { %1158 = vmatpush1.bf16.msra.mxu1 %v5465_v34  ;;  %v6852_v34 = vshrl.u32 %v781_v31, 7 }
 0x1bb   : > { %1159 = vmatprep.subr.bf16.mxu1 %v5466_v35  ;;  %v5550_v35 = vld [vmem:[#allocation11 + $0xa0] ss:$8 sps:$4 sm:$0xff]  }
 0x1be   : > { %1160 = vmatpush1.bf16.msra.mxu1 %v5468_v36  ;;  %v5555_v36 = vld [vmem:[#allocation11 + $0xb4] ss:$8 sps:$4 sm:$0xff]  }
 0x1bf   : > { %1161 = vmatprep.subr.bf16.mxu1 %v5469_v37  ;;  %v6855_v37 = vsub.s32 0, %v6852_v34 }
 0x1c2   : > { %1162 = vmatpush1.bf16.msra.mxu1 %v5471_v38  ;;  %v779_v38 = vld [vmem:[#allocation9] sm:$0xf] }
 0x1c3   : > { %1174 = vmatprep.subr.bf16.mxu1 %v5474_v39  ;;  %v5553_v39 = vld [vmem:[#allocation11 + $0xb0] ss:$8 sps:$4 sm:$0xff]  }
 0x1c5   : > { %1164 = vmatmul.mubr.bf16.vlgmr.msra.gmra.mrb[0].mxu1 %v6843_v41 }
 0x1c6   : > { %1175 = vmatpush1.bf16.msra.mxu1 %v5472_v40  ;;  %1206 = vmatprep.mubr.bf16.mxu1 %v4699_v21  ;;  %v5532_v21 = vld [vmem:[#allocation11 + $0x40] ss:$8 sps:$4 sm:$0xff]   ;;  %v5558_v40 = vld [vmem:[#allocation11 + $0xc4] ss:$8 sps:$4 sm:$0xff]  }
 0x1c7   : > { %1176 = vmatprep.subr.bf16.mxu1 %v5477_v42  ;;  %v784_v42 = vrot.slane %v779_v38, %v6855_v37 }
 0x1ca   : > { %1177 = vmatpush1.bf16.msra.mxu1 %v5475_v43  ;;  %v5556_v43 = vld [vmem:[#allocation11 + $0xc0] ss:$8 sps:$4 sm:$0xff]  }
 0x1cb   : > { %1178 = vmatprep.subr.bf16.mxu1 %v5480_v44  ;;  %v5561_v44 = vld [vmem:[#allocation11 + $0xd4] ss:$8 sps:$4 sm:$0xff]  }
 0x1ce   : > { %1179 = vmatpush1.bf16.msra.mxu1 %v5478_v45 }
 0x1cf   : > { %1180 = vmatprep.subr.bf16.mxu1 %v5483_v46 }
 0x1d2   : > { %1181 = vmatpush1.bf16.msra.mxu1 %v5481_v47 }
 0x1d3   : > { %1182 = vmatprep.subr.bf16.mxu1 %v5486_v48 }
 0x1d6   : > { %1183 = vmatpush1.bf16.msra.mxu1 %v5484_v49 }
 0x1d7   : > { %1184 = vmatprep.subr.bf16.mxu1 %v5489_v50  ;;  %v5559_v50 = vld [vmem:[#allocation11 + $0xd0] ss:$8 sps:$4 sm:$0xff]  }
 0x1da   : > { %1185 = vmatpush1.bf16.msra.mxu1 %v5487_v51 }
 0x1db   : > { %1186 = vmatprep.subr.bf16.mxu1 %v5492_v52 }
 0x1de   : > { %1187 = vmatpush1.bf16.msra.mxu1 %v5490_v53  ;;  %v5564_v53 = vld [vmem:[#allocation11 + $0xe4] ss:$8 sps:$4 sm:$0xff]  }
 0x1df   : > { %1188 = vmatprep.subr.bf16.mxu1 %v5495_v54 }
 0x1e2   : > { %1189 = vmatpush1.bf16.msra.mxu1 %v5493_v55 }
 0x1e3   : > { %1190 = vmatprep.subr.bf16.mxu1 %v5498_v56 }
 0x1e6   : > { %1191 = vmatpush1.bf16.msra.mxu1 %v5496_v57 }
 0x1e7   : > { %1192 = vmatprep.subr.bf16.mxu1 %v5501_v58  ;;  %v5562_v58 = vld [vmem:[#allocation11 + $0xe0] ss:$8 sps:$4 sm:$0xff]  }
 0x1ea   : > { %1193 = vmatpush1.bf16.msra.mxu1 %v5499_v59  ;;  %v5567_v59 = vld [vmem:[#allocation11 + $0xf4] ss:$8 sps:$4 sm:$0xff]  }
 0x1eb   : > { %1194 = vmatprep.subr.bf16.mxu1 %v5504_v60  ;;  %v5565_v60 = vld [vmem:[#allocation11 + $0xf0] ss:$8 sps:$4 sm:$0xff]  }
 0x1ee   : > { %1195 = vmatpush1.bf16.msra.mxu1 %v5502_v61  ;;  %v4764_v61 = vcombine.low %v6836_v13, %v6839_v14 }
 0x1ef   : > { %1196 = vmatprep.subr.bf16.mxu1 %v5507_v62  ;;  %v791_v62 = vsub.s32 2, %v6852_v34 }
 0x1f2   : > { %1197 = vmatpush1.bf16.msra.mxu1 %v5505_v63  ;;  %v795_v63 = vsub.s32 3, %v6852_v34 }
 0x1f3   : > { %1198 = vmatprep.subr.bf16.mxu1 %v5510_v0  ;;  %v792_v0 = vrot.slane %v779_v38, %v791_v62 }
 0x1f6   : > { %1199 = vmatpush1.bf16.msra.mxu1 %v5508_v1 }
 0x1f7   : > { %1200 = vmatprep.subr.bf16.mxu1 %v5513_v2  ;;  %v796_v2 = vrot.slane %v779_v38, %v795_v63 }
 0x1fa   : > { %1201 = vmatpush1.bf16.msra.mxu1 %v5511_v3 }
 0x1fb   : > { %1202 = vmatprep.subr.bf16.mxu1 %v5516_v4 }
 0x1fe   : > { %1203 = vmatpush1.bf16.msra.mxu1 %v5514_v5 }
 0x1ff   : > { %1204 = vmatprep.subr.bf16.mxu1 %v5519_v6 }
 0x202   : > { %1205 = vmatpush1.bf16.msra.mxu1 %v5517_v7 }
 0x203   : > { %1431 = vmatprep.subr.bf16.mxu1 %v5522_v10 }
 0x205   : > { %1207 = vmatmul.mubr.bf16.vlgmr.msra.gmra.mrb[4].mxu1 %v6843_v41  ;;  %v6858_v41 = vsub.s32 1, %v6852_v34 }
 0x206   : > { %1463 = vmatprep.mubr.bf16.mxu1 %v4765_v11  ;;  %1432 = vmatpush1.bf16.msra.mxu1 %v5520_v9 }
 0x207   : > { %1433 = vmatprep.subr.bf16.mxu1 %v5525_v12  ;;  %v788_v46 = vrot.slane %v779_v38, %v6858_v41 }
 0x20a   : > { %1434 = vmatpush1.bf16.msra.mxu1 %v5523_v15 }
 0x20b   : > { %1435 = vmatprep.subr.bf16.mxu1 %v5528_v16 }
 0x20e   : > { %1436 = vmatpush1.bf16.msra.mxu1 %v5526_v17  ;;  %v1249_v17 = vld [vmem:[#allocation12] sm:$0x3] }
 0x20f   : > { %1437 = vmatprep.subr.bf16.mxu1 %v5531_v18  ;;  %v1254_v18 = vrot.slane %v1249_v17, %v6855_v37 }
 0x212   : > { %1438 = vmatpush1.bf16.msra.mxu1 %v5529_v19  ;;  %v1258_v19 = vrot.slane %v1249_v17, %v6858_v41 }
 0x213   : > { %1439 = vmatprep.subr.bf16.mxu1 %v5534_v20 }
 0x216   : > { %1440 = vmatpush1.bf16.msra.mxu1 %v5532_v21 }
 0x217   : > { %1441 = vmatprep.subr.bf16.mxu1 %v5537_v22 }
 0x21a   : > { %1442 = vmatpush1.bf16.msra.mxu1 %v5535_v23 }
 0x21b   : > { %1443 = vmatprep.subr.bf16.mxu1 %v5540_v24 }
 0x21e   : > { %1444 = vmatpush1.bf16.msra.mxu1 %v5538_v25 }
 0x21f   : > { %1445 = vmatprep.subr.bf16.mxu1 %v5543_v26 }
 0x222   : > { %1446 = vmatpush1.bf16.msra.mxu1 %v5541_v27  ;;  %v1480_v27 = vld [vmem:[#allocation18] sm:$0xff] }
 0x223   : > { %1447 = vmatprep.subr.bf16.mxu1 %v5546_v28  ;;  %v1481_v28 = vld [vmem:[#allocation18 + $0x8] sm:$0xff] }
 0x226   : > { %1448 = vmatpush1.bf16.msra.mxu1 %v5544_v29 }
 0x227   : > { %1449 = vmatprep.subr.bf16.mxu1 %v5549_v30 }
 0x22a   : > { %1450 = vmatpush1.bf16.msra.mxu1 %v5547_v32  ;;  %v1488_v32 = vpack.c.bf16 %v1481_v28, %v1480_v27 }
 0x22b   : > { %1451 = vmatprep.subr.bf16.mxu1 %v5552_v33 }
 0x22e   : > { %1452 = vmatpush1.bf16.msra.mxu1 %v5550_v35 }
 0x22f   : > { %1453 = vmatprep.subr.bf16.mxu1 %v5555_v36 }
 0x232   : > { %1454 = vmatpush1.bf16.msra.mxu1 %v5553_v39 }
 0x233   : > { %1455 = vmatprep.subr.bf16.mxu1 %v5558_v40 }
 0x236   : > { %1456 = vmatpush1.bf16.msra.mxu1 %v5556_v43 }
 0x237   : > { %1457 = vmatprep.subr.bf16.mxu1 %v5561_v44 }
 0x23a   : > { %1458 = vmatpush1.bf16.msra.mxu1 %v5559_v50 }
 0x23b   : > { %1459 = vmatprep.subr.bf16.mxu1 %v5564_v53 }
 0x23e   : > { %1460 = vmatpush1.bf16.msra.mxu1 %v5562_v58 }
 0x23f   : > { %1461 = vmatprep.subr.bf16.mxu1 %v5567_v59 }
 0x242   : > { %1462 = vmatpush1.bf16.msra.mxu1 %v5565_v60 }
 0x243   : > { %5150 = vmatprep.subr.bf16.mxu1 %v6318_v8 }
 0x245   : > { %1464 = vmatmul.mubr.bf16.vlgmr.msra.gmra.mrb[8].mxu1 %v4764_v61 }
 0x246   : > { %5152 = vmatprep.mubr.msk.bf16.mxu1 %vm6319_vm0, %v6318_v8 }
 0x298   : > { %v1165_v45 = vpop.f32.mrb[0].mxu1 }
 0x299   : > { %v1166_v47 = vadd.f32 %v1165_v45, %v784_v42  ;;  %v1167_v48 = vpop.f32.mrb[1].mxu1 }
 0x29a   : > { %v1169_v49 = vpop.f32.mrb[2].mxu1  ;;  %v1168_v54 = vadd.f32 %v1167_v48, %v788_v46 }
 0x29b   : > { %v1170_v51 = vadd.f32 %v1169_v49, %v784_v42  ;;  %v1171_v52 = vpop.f32.mrb[3].mxu1 }
 0x29c   : > { %v1172_v55 = vadd.f32 %v1171_v52, %v788_v46 }
 0x29d   : > { %v1474_v56 = vpack.c.bf16 %v1170_v51, %v1166_v47 }
 0x29e   : > { %v6862_v57 = vpack.c.bf16 %v1172_v55, %v1168_v54 }
 0x2d8   : > { %v1208_v1 = vpop.f32.mrb[4].mxu1 }
 0x2d9   : > { %v1210_v3 = vpop.f32.mrb[5].mxu1  ;;  %v1209_v14 = vadd.f32 %v1208_v1, %v792_v0 }
 0x2da   : > { %v1212_v13 = vpop.f32.mrb[6].mxu1  ;;  %v1211_v6 = vadd.f32 %v1210_v3, %v796_v2 }
 0x2db   : > { %v1213_v4 = vadd.f32 %v1212_v13, %v792_v0  ;;  %v1214_v5 = vpop.f32.mrb[7].mxu1 }
 0x2dc   : > { %v1215_v7 = vadd.f32 %v1214_v5, %v796_v2 }
 0x2dd   : > { %v1476_v9 = vpack.c.bf16 %v1213_v4, %v1209_v14 }
 0x2de   : > { %v6875_v10 = vpack.c.bf16 %v1215_v7, %v1211_v6 }
 0x2df   : > { %1660 = vrot.lane.b32.xlu0 %v1476_v9, %s6320_s3  ;;  %v1497_v11 = vsel %vm1492_vm1, %v1476_v9, 0 }
 0x2e0   : > { %5133 = vmatpush3.bf16.xpose.msra.mxu0 %v1497_v11 }
 0x2e1   : > { %5138 = vmatprep.subr.bf16.mxu0 %v6318_v8 }
 0x2e3   : > { %1657 = vrot.lane.b32.xlu0 %v1474_v56, %s6320_s3 }
 0x2e7   : > { %5135 = vmatmul.mubr.msk.bf16.vlgmr.msra.gmra.mrb[0].mxu0 %vm1492_vm1, %v1474_v56 }
 0x2e8   : > { %5140 = vmatprep.mubr.msk.bf16.mxu0 %vm6319_vm0, %v6318_v8 }
 0x318   : > { %v1465_v20 = vpop.f32.mrb[8].mxu1 }
 0x319   : > { %v1466_v21 = vadd.f32 %v1465_v20, %v1254_v18  ;;  %v1467_v22 = vpop.f32.mrb[9].mxu1 }
 0x31a   : > { %v1468_v23 = vadd.f32 %v1467_v22, %v1258_v19  ;;  %v1469_v24 = vpop.f32.mrb[10].mxu1 }
 0x31b   : > { %v1470_v25 = vadd.f32 %v1469_v24, %v1254_v18  ;;  %v1471_v26 = vpop.f32.mrb[11].mxu1  ;;  %v1483_v24 = vld [vmem:[#allocation18 + $0x18] sm:$0xff] }
 0x31c   : > { %v1472_v29 = vadd.f32 %v1471_v26, %v1258_v19 }
 0x31d   : > { %v1478_v30 = vpack.c.bf16 %v1470_v25, %v1466_v21 }
 0x31e   : > { %v6891_v31 = vpack.c.bf16 %v1472_v29, %v1468_v23  ;;  %v1482_v23 = vld [vmem:[#allocation18 + $0x10] sm:$0xff] }
 0x31f   : > { %5139 = vmatpush3.bf16.msra.mxu0 %v1478_v30  ;;  %v1489_v27 = vpack.c.bf16 %v1483_v24, %v1482_v23 }
 0x320   : > { %5144 = vmatprep.subr.bf16.mxu0 %v6318_v8 }
 0x322   : > { %5141 = vmatmul.mubr.msk.bf16.vlgmr.msra.gmra.mrb[4].mxu0 %vm1540_vm2, %v1488_v32  ;;  %v1732_v32 = vstv %s4802_s19 }
 0x323   : > { %5145 = vmatpush3.bf16.msra.mxu0 %v1478_v30  ;;  %5146 = vmatprep.mubr.msk.bf16.mxu0 %vm6319_vm0, %v6318_v8 }
 0x324   : > { %5186 = vmatprep.subr.bf16.mxu0 %v6318_v8 }
 0x351   : > { %v1661_v12 = vpop.permute.xlu0 %1660 }
 0x352   : > { %v1666_v15 = vsel %vm1492_vm1, %v1661_v12, 0  ;;  %v1564_v12 = vstv %s1563_s13 }
 0x353   : > { %5151 = vmatpush3.bf16.xpose.msra.mxu1 %v1666_v15 }
 0x354   : > { %5156 = vmatprep.subr.bf16.mxu1 %v6318_v8 }
 0x355   : > { %v1658_v16 = vpop.permute.xlu0 %1657 }
 0x35a   : > { %5153 = vmatmul.mubr.msk.bf16.vlgmr.msra.gmra.mrb[12].mxu1 %vm1492_vm1, %v1658_v16 }
 0x35b   : > { %5158 = vmatprep.mubr.msk.bf16.mxu1 %vm6319_vm0, %v6318_v8 }
 0x3ba   : > { %v1533_v33 = vpop.f32.mrb[0].mxu0 }
 0x3bb   : > { %v5136_v35 = vpop.f32.mrb[1].mxu0  ;;  %v1541_v36 = vsel %vm1540_vm2, %v1533_v33, -inf }
 0x3bc   : > { %1542 = vmax.xlane.f32.xlu1 %v1541_v36  ;;  %v1536_v38 = vpop.f32.mrb[2].mxu0 }
 0x3bd   : > { %v5137_v39 = vpop.f32.mrb[3].mxu0  ;;  %v1544_v40 = vsel %vm1540_vm2, %v1536_v38, -inf }
 0x3be   : > { %v1832_v39 = vsel %vm1492_vm1, %v6875_v10, 0 }
 0x3c0   : > { %1545 = vmax.xlane.f32.xlu1 %v1544_v40  ;;  %v1484_v40 = vld [vmem:[#allocation18 + $0x20] sm:$0xff] }
 0x42d   : > { %v1702_v42 = vpop.f32.mrb[12].mxu1 }
 0x42e   : > { %v5154_v43 = vpop.f32.mrb[13].mxu1  ;;  %v1709_v44 = vsel %vm1540_vm2, %v1702_v42, -inf }
 0x42f   : > { %1710 = vmax.xlane.f32.xlu0 %v1709_v44  ;;  %v1705_v45 = vpop.f32.mrb[14].mxu1 }
 0x430   : > { %v5155_v46 = vpop.f32.mrb[15].mxu1  ;;  %v1712_v47 = vsel %vm1540_vm2, %v1705_v45, -inf }
 0x431   : > { %1713 = vmax.xlane.f32.xlu1 %v1712_v47 }
 0x449   : > { %v1543_v48 = vpop.xlane.xlu1 %1542 }
 0x44a   : > { %v1547_v49 = vsub.f32 %v1533_v33, %v1543_v48 }
 0x44c   : > { %v1549_v50 = vmul.f32 1.442695, %v1547_v49 }
 0x44d   : > { %v1546_v51 = vpop.xlane.xlu1 %1545 }
 0x44e   : > { %5810 = vpow2.f32 %v1549_v50  ;;  %v1548_v52 = vsub.f32 %v1536_v38, %v1546_v51 }
 0x450   : > { %v1551_v53 = vmul.f32 1.442695, %v1548_v52 }
 0x452   : > { %5812 = vpow2.f32 %v1551_v53 }
 0x458   : > { %v5811_v54 = vpop.eup %5810 }
 0x459   : > { %v1553_v55 = vsel %vm1540_vm2, %v5811_v54, 0.0 }
 0x45a   : > { %1554 = vadd.xlane.f32.xlu1 %v1553_v55 }
 0x45c   : > { %v5813_v56 = vpop.eup %5812 }
 0x45d   : > { %v1556_v58 = vsel %vm1540_vm2, %v5813_v56, 0.0 }
 0x45e   : > { %1557 = vadd.xlane.f32.xlu1 %v1556_v58 }
 0x46f   : > { %1994 = vrot.lane.b32.xlu1 %v6875_v10, %s6320_s3 }
 0x473   : > { %1991 = vrot.lane.b32.xlu1 %v6862_v57, %s6320_s3 }
 0x4bc   : > { %v1711_v59 = vpop.xlane.xlu0 %1710 }
 0x4bd   : > { %v1715_v60 = vsub.f32 %v1702_v42, %v1711_v59  ;;  %v1485_v42 = vld [vmem:[#allocation18 + $0x28] sm:$0xff] }
 0x4be   : > { %v1714_v61 = vpop.xlane.xlu1 %1713  ;;  %v1490_v43 = vpack.c.bf16 %v1485_v42, %v1484_v40  ;;  %v2066_v40 = vstv %s4810_s16  ;;  %s7216_s16 = sld [smem:[#allocation45_spill]] }
 0x4bf   : > { %v1717_v0 = vmul.f32 1.442695, %v1715_v60  ;;  %v1716_v1 = vsub.f32 %v1705_v45, %v1714_v61 }
 0x4c1   : > { %5814 = vpow2.f32 %v1717_v0  ;;  %v1719_v2 = vmul.f32 1.442695, %v1716_v1 }
 0x4c3   : > { %5816 = vpow2.f32 %v1719_v2 }
 0x4cb   : > { %v5815_v3 = vpop.eup %5814 }
 0x4cc   : > { %v1721_v13 = vsel %vm1540_vm2, %v5815_v3, 0.0 }
 0x4cd   : > { %v5817_v14 = vpop.eup %5816  ;;  %1722 = vadd.xlane.f32.xlu0 %v1721_v13  ;;  %v1487_v13 = vld [vmem:[#allocation18 + $0x38] sm:$0xff] }
 0x4ce   : > { %v1724_v4 = vsel %vm1540_vm2, %v5817_v14, 0.0 }
 0x4cf   : > { %1725 = vadd.xlane.f32.xlu1 %v1724_v4 }
 0x4e3   : > { %1737 = vrot.lane.b32.xlu0 %v1478_v30, %s6320_s3 }
 0x4e7   : > { %v1555_v5 = vpop.xlane.xlu1 %1554 }
 0x4e8   : > { %5818 = vrcp.f32 %v1555_v5 }
 0x4eb   : > { %v1558_v6 = vpop.xlane.xlu1 %1557 }
 0x4ec   : > { %5820 = vrcp.f32 %v1558_v6 }
 0x4ef   : > { %v1995_v18 = vpop.permute.xlu1 %1994 }
 0x4f0   : > { %v2000_v20 = vsel %vm1492_vm1, %v1995_v18, 0 }
 0x4f2   : > { %v5819_v7 = vpop.eup %5818 }
 0x4f3   : > { %v1561_v9 = vmul.f32 %v5819_v7, %v5811_v54  ;;  %v1992_v21 = vpop.permute.xlu1 %1991 }
 0x4f5   : > { %v1565_v16 = vmul.f32 %v1564_v12, %v1561_v9 }
 0x4f6   : > { %v5821_v11 = vpop.eup %5820 }
 0x4f7   : > { %v1562_v15 = vmul.f32 %v5821_v11, %v5813_v56 }
 0x4f9   : > { %v1566_v17 = vmul.f32 %v1564_v12, %v1562_v15 }
 0x4fb   : > { %v1567_v19 = vpack.c.bf16 %v1566_v17, %v1565_v16 }
 0x4fd   : > { %5147 = vmatmul.mubr.msk.bf16.vlgmr.msra.gmra.mrb[4].mxu0 %vm1540_vm2, %v1567_v19 }
 0x4fe   : > { %5187 = vmatpush3.bf16.xpose.msra.mxu0 %v2000_v20  ;;  %5188 = vmatprep.mubr.msk.bf16.mxu0 %vm6319_vm0, %v6318_v8 }
 0x4ff   : > { %5192 = vmatprep.subr.bf16.mxu0 %v6318_v8 }
 0x505   : > { %5189 = vmatmul.mubr.msk.bf16.vlgmr.msra.gmra.mrb[8].mxu0 %vm1492_vm1, %v1992_v21 }
 0x506   : > { %5194 = vmatprep.mubr.msk.bf16.mxu0 %vm6319_vm0, %v6318_v8 }
 0x55a   : > { %v1723_v22 = vpop.xlane.xlu0 %1722 }
 0x55b   : > { %5822 = vrcp.f32 %v1723_v22 }
 0x55c   : > { %v1726_v25 = vpop.xlane.xlu1 %1725 }
 0x55d   : > { %5824 = vrcp.f32 %v1726_v25 }
 0x55e   : > { %v1738_v26 = vpop.permute.xlu0 %1737 }
 0x55f   : > { %5157 = vmatpush3.bf16.msra.mxu1 %v1738_v26 }
 0x560   : > { %5162 = vmatprep.subr.bf16.mxu1 %v6318_v8 }
 0x562   : > { %5159 = vmatmul.mubr.msk.bf16.vlgmr.msra.gmra.mrb[16].mxu1 %vm1540_vm2, %v1489_v27 }
 0x563   : > { %5163 = vmatpush3.bf16.msra.mxu1 %v1738_v26  ;;  %5164 = vmatprep.mubr.msk.bf16.mxu1 %vm6319_vm0, %v6318_v8 }
 0x564   : > { %5168 = vmatprep.subr.bf16.mxu1 %v6318_v8 }
 0x565   : > { %v5823_v28 = vpop.eup %5822 }
 0x566   : > { %v1729_v29 = vmul.f32 %v5823_v28, %v5815_v3 }
 0x567   : > { %v5825_v30 = vpop.eup %5824 }
 0x568   : > { %v1730_v33 = vmul.f32 %v5825_v30, %v5817_v14  ;;  %v1733_v35 = vmul.f32 %v1732_v32, %v1729_v29 }
 0x56a   : > { %v1734_v36 = vmul.f32 %v1732_v32, %v1730_v33 }
 0x56c   : > { %v1735_v38 = vpack.c.bf16 %v1734_v36, %v1733_v35 }
 0x56e   : > { %5165 = vmatmul.mubr.msk.bf16.vlgmr.msra.gmra.mrb[16].mxu1 %vm1540_vm2, %v1735_v38 }
 0x56f   : > { %5169 = vmatpush3.bf16.xpose.msra.mxu1 %v1832_v39  ;;  %5170 = vmatprep.mubr.msk.bf16.mxu1 %vm6319_vm0, %v6318_v8 }
 0x570   : > { %5174 = vmatprep.subr.bf16.mxu1 %v6318_v8 }
 0x576   : > { %5171 = vmatmul.mubr.msk.bf16.vlgmr.msra.gmra.mrb[20].mxu1 %vm1492_vm1, %v6862_v57 }
 0x577   : > { %5175 = vmatpush3.bf16.msra.mxu1 %v6891_v31  ;;  %5176 = vmatprep.mubr.msk.bf16.mxu1 %vm6319_vm0, %v6318_v8 }
 0x578   : > { %5180 = vmatprep.subr.bf16.mxu1 %v6318_v8 }
 0x57e   : > { %5177 = vmatmul.mubr.msk.bf16.vlgmr.msra.gmra.mrb[24].mxu1 %vm1540_vm2, %v1490_v43 }
 0x57f   : > { %5181 = vmatpush3.bf16.msra.mxu1 %v6891_v31  ;;  %5182 = vmatprep.mubr.msk.bf16.mxu1 %vm6319_vm0, %v6318_v8 }
 0x5d0   : > { %v1649_v10 = vpop.f32.mrb[4].mxu0 }
 0x5d1   : > { %v5148_v44 = vpop.f32.mrb[5].mxu0 }
 0x5d2   : > { %v1652_v57 = vpop.f32.mrb[6].mxu0 }
 0x5d3   : > { %v5149_v45 = vpop.f32.mrb[7].mxu0 }
 0x5d8   : > { %v2036_v46 = vpop.f32.mrb[8].mxu0 }
 0x5d9   : > { %v5190_v47 = vpop.f32.mrb[9].mxu0  ;;  %v2043_v48 = vsel %vm1540_vm2, %v2036_v46, -inf }
 0x5da   : > { %2044 = vmax.xlane.f32.xlu0 %v2043_v48  ;;  %v2039_v49 = vpop.f32.mrb[10].mxu0 }
 0x5db   : > { %v5191_v50 = vpop.f32.mrb[11].mxu0  ;;  %v2046_v51 = vsel %vm1540_vm2, %v2039_v49, -inf }
 0x5dc   : > { %2047 = vmax.xlane.f32.xlu1 %v2046_v51  ;;  %v1898_v50 = vstv %s4806_s10  ;;  %s7214_s10 = sld [smem:[#allocation43_spill]] }
 0x5f0   : > { %2071 = vrot.lane.b32.xlu0 %v6891_v31, %s6320_s3  ;;  %v1486_v31 = vld [vmem:[#allocation18 + $0x30] sm:$0xff] }
 0x5f1   : > { %v1491_v7 = vpack.c.bf16 %v1487_v13, %v1486_v31  ;;  %v5585_v31 = vld [vmem:[#allocation14 + $0x50] ss:$8 sps:$4 sm:$0xff]   ;;  %v5590_v13 = vld [vmem:[#allocation14 + $0x64] ss:$8 sps:$4 sm:$0xff]  }
 0x641   : > { %v1821_v52 = vpop.f32.mrb[16].mxu1 }
 0x642   : > { %v5166_v53 = vpop.f32.mrb[17].mxu1 }
 0x643   : > { %v1824_v54 = vpop.f32.mrb[18].mxu1 }
 0x644   : > { %v5419_v55 = vpack.i.bf16 %v1824_v54, %v1821_v52  ;;  %v5167_v56 = vpop.f32.mrb[19].mxu1  ;;  %v5570_v54 = vld [vmem:[#allocation14] ss:$8 sps:$4 sm:$0xff]  }
 0x645   : > { %v5575_v56 = vld [vmem:[#allocation14 + $0x14] ss:$8 sps:$4 sm:$0xff]  }
 0x646   : > { %5420 = vrot.lane.b32.xlu0 %v5419_v55, %s6320_s3 }
 0x649   : > { %v1868_v58 = vpop.f32.mrb[20].mxu1 }
 0x64a   : > { %v5172_v59 = vpop.f32.mrb[21].mxu1  ;;  %v1875_v60 = vsel %vm1540_vm2, %v1868_v58, -inf }
 0x64b   : > { %v1871_v61 = vpop.f32.mrb[22].mxu1  ;;  %1876 = vmax.xlane.f32.xlu1 %v1875_v60  ;;  %v5578_v59 = vld [vmem:[#allocation14 + $0x24] ss:$8 sps:$4 sm:$0xff]   ;;  %v5576_v60 = vld [vmem:[#allocation14 + $0x20] ss:$8 sps:$4 sm:$0xff]  }
 0x64c   : > { %v5173_v0 = vpop.f32.mrb[23].mxu1  ;;  %v1878_v1 = vsel %vm1540_vm2, %v1871_v61, -inf }
 0x64d   : > { %v5579_v0 = vld [vmem:[#allocation14 + $0x30] ss:$8 sps:$4 sm:$0xff]  }
 0x64f   : > { %1879 = vmax.xlane.f32.xlu1 %v1878_v1  ;;  %v5584_v1 = vld [vmem:[#allocation14 + $0x44] ss:$8 sps:$4 sm:$0xff]  }
 0x667   : > { %v2045_v2 = vpop.xlane.xlu0 %2044 }
 0x668   : > { %v2049_v3 = vsub.f32 %v2036_v46, %v2045_v2  ;;  %v5582_v2 = vld [vmem:[#allocation14 + $0x40] ss:$8 sps:$4 sm:$0xff]  }
 0x669   : > { %v2048_v14 = vpop.xlane.xlu1 %2047 }
 0x66a   : > { %v2051_v4 = vmul.f32 1.442695, %v2049_v3  ;;  %v2050_v5 = vsub.f32 %v2039_v49, %v2048_v14  ;;  %v5587_v3 = vld [vmem:[#allocation14 + $0x54] ss:$8 sps:$4 sm:$0xff]   ;;  %v5588_v14 = vld [vmem:[#allocation14 + $0x60] ss:$8 sps:$4 sm:$0xff]  }
 0x66b   : > { %v2072_v6 = vpop.permute.xlu0 %2071 }
 0x66c   : > { %5826 = vpow2.f32 %v2051_v4  ;;  %v2053_v9 = vmul.f32 1.442695, %v2050_v5  ;;  %5193 = vmatpush3.bf16.msra.mxu0 %v2072_v6  ;;  %v5593_v4 = vld [vmem:[#allocation14 + $0x74] ss:$8 sps:$4 sm:$0xff]   ;;  %v5591_v5 = vld [vmem:[#allocation14 + $0x70] ss:$8 sps:$4 sm:$0xff]  }
 0x66d   : > { %5198 = vmatprep.subr.bf16.mxu0 %v6318_v8 }
 0x66e   : > { %5828 = vpow2.f32 %v2053_v9  ;;  %v5599_v9 = vld [vmem:[#allocation14 + $0x94] ss:$8 sps:$4 sm:$0xff]  }
 0x66f   : > { %5195 = vmatmul.mubr.msk.bf16.vlgmr.msra.gmra.mrb[12].mxu0 %vm1540_vm2, %v1491_v7  ;;  %v5594_v7 = vld [vmem:[#allocation14 + $0x80] ss:$8 sps:$4 sm:$0xff]  }
 0x670   : > { %5199 = vmatpush3.bf16.msra.mxu0 %v2072_v6  ;;  %5200 = vmatprep.mubr.msk.bf16.mxu0 %vm6319_vm0, %v6318_v8  ;;  %v5596_v6 = vld [vmem:[#allocation14 + $0x84] ss:$8 sps:$4 sm:$0xff]  }
 0x676   : > { %v5827_v11 = vpop.eup %5826 }
 0x677   : > { %v2055_v12 = vsel %vm1540_vm2, %v5827_v11, 0.0 }
 0x678   : > { %v5829_v15 = vpop.eup %5828  ;;  %2056 = vadd.xlane.f32.xlu1 %v2055_v12  ;;  %v5602_v12 = vld [vmem:[#allocation14 + $0xa4] ss:$8 sps:$4 sm:$0xff]  }
 0x679   : > { %v2058_v16 = vsel %vm1540_vm2, %v5829_v15, 0.0 }
 0x67c   : > { %2059 = vadd.xlane.f32.xlu1 %v2058_v16  ;;  %v5605_v16 = vld [vmem:[#allocation14 + $0xb4] ss:$8 sps:$4 sm:$0xff]  }
 0x6b8   : > { %v5421_v17 = vpop.permute.xlu0 %5420 }
 0x6b9   : > { %v5423_v18 = vunpack.i.h.bf16 %v5421_v17  ;;  %v5422_v19 = vunpack.i.l.bf16 %v5421_v17  ;;  %v5603_v17 = vld [vmem:[#allocation14 + $0xb0] ss:$8 sps:$4 sm:$0xff]  }
 0x6bb   : > { %v6954_v20 = vsel %vm1492_vm1, %v1652_v57, %v5423_v18  ;;  %v6957_v21 = vsel %vm1492_vm1, %v1649_v10, %v5422_v19  ;;  %v5572_v57 = vld [vmem:[#allocation14 + $0x4] ss:$8 sps:$4 sm:$0xff]   ;;  %v5606_v19 = vld [vmem:[#allocation14 + $0xc0] ss:$8 sps:$4 sm:$0xff]  }
 0x6bc   : > { %v2182_v8 = vpack.c.bf16 %v6954_v20, %v6957_v21  ;;  %2388 = vmatprep.subr.bf16.mxu1 %v5572_v57  ;;  %v5608_v18 = vld [vmem:[#allocation14 + $0xc4] ss:$8 sps:$4 sm:$0xff]  }
 0x6d8   : > { %v1877_v22 = vpop.xlane.xlu1 %1876 }
 0x6d9   : > { %v1881_v23 = vsub.f32 %v1868_v58, %v1877_v22  ;;  %v5573_v58 = vld [vmem:[#allocation14 + $0x10] ss:$8 sps:$4 sm:$0xff]   ;;  %v5611_v22 = vld [vmem:[#allocation14 + $0xd4] ss:$8 sps:$4 sm:$0xff]  }
 0x6db   : > { %v1883_v24 = vmul.f32 1.442695, %v1881_v23  ;;  %v5609_v23 = vld [vmem:[#allocation14 + $0xd0] ss:$8 sps:$4 sm:$0xff]  }
 0x6dc   : > { %v1880_v25 = vpop.xlane.xlu1 %1879 }
 0x6dd   : > { %5830 = vpow2.f32 %v1883_v24  ;;  %v1882_v26 = vsub.f32 %v1871_v61, %v1880_v25  ;;  %v5581_v61 = vld [vmem:[#allocation14 + $0x34] ss:$8 sps:$4 sm:$0xff]   ;;  %v5612_v24 = vld [vmem:[#allocation14 + $0xe0] ss:$8 sps:$4 sm:$0xff]   ;;  %v5614_v25 = vld [vmem:[#allocation14 + $0xe4] ss:$8 sps:$4 sm:$0xff]  }
 0x6df   : > { %v1885_v27 = vmul.f32 1.442695, %v1882_v26  ;;  %v5615_v26 = vld [vmem:[#allocation14 + $0xf0] ss:$8 sps:$4 sm:$0xff]  }
 0x6e1   : > { %5832 = vpow2.f32 %v1885_v27  ;;  %v5617_v27 = vld [vmem:[#allocation14 + $0xf4] ss:$8 sps:$4 sm:$0xff]  }
 0x6e7   : > { %v5831_v28 = vpop.eup %5830 }
 0x6e8   : > { %v1887_v29 = vsel %vm1540_vm2, %v5831_v28, 0.0 }
 0x6e9   : > { %1888 = vadd.xlane.f32.xlu1 %v1887_v29 }
 0x6eb   : > { %v5833_v30 = vpop.eup %5832 }
 0x6ec   : > { %v1890_v32 = vsel %vm1540_vm2, %v5833_v30, 0.0 }
 0x6ed   : > { %1891 = vadd.xlane.f32.xlu1 %v1890_v32 }
 0x705   : > { %v2057_v33 = vpop.xlane.xlu1 %2056 }
 0x706   : > { %5834 = vrcp.f32 %v2057_v33 }
 0x709   : > { %v2060_v35 = vpop.xlane.xlu1 %2059 }
 0x70a   : > { %5836 = vrcp.f32 %v2060_v35 }
 0x710   : > { %v5835_v36 = vpop.eup %5834 }
 0x711   : > { %v2063_v38 = vmul.f32 %v5835_v36, %v5827_v11  ;;  %v5597_v11 = vld [vmem:[#allocation14 + $0x90] ss:$8 sps:$4 sm:$0xff]  }
 0x713   : > { %v2067_v43 = vmul.f32 %v2066_v40, %v2063_v38 }
 0x714   : > { %v5837_v39 = vpop.eup %5836 }
 0x715   : > { %v2064_v42 = vmul.f32 %v5837_v39, %v5829_v15  ;;  %v5600_v15 = vld [vmem:[#allocation14 + $0xa0] ss:$8 sps:$4 sm:$0xff]  }
 0x717   : > { %v2068_v10 = vmul.f32 %v2066_v40, %v2064_v42 }
 0x719   : > { %v2069_v44 = vpack.c.bf16 %v2068_v10, %v2067_v43 }
 0x71b   : > { %5201 = vmatmul.mubr.msk.bf16.vlgmr.msra.gmra.mrb[12].mxu0 %vm1540_vm2, %v2069_v44 }
 0x776   : > { %v1889_v45 = vpop.xlane.xlu1 %1888 }
 0x777   : > { %5838 = vrcp.f32 %v1889_v45  ;;  %v2216_v45 = vld [vmem:[#allocation15] sm:$0x3] }
 0x77a   : > { %v1892_v46 = vpop.xlane.xlu1 %1891 }
 0x77b   : > { %5840 = vrcp.f32 %v1892_v46  ;;  %v2221_v46 = vrot.slane %v2216_v45, %v6855_v37 }
 0x781   : > { %v5839_v47 = vpop.eup %5838 }
 0x782   : > { %v1895_v48 = vmul.f32 %v5839_v47, %v5831_v28  ;;  %v2225_v47 = vrot.slane %v2216_v45, %v6858_v41 }
 0x784   : > { %v1899_v52 = vmul.f32 %v1898_v50, %v1895_v48  ;;  %v5844_v48 = vld [vmem:[%s6797_s27] sm:$0xff] }
 0x785   : > { %v5841_v49 = vpop.eup %5840 }
 0x786   : > { %v1896_v51 = vmul.f32 %v5841_v49, %v5833_v30  ;;  %v2431_v49 = vunpack.c.l.bf16 %v5844_v48 }
 0x788   : > { %v1900_v53 = vmul.f32 %v1898_v50, %v1896_v51  ;;  %v2432_v51 = vunpack.c.h.bf16 %v5844_v48  ;;  %v2535_v48 = vld [vmem:[#allocation21 + $0x140] sm:$0xff] }
 0x78a   : > { %v1901_v55 = vpack.c.bf16 %v1900_v53, %v1899_v52 }
 0x78c   : > { %5183 = vmatmul.mubr.msk.bf16.vlgmr.msra.gmra.mrb[24].mxu1 %vm1540_vm2, %v1901_v55 }
 0x78d   : > { %2389 = vmatpush1.bf16.msra.mxu1 %v5570_v54  ;;  %v5845_v54 = vld [vmem:[%s6797_s27 + $0x8] sm:$0xff]  ;;  %s4475_s27 = sshll.u32 %s707_s25, 4  ;;  %s7084_s27 = int_to_ptr.vmem [resolvable:$true] %s4475_s27 }
 0x78e   : > { %2390 = vmatprep.subr.bf16.mxu1 %v5575_v56  ;;  %v2433_v55 = vunpack.c.l.bf16 %v5845_v54  ;;  %s6199_s0 = scalar_lea.vmem %s7084_s27, 512 }
 0x78f   : > { %p6200_p5 = scmp.ne.s32.totalorder %s7084_s27, %s6199_s0 }
 0x791   : > { %2391 = vmatpush1.bf16.msra.mxu1 %v5573_v58  ;;  %p6201_p1 = pnand %p6200_p5, %p7217_p4 }
 0x792   : > { %2392 = vmatprep.subr.bf16.mxu1 %v5578_v59 }
 0x793   : > { %p6202_p3 = pneg %p6201_p1 }
 0x795   : > { %2393 = vmatpush1.bf16.msra.mxu1 %v5576_v60 }
 0x796   : > { %2394 = vmatprep.subr.bf16.mxu1 %v5581_v61  ;;  %v2434_v61 = vunpack.c.h.bf16 %v5845_v54 }
 0x799   : > { %2395 = vmatpush1.bf16.msra.mxu1 %v5579_v0 }
 0x79a   : > { %2396 = vmatprep.subr.bf16.mxu1 %v5584_v1 }
 0x79d   : > { %2397 = vmatpush1.bf16.msra.mxu1 %v5582_v2 }
 0x79e   : > { %2398 = vmatprep.subr.bf16.mxu1 %v5587_v3 }
 0x7a1   : > { %2399 = vmatpush1.bf16.msra.mxu1 %v5585_v31 }
 0x7a2   : > { %2400 = vmatprep.subr.bf16.mxu1 %v5590_v13  ;;  %v2495_v13 = vld [vmem:[#allocation21] sm:$0xff] }
 0x7a5   : > { %2401 = vmatpush1.bf16.msra.mxu1 %v5588_v14  ;;  %v2499_v14 = vld [vmem:[#allocation21 + $0x20] sm:$0xff] }
 0x7a6   : > { %2402 = vmatprep.subr.bf16.mxu1 %v5593_v4  ;;  %v2496_v4 = vld [vmem:[#allocation21 + $0x8] sm:$0xff] }
 0x7a9   : > { %2403 = vmatpush1.bf16.msra.mxu1 %v5591_v5  ;;  %v4845_v5 = vcombine.low %v2495_v13, %v2499_v14 }
 0x7aa   : > { %2404 = vmatprep.subr.bf16.mxu1 %v5596_v6  ;;  %v4846_v6 = vcombine.high %v2495_v13, %v2499_v14  ;;  %v2555_v13 = vld [vmem:[#allocation21 + $0x1e0] sm:$0xff]  ;;  %v2552_v14 = vld [vmem:[#allocation21 + $0x1c8] sm:$0xff] }
 0x7ac   : > { %3305 = vmatprep.subr.bf16.mxu0 %v4846_v6 }
 0x7ad   : > { %2405 = vmatpush1.bf16.msra.mxu1 %v5594_v7  ;;  %v2500_v7 = vld [vmem:[#allocation21 + $0x28] sm:$0xff]  ;;  %3306 = vmatpush1.bf16.msra.mxu0 %v4845_v5 }
 0x7ae   : > { %2406 = vmatprep.subr.bf16.mxu1 %v5599_v9  ;;  %v2503_v9 = vld [vmem:[#allocation21 + $0x40] sm:$0xff] }
 0x7b1   : > { %2407 = vmatpush1.bf16.msra.mxu1 %v5597_v11  ;;  %v2507_v11 = vld [vmem:[#allocation21 + $0x60] sm:$0xff] }
 0x7b2   : > { %2408 = vmatprep.subr.bf16.mxu1 %v5602_v12  ;;  %v4847_v12 = vcombine.low %v2496_v4, %v2500_v7 }
 0x7b5   : > { %2409 = vmatpush1.bf16.msra.mxu1 %v5600_v15  ;;  %v4848_v15 = vcombine.high %v2496_v4, %v2500_v7  ;;  %v2556_v4 = vld [vmem:[#allocation21 + $0x1e8] sm:$0xff] }
 0x7b6   : > { %2410 = vmatprep.subr.bf16.mxu1 %v5605_v16  ;;  %v4854_v16 = vcombine.high %v2503_v9, %v2507_v11 }
 0x7b8   : > { %3307 = vmatprep.subr.bf16.mxu0 %v4854_v16 }
 0x7b9   : > { %2411 = vmatpush1.bf16.msra.mxu1 %v5603_v17  ;;  %v2504_v17 = vld [vmem:[#allocation21 + $0x48] sm:$0xff] }
 0x7ba   : > { %2412 = vmatprep.subr.bf16.mxu1 %v5608_v18  ;;  %v2508_v18 = vld [vmem:[#allocation21 + $0x68] sm:$0xff] }
 0x7bd   : > { %2413 = vmatpush1.bf16.msra.mxu1 %v5606_v19  ;;  %v2511_v19 = vld [vmem:[#allocation21 + $0x80] sm:$0xff] }
 0x7be   : > { %2414 = vmatprep.subr.bf16.mxu1 %v5611_v22  ;;  %v4856_v22 = vcombine.high %v2504_v17, %v2508_v18 }
 0x7c1   : > { %2415 = vmatpush1.bf16.msra.mxu1 %v5609_v23  ;;  %v2515_v23 = vld [vmem:[#allocation21 + $0xa0] sm:$0xff] }
 0x7c2   : > { %2416 = vmatprep.subr.bf16.mxu1 %v5614_v25  ;;  %v2516_v25 = vld [vmem:[#allocation21 + $0xa8] sm:$0xff] }
 0x7c5   : > { %2417 = vmatpush1.bf16.msra.mxu1 %v5612_v24  ;;  %v2512_v24 = vld [vmem:[#allocation21 + $0x88] sm:$0xff] }
 0x7c6   : > { %2418 = vmatprep.subr.bf16.mxu1 %v5617_v27  ;;  %v4855_v27 = vcombine.low %v2504_v17, %v2508_v18 }
 0x7c9   : > { %2419 = vmatpush1.bf16.msra.mxu1 %v5615_v26  ;;  %v4853_v26 = vcombine.low %v2503_v9, %v2507_v11  ;;  %v4904_v9 = vcombine.high %v2552_v14, %v2556_v4 }
 0x7ca   : > { %3348 = vmatprep.subr.bf16.mxu1 %v4848_v15 }
 0x7cb   : > { %3308 = vmatpush1.bf16.msra.mxu0 %v4853_v26 }
 0x7ee   : > { %v2155_v28 = vpop.f32.mrb[12].mxu0 }
 0x7ef   : > { %v5202_v29 = vpop.f32.mrb[13].mxu0 }
 0x7f0   : > { %v2158_v30 = vpop.f32.mrb[14].mxu0  ;;  %v4864_v29 = vcombine.high %v2512_v24, %v2516_v25 }
 0x7f1   : > { %v5414_v32 = vpack.i.bf16 %v2158_v30, %v2155_v28  ;;  %v5203_v33 = vpop.f32.mrb[15].mxu0  ;;  %v4862_v28 = vcombine.high %v2511_v19, %v2515_v23  ;;  %v2519_v30 = vld [vmem:[#allocation21 + $0xc0] sm:$0xff] }
 0x7f2   : > { %v2520_v33 = vld [vmem:[#allocation21 + $0xc8] sm:$0xff] }
 0x7f3   : > { %5415 = vrot.lane.b32.xlu1 %v5414_v32, %s6320_s3  ;;  %v2523_v32 = vld [vmem:[#allocation21 + $0xe0] sm:$0xff]  ;;  %3309 = vmatprep.subr.bf16.mxu0 %v4862_v28  ;;  %s5107_s3 = sshll.u32 %s7197_s18, 9 }
 0x7f4   : > { %s7091_s18 = scalar_lea.hbm %s7216_s16, %s5107_s3 }
 0x85f   : > { %v1983_v35 = vpop.f32.mrb[24].mxu1 }
 0x860   : > { %v5184_v36 = vpop.f32.mrb[25].mxu1 }
 0x861   : > { %v1986_v38 = vpop.f32.mrb[26].mxu1  ;;  %v4861_v36 = vcombine.low %v2511_v19, %v2515_v23 }
 0x862   : > { %v5185_v39 = vpop.f32.mrb[27].mxu1 }
 0x863   : > { %v4870_v39 = vcombine.high %v2519_v30, %v2523_v32  ;;  %3310 = vmatpush1.bf16.msra.mxu0 %v4861_v36  ;;  %v2563_v36 = vld [vmem:[#allocation21 + $0x220] sm:$0xff] }
 0x865   : > { %v5416_v40 = vpop.permute.xlu1 %5415  ;;  %3311 = vmatprep.subr.bf16.mxu0 %v4870_v39  ;;  %v2564_v39 = vld [vmem:[#allocation21 + $0x228] sm:$0xff] }
 0x866   : > { %v5418_v42 = vunpack.i.h.bf16 %v5416_v40  ;;  %v5417_v43 = vunpack.i.l.bf16 %v5416_v40 }
 0x868   : > { %v2180_v10 = vsel %vm1492_vm1, %v1983_v35, %v5417_v43  ;;  %v2181_v44 = vsel %vm1492_vm1, %v1986_v38, %v5418_v42  ;;  %v2524_v35 = vld [vmem:[#allocation21 + $0xe8] sm:$0xff]  ;;  %v4863_v38 = vcombine.low %v2512_v24, %v2516_v25  ;;  %v2527_v42 = vld [vmem:[#allocation21 + $0x100] sm:$0xff] }
 0x869   : > { %v2183_v57 = vpack.c.bf16 %v2181_v44, %v2180_v10  ;;  %v4872_v40 = vcombine.high %v2520_v33, %v2524_v35  ;;  %v2531_v43 = vld [vmem:[#allocation21 + $0x120] sm:$0xff]  ;;  %v2528_v10 = vld [vmem:[#allocation21 + $0x108] sm:$0xff]  ;;  %v4871_v45 = vcombine.low %v2520_v33, %v2524_v35 }
 0x86a   : > { %v2532_v44 = vld [vmem:[#allocation21 + $0x128] sm:$0xff] }
 0x86b   : > { %2420 = vmatprep.mubr.bf16.mxu1 %v2183_v57  ;;  %v4869_v57 = vcombine.low %v2519_v30, %v2523_v32 }
 0x86c   : > { %2421 = vmatmul.mubr.bf16.vlgmr.msra.gmra.mrb[28].mxu1 %v2182_v8 }
 0x86d   : > { %3349 = vmatpush1.bf16.msra.mxu1 %v4847_v12  ;;  %3312 = vmatpush1.bf16.msra.mxu0 %v4869_v57  ;;  %v4903_v12 = vcombine.low %v2552_v14, %v2556_v4  ;;  %v2568_v57 = vld [vmem:[#allocation21 + $0x248] sm:$0xff]  ;;  %v2591_v14 = vld [vmem:[#allocation21 + $0x300] sm:$0xff] }
 0x86e   : > { %3350 = vmatprep.subr.bf16.mxu1 %v4856_v22  ;;  %v2595_v4 = vld [vmem:[#allocation21 + $0x320] sm:$0xff] }
 0x871   : > { %3351 = vmatpush1.bf16.msra.mxu1 %v4855_v27 }
 0x872   : > { %3352 = vmatprep.subr.bf16.mxu1 %v4864_v29 }
 0x875   : > { %3353 = vmatpush1.bf16.msra.mxu1 %v4863_v38 }
 0x876   : > { %3354 = vmatprep.subr.bf16.mxu1 %v4872_v40 }
 0x879   : > { %3355 = vmatpush1.bf16.msra.mxu1 %v4871_v45 }
 0x93f   : > { %v2422_v50 = vpop.f32.mrb[28].mxu1 }
 0x940   : > { %v2423_v52 = vadd.f32 %v2422_v50, %v2221_v46  ;;  %v2424_v53 = vpop.f32.mrb[29].mxu1  ;;  %v2536_v50 = vld [vmem:[#allocation21 + $0x148] sm:$0xff] }
 0x941   : > { %v2425_v56 = vadd.f32 %v2424_v53, %v2225_v47  ;;  %v2426_v58 = vpop.f32.mrb[30].mxu1  ;;  %v4879_v53 = vcombine.low %v2528_v10, %v2532_v44 }
 0x942   : > { %v6975_v59 = vadd.f32 %v2431_v49, %v2423_v52  ;;  %v2427_v60 = vadd.f32 %v2426_v58, %v2221_v46  ;;  %v2428_v20 = vpop.f32.mrb[31].mxu1  ;;  %v4878_v46 = vcombine.high %v2527_v42, %v2531_v43  ;;  %v2539_v49 = vld [vmem:[#allocation21 + $0x160] sm:$0xff]  ;;  %v4877_v52 = vcombine.low %v2527_v42, %v2531_v43 }
 0x943   : > { %v6977_v21 = vadd.f32 %v2432_v51, %v2425_v56  ;;  %v2429_v8 = vadd.f32 %v2428_v20, %v2225_v47  ;;  %v4880_v47 = vcombine.high %v2528_v10, %v2532_v44  ;;  %v2540_v51 = vld [vmem:[#allocation21 + $0x168] sm:$0xff]  ;;  %v4886_v54 = vcombine.high %v2535_v48, %v2539_v49  ;;  %v2543_v56 = vld [vmem:[#allocation21 + $0x180] sm:$0xff] }
 0x944   : > { %v6979_v0 = vadd.f32 %v2433_v55, %v2427_v60  ;;  %3313 = vmatprep.subr.bf16.mxu0 %v4878_v46  ;;  %v4888_v55 = vcombine.high %v2536_v50, %v2540_v51  ;;  %v2547_v58 = vld [vmem:[#allocation21 + $0x1a0] sm:$0xff]  ;;  %v2544_v60 = vld [vmem:[#allocation21 + $0x188] sm:$0xff] }
 0x945   : > { %v2439_v1 = vadd.f32 %v6977_v21, %v6975_v59  ;;  %v6983_v2 = vadd.f32 %v2434_v61, %v2429_v8  ;;  %3356 = vmatprep.subr.bf16.mxu1 %v4880_v47  ;;  %v2548_v20 = vld [vmem:[#allocation21 + $0x1a8] sm:$0xff]  ;;  %3314 = vmatpush1.bf16.msra.mxu0 %v4877_v52  ;;  %v4885_v8 = vcombine.low %v2535_v48, %v2539_v49  ;;  %v2567_v10 = vld [vmem:[#allocation21 + $0x240] sm:$0xff] }
 0x946   : > { %3357 = vmatpush1.bf16.msra.mxu1 %v4879_v53  ;;  %3315 = vmatprep.subr.bf16.mxu0 %v4886_v54  ;;  %v4887_v61 = vcombine.low %v2536_v50, %v2540_v51  ;;  %v4893_v5 = vcombine.low %v2543_v56, %v2547_v58  ;;  %v4895_v6 = vcombine.low %v2544_v60, %v2548_v20  ;;  %v2571_v44 = vld [vmem:[#allocation21 + $0x260] sm:$0xff]  ;;  %v2572_v46 = vld [vmem:[#allocation21 + $0x268] sm:$0xff] }
 0x947   : > { %v2440_v3 = vadd.f32 %v2439_v1, %v6979_v0  ;;  %v4894_v1 = vcombine.high %v2543_v56, %v2547_v58  ;;  %3358 = vmatprep.subr.bf16.mxu1 %v4888_v55  ;;  %v4918_v45 = vcombine.high %v2567_v10, %v2571_v44  ;;  %v4917_v47 = vcombine.low %v2567_v10, %v2571_v44  ;;  %v2575_v50 = vld [vmem:[#allocation21 + $0x280] sm:$0xff]  ;;  %v2576_v52 = vld [vmem:[#allocation21 + $0x288] sm:$0xff]  ;;  %v2497_v44 = vld [vmem:[#allocation21 + $0x10] sm:$0xff] }
 0x948   : > { %v4919_v48 = vcombine.low %v2568_v57, %v2572_v46  ;;  %v4920_v49 = vcombine.high %v2568_v57, %v2572_v46  ;;  %v2579_v51 = vld [vmem:[#allocation21 + $0x2a0] sm:$0xff]  ;;  %v2580_v54 = vld [vmem:[#allocation21 + $0x2a8] sm:$0xff]  ;;  %v2501_v57 = vld [vmem:[#allocation21 + $0x30] sm:$0xff] }
 0x949   : > { %v2441_v31 = vadd.f32 %v2440_v3, %v6983_v2  ;;  %v4896_v3 = vcombine.high %v2544_v60, %v2548_v20  ;;  %3316 = vmatpush1.bf16.msra.mxu0 %v4885_v8  ;;  %v4926_v53 = vcombine.high %v2575_v50, %v2579_v51  ;;  %v4925_v55 = vcombine.low %v2575_v50, %v2579_v51  ;;  %v2583_v60 = vld [vmem:[#allocation21 + $0x2c0] sm:$0xff]  ;;  %v2584_v8 = vld [vmem:[#allocation21 + $0x2c8] sm:$0xff] }
 0x94a   : > { %3359 = vmatpush1.bf16.msra.mxu1 %v4887_v61  ;;  %3317 = vmatprep.subr.bf16.mxu0 %v4894_v1  ;;  %v4927_v56 = vcombine.low %v2576_v52, %v2580_v54  ;;  %v4928_v58 = vcombine.high %v2576_v52, %v2580_v54  ;;  %v2587_v20 = vld [vmem:[#allocation21 + $0x2e0] sm:$0xff]  ;;  %v2588_v1 = vld [vmem:[#allocation21 + $0x2e8] sm:$0xff]  ;;  %v4850_v46 = vcombine.high %v2497_v44, %v2501_v57 }
 0x94b   : > { %2442 = vadd.xlane.f32.xlu0 %v2441_v31  ;;  %v2551_v31 = vld [vmem:[#allocation21 + $0x1c0] sm:$0xff]  ;;  %3360 = vmatprep.subr.bf16.mxu1 %v4896_v3  ;;  %v4934_v61 = vcombine.high %v2583_v60, %v2587_v20  ;;  %v4933_v3 = vcombine.low %v2583_v60, %v2587_v20 }
 0x94c   : > { %v4902_v7 = vcombine.high %v2551_v31, %v2555_v13  ;;  %v4901_v11 = vcombine.low %v2551_v31, %v2555_v13  ;;  %v4935_v31 = vcombine.low %v2584_v8, %v2588_v1  ;;  %v4936_v13 = vcombine.high %v2584_v8, %v2588_v1  ;;  %v2478_v8 = vld [vmem:[%s7213_s28 + $0x8] sm:$0xff]  ;;  %v2480_v1 = vld [vmem:[%s7213_s28 + $0x18] sm:$0xff] }
 0x94d   : > { %3318 = vmatpush1.bf16.msra.mxu0 %v4893_v5  ;;  %v2592_v5 = vld [vmem:[#allocation21 + $0x308] sm:$0xff] }
 0x94e   : > { %3361 = vmatpush1.bf16.msra.mxu1 %v4895_v6  ;;  %3319 = vmatprep.subr.bf16.mxu0 %v4902_v7  ;;  %v4941_v6 = vcombine.low %v2591_v14, %v2595_v4  ;;  %v4942_v7 = vcombine.high %v2591_v14, %v2595_v4  ;;  %v2486_v4 = vld [vmem:[#allocation19 + $0x8] sm:$0xff] }
 0x94f   : > { %3362 = vmatprep.subr.bf16.mxu1 %v4904_v9  ;;  %v2596_v9 = vld [vmem:[#allocation21 + $0x328] sm:$0xff] }
 0x951   : > { %3320 = vmatpush1.bf16.msra.mxu0 %v4901_v11  ;;  %v2599_v11 = vld [vmem:[#allocation21 + $0x340] sm:$0xff] }
 0x952   : > { %3363 = vmatpush1.bf16.msra.mxu1 %v4903_v12  ;;  %v2603_v12 = vld [vmem:[#allocation21 + $0x360] sm:$0xff] }
 0x9d8   : > { %v2443_v15 = vpop.xlane.xlu0 %2442 }
 0x9d9   : > { %v2444_v16 = vrot.slane %v2443_v15, 4 }
 0x9db   : > { %v2445_v17 = vadd.f32 %v2444_v16, %v2443_v15  ;;  %v4943_v15 = vcombine.low %v2592_v5, %v2596_v9  ;;  %v4944_v16 = vcombine.high %v2592_v5, %v2596_v9  ;;  %v2485_v9 = vld [vmem:[#allocation19] sm:$0xff] }
 0x9dd   : > { %v2446_v18 = vrot.slane %v2445_v17, 2 }
 0x9df   : > { %v2447_v19 = vadd.f32 %v2446_v18, %v2445_v17  ;;  %v4950_v17 = vcombine.high %v2599_v11, %v2603_v12  ;;  %v2600_v18 = vld [vmem:[#allocation21 + $0x348] sm:$0xff] }
 0x9e1   : > { %v2448_v22 = vrot.slane %v2447_v19, 1 }
 0x9e3   : > { %v2449_v23 = vadd.f32 %v2448_v22, %v2447_v19  ;;  %v2604_v19 = vld [vmem:[#allocation21 + $0x368] sm:$0xff] }
 0x9e4   : > { %v4952_v22 = vcombine.high %v2600_v18, %v2604_v19 }
 0x9e5   : > { %v2450_v24 = vmul.f32 0.00024414063, %v2449_v23  ;;  %v2607_v23 = vld [vmem:[#allocation21 + $0x380] sm:$0xff] }
 0x9e7   : > { %v6988_v25 = vsub.f32 %v6975_v59, %v2450_v24  ;;  %v6991_v26 = vsub.f32 %v6977_v21, %v2450_v24  ;;  %v6994_v27 = vsub.f32 %v6979_v0, %v2450_v24  ;;  %v6997_v28 = vsub.f32 %v6983_v2, %v2450_v24  ;;  %v2559_v0 = vld [vmem:[#allocation21 + $0x200] sm:$0xff]  ;;  %v2560_v2 = vld [vmem:[#allocation21 + $0x208] sm:$0xff] }
 0x9e8   : > { %v4910_v38 = vcombine.high %v2559_v0, %v2563_v36  ;;  %v4909_v40 = vcombine.low %v2559_v0, %v2563_v36  ;;  %v4911_v42 = vcombine.low %v2560_v2, %v2564_v39  ;;  %v4912_v43 = vcombine.high %v2560_v2, %v2564_v39  ;;  %v2611_v24 = vld [vmem:[#allocation21 + $0x3a0] sm:$0xff]  ;;  %v2616_v36 = vld [vmem:[#allocation21 + $0x3c8] sm:$0xff] }
 0x9e9   : > { %v2455_v29 = vmul.f32 %v6988_v25, %v6988_v25  ;;  %v2456_v30 = vmul.f32 %v6991_v26, %v6991_v26  ;;  %v2457_v32 = vmul.f32 %v6994_v27, %v6994_v27  ;;  %v2458_v21 = vmul.f32 %v6997_v28, %v6997_v28  ;;  %v2619_v0 = vld [vmem:[#allocation21 + $0x3e0] sm:$0xff]  ;;  %v2620_v2 = vld [vmem:[#allocation21 + $0x3e8] sm:$0xff] }
 0x9ea   : > { %3321 = vmatprep.subr.bf16.mxu0 %v4910_v38  ;;  %3364 = vmatprep.subr.bf16.mxu1 %v4912_v43  ;;  %v4957_v38 = vcombine.low %v2607_v23, %v2611_v24  ;;  %v4967_v10 = vcombine.low %v2616_v36, %v2620_v2 }
 0x9eb   : > { %v2459_v59 = vadd.f32 %v2456_v30, %v2455_v29  ;;  %3322 = vmatpush1.bf16.msra.mxu0 %v4909_v40  ;;  %3365 = vmatpush1.bf16.msra.mxu1 %v4911_v42  ;;  %v2608_v29 = vld [vmem:[#allocation21 + $0x388] sm:$0xff]  ;;  %v4968_v42 = vcombine.high %v2616_v36, %v2620_v2 }
 0x9ec   : > { %3323 = vmatprep.subr.bf16.mxu0 %v4918_v45  ;;  %3366 = vmatprep.subr.bf16.mxu1 %v4920_v49  ;;  %v2612_v30 = vld [vmem:[#allocation21 + $0x3a8] sm:$0xff]  ;;  %v2498_v45 = vld [vmem:[#allocation21 + $0x18] sm:$0xff] }
 0x9ed   : > { %v2460_v33 = vadd.f32 %v2459_v59, %v2457_v32  ;;  %v4949_v32 = vcombine.low %v2599_v11, %v2603_v12  ;;  %v4951_v59 = vcombine.low %v2600_v18, %v2604_v19  ;;  %v4959_v39 = vcombine.low %v2608_v29, %v2612_v30  ;;  %v2487_v11 = vld [vmem:[#allocation19 + $0x10] sm:$0xff] }
 0x9ef   : > { %v2461_v35 = vadd.f32 %v2460_v33, %v2458_v21  ;;  %3324 = vmatpush1.bf16.msra.mxu0 %v4917_v47  ;;  %3367 = vmatpush1.bf16.msra.mxu1 %v4919_v48  ;;  %v4958_v21 = vcombine.high %v2607_v23, %v2611_v24  ;;  %v4960_v33 = vcombine.high %v2608_v29, %v2612_v30  ;;  %v2502_v47 = vld [vmem:[#allocation21 + $0x38] sm:$0xff]  ;;  %v2509_v23 = vld [vmem:[#allocation21 + $0x70] sm:$0xff] }
 0x9f0   : > { %3325 = vmatprep.subr.bf16.mxu0 %v4926_v53  ;;  %3368 = vmatprep.subr.bf16.mxu1 %v4928_v58  ;;  %v4849_v48 = vcombine.low %v2497_v44, %v2501_v57  ;;  %v4851_v49 = vcombine.low %v2498_v45, %v2502_v47  ;;  %v4852_v50 = vcombine.high %v2498_v45, %v2502_v47  ;;  %v2510_v24 = vld [vmem:[#allocation21 + $0x78] sm:$0xff]  ;;  %v2513_v30 = vld [vmem:[#allocation21 + $0x90] sm:$0xff] }
 0x9f1   : > { %2462 = vadd.xlane.f32.xlu1 %v2461_v35  ;;  %v2615_v35 = vld [vmem:[#allocation21 + $0x3c0] sm:$0xff]  ;;  %v2533_v47 = vld [vmem:[#allocation21 + $0x130] sm:$0xff] }
 0x9f2   : > { %v4966_v40 = vcombine.high %v2615_v35, %v2619_v0  ;;  %v4965_v43 = vcombine.low %v2615_v35, %v2619_v0  ;;  %v2518_v35 = vld [vmem:[#allocation21 + $0xb8] sm:$0xff] }
 0x9f3   : > { %3326 = vmatpush1.bf16.msra.mxu0 %v4925_v55  ;;  %3369 = vmatpush1.bf16.msra.mxu1 %v4927_v56 }
 0x9f4   : > { %3327 = vmatprep.subr.bf16.mxu0 %v4934_v61  ;;  %3370 = vmatprep.subr.bf16.mxu1 %v4936_v13 }
 0x9f7   : > { %3328 = vmatpush1.bf16.msra.mxu0 %v4933_v3  ;;  %3371 = vmatpush1.bf16.msra.mxu1 %v4935_v31  ;;  %v2477_v3 = vld [vmem:[%s7213_s28] sm:$0xff]  ;;  %v2479_v31 = vld [vmem:[%s7213_s28 + $0x10] sm:$0xff] }
 0x9f8   : > { %3329 = vmatprep.subr.bf16.mxu0 %v4942_v7  ;;  %3372 = vmatprep.subr.bf16.mxu1 %v4944_v16  ;;  %v2488_v7 = vld [vmem:[#allocation19 + $0x18] sm:$0xff] }
 0x9fb   : > { %3330 = vmatpush1.bf16.msra.mxu0 %v4941_v6  ;;  %3373 = vmatpush1.bf16.msra.mxu1 %v4943_v15 }
 0x9fc   : > { %3331 = vmatprep.subr.bf16.mxu0 %v4950_v17  ;;  %3374 = vmatprep.subr.bf16.mxu1 %v4952_v22 }
 0x9ff   : > { %3332 = vmatpush1.bf16.msra.mxu0 %v4949_v32  ;;  %3375 = vmatpush1.bf16.msra.mxu1 %v4951_v59 }
 0xa00   : > { %3333 = vmatprep.subr.bf16.mxu0 %v4958_v21  ;;  %3376 = vmatprep.subr.bf16.mxu1 %v4960_v33  ;;  %v2517_v21 = vld [vmem:[#allocation21 + $0xb0] sm:$0xff]  ;;  %v2514_v33 = vld [vmem:[#allocation21 + $0x98] sm:$0xff] }
 0xa01   : > { %v4866_v2 = vcombine.high %v2513_v30, %v2517_v21  ;;  %v4867_v44 = vcombine.low %v2514_v33, %v2518_v35 }
 0xa03   : > { %3334 = vmatpush1.bf16.msra.mxu0 %v4957_v38  ;;  %3377 = vmatpush1.bf16.msra.mxu1 %v4959_v39  ;;  %v4868_v38 = vcombine.high %v2514_v33, %v2518_v35  ;;  %v2521_v39 = vld [vmem:[#allocation21 + $0xd0] sm:$0xff] }
 0xa04   : > { %3335 = vmatprep.subr.bf16.mxu0 %v4966_v40  ;;  %3378 = vmatprep.subr.bf16.mxu1 %v4968_v42  ;;  %v2525_v40 = vld [vmem:[#allocation21 + $0xf0] sm:$0xff]  ;;  %v2522_v42 = vld [vmem:[#allocation21 + $0xd8] sm:$0xff] }
 0xa05   : > { %v4874_v57 = vcombine.high %v2521_v39, %v2525_v40  ;;  %v2569_v33 = vld [vmem:[#allocation21 + $0x250] sm:$0xff] }
 0xa06   : > { %v2573_v35 = vld [vmem:[#allocation21 + $0x270] sm:$0xff] }
 0xa07   : > { %3336 = vmatpush1.bf16.msra.mxu0 %v4965_v43  ;;  %3379 = vmatpush1.bf16.msra.mxu1 %v4967_v10  ;;  %v2526_v43 = vld [vmem:[#allocation21 + $0xf8] sm:$0xff]  ;;  %v4865_v10 = vcombine.low %v2513_v30, %v2517_v21 }
 0xa08   : > { %3391 = vmatprep.subr.bf16.mxu0 %v4850_v46  ;;  %3434 = vmatprep.subr.bf16.mxu1 %v4852_v50  ;;  %v4876_v45 = vcombine.high %v2522_v42, %v2526_v43  ;;  %v2529_v46 = vld [vmem:[#allocation21 + $0x110] sm:$0xff]  ;;  %v4873_v50 = vcombine.low %v2521_v39, %v2525_v40  ;;  %v4922_v39 = vcombine.high %v2569_v33, %v2573_v35 }
 0xa7e   : > { %v2463_v51 = vpop.xlane.xlu1 %2462 }
 0xa7f   : > { %v2464_v52 = vrot.slane %v2463_v51, 4 }
 0xa81   : > { %v2465_v53 = vadd.f32 %v2464_v52, %v2463_v51  ;;  %v4875_v51 = vcombine.low %v2522_v42, %v2526_v43  ;;  %v4882_v52 = vcombine.high %v2529_v46, %v2533_v47  ;;  %v2577_v42 = vld [vmem:[#allocation21 + $0x290] sm:$0xff] }
 0xa82   : > { %v2581_v43 = vld [vmem:[#allocation21 + $0x2b0] sm:$0xff] }
 0xa83   : > { %v2466_v54 = vrot.slane %v2465_v53, 2 }
 0xa85   : > { %v2467_v55 = vadd.f32 %v2466_v54, %v2465_v53  ;;  %v2537_v54 = vld [vmem:[#allocation21 + $0x150] sm:$0xff] }
 0xa87   : > { %v2468_v56 = vrot.slane %v2467_v55, 1 }
 0xa89   : > { %v2469_v58 = vadd.f32 %v2468_v56, %v2467_v55  ;;  %v2541_v55 = vld [vmem:[#allocation21 + $0x170] sm:$0xff]  ;;  %v2538_v56 = vld [vmem:[#allocation21 + $0x158] sm:$0xff] }
 0xa8b   : > { %v2470_v60 = vmul.f32 0.00024414063, %v2469_v58  ;;  %v2542_v58 = vld [vmem:[#allocation21 + $0x178] sm:$0xff] }
 0xa8d   : > { %v2471_v20 = vadd.f32 1e-05, %v2470_v60  ;;  %v4881_v60 = vcombine.low %v2529_v46, %v2533_v47  ;;  %v4930_v46 = vcombine.high %v2577_v42, %v2581_v43 }
 0xa8f   : > { %5842 = vrsqrt.f32 %v2471_v20 }
 0xa99   : > { %v5843_v61 = vpop.eup %5842 }
 0xa9a   : > { %v2474_v13 = vmul.f32 %v5843_v61, %v6991_v26  ;;  %v2476_v14 = vmul.f32 %v5843_v61, %v6997_v28  ;;  %v2473_v5 = vmul.f32 %v5843_v61, %v6988_v25  ;;  %v2475_v6 = vmul.f32 %v5843_v61, %v6994_v27  ;;  %v2505_v28 = vld [vmem:[#allocation21 + $0x50] sm:$0xff]  ;;  %v2506_v25 = vld [vmem:[#allocation21 + $0x58] sm:$0xff] }
 0xa9b   : > { %v4858_v32 = vcombine.high %v2505_v28, %v2509_v23  ;;  %v4860_v59 = vcombine.high %v2506_v25, %v2510_v24  ;;  %v4857_v0 = vcombine.low %v2505_v28, %v2509_v23  ;;  %v4859_v36 = vcombine.low %v2506_v25, %v2510_v24  ;;  %v2561_v23 = vld [vmem:[#allocation21 + $0x210] sm:$0xff]  ;;  %v2562_v24 = vld [vmem:[#allocation21 + $0x218] sm:$0xff] }
 0xa9c   : > { %v2482_v12 = vmul.f32 %v2478_v8, %v2474_v13  ;;  %v2484_v15 = vmul.f32 %v2480_v1, %v2476_v14  ;;  %v2481_v16 = vmul.f32 %v2477_v3, %v2473_v5  ;;  %v2483_v17 = vmul.f32 %v2479_v31, %v2475_v6  ;;  %v2545_v1 = vld [vmem:[#allocation21 + $0x190] sm:$0xff]  ;;  %v2546_v31 = vld [vmem:[#allocation21 + $0x198] sm:$0xff] }
 0xa9d   : > { %v4890_v8 = vcombine.high %v2537_v54, %v2541_v55  ;;  %v4892_v61 = vcombine.high %v2538_v56, %v2542_v58  ;;  %v2549_v3 = vld [vmem:[#allocation21 + $0x1b0] sm:$0xff]  ;;  %v2550_v13 = vld [vmem:[#allocation21 + $0x1b8] sm:$0xff]  ;;  %v4889_v14 = vcombine.low %v2537_v54, %v2541_v55 }
 0xa9e   : > { %v7023_v18 = vadd.f32 %v2486_v4, %v2482_v12  ;;  %v7025_v19 = vadd.f32 %v2488_v7, %v2484_v15  ;;  %v7027_v22 = vadd.f32 %v2485_v9, %v2481_v16  ;;  %v7029_v26 = vadd.f32 %v2487_v11, %v2483_v17  ;;  %v2553_v7 = vld [vmem:[#allocation21 + $0x1d0] sm:$0xff]  ;;  %v2554_v11 = vld [vmem:[#allocation21 + $0x1d8] sm:$0xff] }
 0xa9f   : > { %v4891_v4 = vcombine.low %v2538_v56, %v2542_v58  ;;  %v4898_v5 = vcombine.high %v2545_v1, %v2549_v3  ;;  %v4900_v6 = vcombine.high %v2546_v31, %v2550_v13  ;;  %v2557_v9 = vld [vmem:[#allocation21 + $0x1f0] sm:$0xff]  ;;  %v2558_v12 = vld [vmem:[#allocation21 + $0x1f8] sm:$0xff]  ;;  %v4897_v15 = vcombine.low %v2545_v1, %v2549_v3 }
 0xaa0   : > { %v2494_v27 = vpack.c.bf16 %v7025_v19, %v7023_v18  ;;  %v7035_v29 = vpack.c.bf16 %v7029_v26, %v7027_v22  ;;  %v4899_v16 = vcombine.low %v2546_v31, %v2550_v13  ;;  %v4906_v17 = vcombine.high %v2553_v7, %v2557_v9  ;;  %v2565_v25 = vld [vmem:[#allocation21 + $0x230] sm:$0xff] }
 0xaa1   : > { %v4908_v28 = vcombine.high %v2554_v11, %v2558_v12  ;;  %v4905_v30 = vcombine.low %v2553_v7, %v2557_v9  ;;  %v2593_v56 = vld [vmem:[#allocation21 + $0x310] sm:$0xff] }
 0xaa2   : > { %3337 = vmatprep.mubr.bf16.mxu0 %v2494_v27  ;;  %3380 = vmatprep.mubr.bf16.mxu1 %v2494_v27  ;;  %v2597_v58 = vld [vmem:[#allocation21 + $0x330] sm:$0xff] }
 0xaa3   : > { %3338 = vmatmul.mubr.bf16.vlgmr.msra.gmra.mrb[16].mxu0 %v7035_v29  ;;  %3381 = vmatmul.mubr.bf16.vlgmr.msra.gmra.mrb[32].mxu1 %v7035_v29  ;;  %v4946_v1 = vcombine.high %v2593_v56, %v2597_v58  ;;  %v2601_v31 = vld [vmem:[#allocation21 + $0x350] sm:$0xff] }
 0xaa4   : > { %3392 = vmatpush1.bf16.msra.mxu0 %v4849_v48  ;;  %3435 = vmatpush1.bf16.msra.mxu1 %v4851_v49  ;;  %v2530_v48 = vld [vmem:[#allocation21 + $0x118] sm:$0xff]  ;;  %v2605_v13 = vld [vmem:[#allocation21 + $0x370] sm:$0xff] }
 0xaa5   : > { %3423 = vmatprep.mubr.bf16.mxu0 %v2494_v27  ;;  %3466 = vmatprep.mubr.bf16.mxu1 %v2494_v27  ;;  %v2534_v49 = vld [vmem:[#allocation21 + $0x138] sm:$0xff]  ;;  %v4954_v7 = vcombine.high %v2601_v31, %v2605_v13 }
 0xaa6   : > { %3393 = vmatprep.subr.bf16.mxu0 %v4858_v32  ;;  %3436 = vmatprep.subr.bf16.mxu1 %v4860_v59  ;;  %v4884_v53 = vcombine.high %v2530_v48, %v2534_v49  ;;  %v4883_v20 = vcombine.low %v2530_v48, %v2534_v49  ;;  %v2566_v27 = vld [vmem:[#allocation21 + $0x238] sm:$0xff]  ;;  %v4907_v32 = vcombine.low %v2554_v11, %v2558_v12  ;;  %v2585_v48 = vld [vmem:[#allocation21 + $0x2d0] sm:$0xff] }
 0xaa7   : > { %v4914_v59 = vcombine.high %v2561_v23, %v2565_v25  ;;  %v4916_v21 = vcombine.high %v2562_v24, %v2566_v27  ;;  %v2589_v49 = vld [vmem:[#allocation21 + $0x2f0] sm:$0xff] }
 0xaa8   : > { %3394 = vmatpush1.bf16.msra.mxu0 %v4857_v0  ;;  %3437 = vmatpush1.bf16.msra.mxu1 %v4859_v36  ;;  %v2570_v0 = vld [vmem:[#allocation21 + $0x258] sm:$0xff]  ;;  %v4938_v54 = vcombine.high %v2585_v48, %v2589_v49  ;;  %v2609_v11 = vld [vmem:[#allocation21 + $0x390] sm:$0xff] }
 0xaa9   : > { %3395 = vmatprep.subr.bf16.mxu0 %v4866_v2  ;;  %3438 = vmatprep.subr.bf16.mxu1 %v4868_v38  ;;  %v2574_v36 = vld [vmem:[#allocation21 + $0x278] sm:$0xff]  ;;  %v4913_v2 = vcombine.low %v2561_v23, %v2565_v25  ;;  %v4915_v38 = vcombine.low %v2562_v24, %v2566_v27  ;;  %v2613_v12 = vld [vmem:[#allocation21 + $0x3b0] sm:$0xff] }
 0xaaa   : > { %v4924_v40 = vcombine.high %v2570_v0, %v2574_v36  ;;  %v4962_v23 = vcombine.high %v2609_v11, %v2613_v12  ;;  %v2617_v24 = vld [vmem:[#allocation21 + $0x3d0] sm:$0xff] }
 0xaab   : > { %v2621_v27 = vld [vmem:[#allocation21 + $0x3f0] sm:$0xff] }
 0xaac   : > { %3396 = vmatpush1.bf16.msra.mxu0 %v4865_v10  ;;  %3439 = vmatpush1.bf16.msra.mxu1 %v4867_v44  ;;  %v2578_v10 = vld [vmem:[#allocation21 + $0x298] sm:$0xff] }
 0xaad   : > { %3397 = vmatprep.subr.bf16.mxu0 %v4874_v57  ;;  %3440 = vmatprep.subr.bf16.mxu1 %v4876_v45  ;;  %v2582_v44 = vld [vmem:[#allocation21 + $0x2b8] sm:$0xff]  ;;  %v4921_v57 = vcombine.low %v2569_v33, %v2573_v35  ;;  %v4923_v45 = vcombine.low %v2570_v0, %v2574_v36  ;;  %v4970_v33 = vcombine.high %v2617_v24, %v2621_v27 }
 0xaae   : > { %v4932_v47 = vcombine.high %v2578_v10, %v2582_v44  ;;  %v4969_v0 = vcombine.low %v2617_v24, %v2621_v27 }
 0xab0   : > { %3398 = vmatpush1.bf16.msra.mxu0 %v4873_v50  ;;  %3441 = vmatpush1.bf16.msra.mxu1 %v4875_v51  ;;  %v2586_v50 = vld [vmem:[#allocation21 + $0x2d8] sm:$0xff] }
 0xab1   : > { %3399 = vmatprep.subr.bf16.mxu0 %v4882_v52  ;;  %3442 = vmatprep.subr.bf16.mxu1 %v4884_v53  ;;  %v2590_v51 = vld [vmem:[#allocation21 + $0x2f8] sm:$0xff]  ;;  %v4929_v52 = vcombine.low %v2577_v42, %v2581_v43  ;;  %v4931_v53 = vcombine.low %v2578_v10, %v2582_v44  ;;  %v5626_v42 = vld [vmem:[#allocation22 + $0x24] ss:$8 sps:$4 sm:$0xff]   ;;  %v5624_v43 = vld [vmem:[#allocation22 + $0x20] ss:$8 sps:$4 sm:$0xff]  }
 0xab2   : > { %v4940_v55 = vcombine.high %v2586_v50, %v2590_v51  ;;  %v5629_v10 = vld [vmem:[#allocation22 + $0x34] ss:$8 sps:$4 sm:$0xff]   ;;  %v5627_v44 = vld [vmem:[#allocation22 + $0x30] ss:$8 sps:$4 sm:$0xff]  }
 0xab4   : > { %3400 = vmatpush1.bf16.msra.mxu0 %v4881_v60  ;;  %3443 = vmatpush1.bf16.msra.mxu1 %v4883_v20  ;;  %v2594_v60 = vld [vmem:[#allocation21 + $0x318] sm:$0xff] }
 0xab5   : > { %3401 = vmatprep.subr.bf16.mxu0 %v4890_v8  ;;  %3444 = vmatprep.subr.bf16.mxu1 %v4892_v61  ;;  %v2598_v20 = vld [vmem:[#allocation21 + $0x338] sm:$0xff]  ;;  %v4937_v8 = vcombine.low %v2585_v48, %v2589_v49  ;;  %v4939_v61 = vcombine.low %v2586_v50, %v2590_v51  ;;  %v5636_v48 = vld [vmem:[#allocation22 + $0x60] ss:$8 sps:$4 sm:$0xff]   ;;  %v5644_v51 = vld [vmem:[#allocation22 + $0x84] ss:$8 sps:$4 sm:$0xff]  }
 0xab6   : > { %v4948_v3 = vcombine.high %v2594_v60, %v2598_v20  ;;  %v5641_v49 = vld [vmem:[#allocation22 + $0x74] ss:$8 sps:$4 sm:$0xff]   ;;  %v5639_v50 = vld [vmem:[#allocation22 + $0x70] ss:$8 sps:$4 sm:$0xff]  }
 0xab8   : > { %3402 = vmatpush1.bf16.msra.mxu0 %v4889_v14  ;;  %3445 = vmatpush1.bf16.msra.mxu1 %v4891_v4  ;;  %v2602_v14 = vld [vmem:[#allocation21 + $0x358] sm:$0xff] }
 0xab9   : > { %3403 = vmatprep.subr.bf16.mxu0 %v4898_v5  ;;  %3446 = vmatprep.subr.bf16.mxu1 %v4900_v6  ;;  %v2606_v4 = vld [vmem:[#allocation21 + $0x378] sm:$0xff]  ;;  %v4945_v5 = vcombine.low %v2593_v56, %v2597_v58  ;;  %v4947_v6 = vcombine.low %v2594_v60, %v2598_v20  ;;  %v5648_v56 = vld [vmem:[#allocation22 + $0xa0] ss:$8 sps:$4 sm:$0xff]   ;;  %v5656_v20 = vld [vmem:[#allocation22 + $0xc4] ss:$8 sps:$4 sm:$0xff]  }
 0xaba   : > { %v4956_v9 = vcombine.high %v2602_v14, %v2606_v4  ;;  %v5653_v58 = vld [vmem:[#allocation22 + $0xb4] ss:$8 sps:$4 sm:$0xff]   ;;  %v5651_v60 = vld [vmem:[#allocation22 + $0xb0] ss:$8 sps:$4 sm:$0xff]  }
 0xabc   : > { %3404 = vmatpush1.bf16.msra.mxu0 %v4897_v15  ;;  %3447 = vmatpush1.bf16.msra.mxu1 %v4899_v16  ;;  %v2610_v15 = vld [vmem:[#allocation21 + $0x398] sm:$0xff] }
 0xabd   : > { %3405 = vmatprep.subr.bf16.mxu0 %v4906_v17  ;;  %3448 = vmatprep.subr.bf16.mxu1 %v4908_v28  ;;  %v2614_v16 = vld [vmem:[#allocation21 + $0x3b8] sm:$0xff]  ;;  %v4953_v17 = vcombine.low %v2601_v31, %v2605_v13  ;;  %v4955_v28 = vcombine.low %v2602_v14, %v2606_v4  ;;  %v5660_v31 = vld [vmem:[#allocation22 + $0xe0] ss:$8 sps:$4 sm:$0xff]   ;;  %v5668_v4 = vld [vmem:[#allocation22 + $0x104] ss:$8 sps:$4 sm:$0xff]  }
 0xabe   : > { %v4964_v25 = vcombine.high %v2610_v15, %v2614_v16  ;;  %v5665_v13 = vld [vmem:[#allocation22 + $0xf4] ss:$8 sps:$4 sm:$0xff]   ;;  %v5663_v14 = vld [vmem:[#allocation22 + $0xf0] ss:$8 sps:$4 sm:$0xff]  }
 0xac0   : > { %3406 = vmatpush1.bf16.msra.mxu0 %v4905_v30  ;;  %3449 = vmatpush1.bf16.msra.mxu1 %v4907_v32  ;;  %v2618_v30 = vld [vmem:[#allocation21 + $0x3d8] sm:$0xff] }
 0xac1   : > { %3407 = vmatprep.subr.bf16.mxu0 %v4914_v59  ;;  %3450 = vmatprep.subr.bf16.mxu1 %v4916_v21  ;;  %v2622_v32 = vld [vmem:[#allocation21 + $0x3f8] sm:$0xff]  ;;  %v4961_v59 = vcombine.low %v2609_v11, %v2613_v12  ;;  %v4963_v21 = vcombine.low %v2610_v15, %v2614_v16 }
 0xac2   : > { %v4972_v35 = vcombine.high %v2618_v30, %v2622_v32  ;;  %v4971_v36 = vcombine.low %v2618_v30, %v2622_v32 }
 0xac4   : > { %3408 = vmatpush1.bf16.msra.mxu0 %v4913_v2  ;;  %3451 = vmatpush1.bf16.msra.mxu1 %v4915_v38  ;;  %v5620_v2 = vld [vmem:[#allocation22 + $0x4] ss:$8 sps:$4 sm:$0xff]   ;;  %v5618_v38 = vld [vmem:[#allocation22] ss:$8 sps:$4 sm:$0xff]  }
 0xac5   : > { %3409 = vmatprep.subr.bf16.mxu0 %v4922_v39  ;;  %3452 = vmatprep.subr.bf16.mxu1 %v4924_v40  ;;  %v5623_v39 = vld [vmem:[#allocation22 + $0x14] ss:$8 sps:$4 sm:$0xff]   ;;  %v5621_v40 = vld [vmem:[#allocation22 + $0x10] ss:$8 sps:$4 sm:$0xff]  }
 0xac8   : > { %3410 = vmatpush1.bf16.msra.mxu0 %v4921_v57  ;;  %3453 = vmatpush1.bf16.msra.mxu1 %v4923_v45  ;;  %v5632_v57 = vld [vmem:[#allocation22 + $0x44] ss:$8 sps:$4 sm:$0xff]   ;;  %v5630_v45 = vld [vmem:[#allocation22 + $0x40] ss:$8 sps:$4 sm:$0xff]  }
 0xac9   : > { %3411 = vmatprep.subr.bf16.mxu0 %v4930_v46  ;;  %3454 = vmatprep.subr.bf16.mxu1 %v4932_v47  ;;  %v5635_v46 = vld [vmem:[#allocation22 + $0x54] ss:$8 sps:$4 sm:$0xff]   ;;  %v5633_v47 = vld [vmem:[#allocation22 + $0x50] ss:$8 sps:$4 sm:$0xff]  }
 0xacc   : > { %3412 = vmatpush1.bf16.msra.mxu0 %v4929_v52  ;;  %3455 = vmatpush1.bf16.msra.mxu1 %v4931_v53  ;;  %v5642_v52 = vld [vmem:[#allocation22 + $0x80] ss:$8 sps:$4 sm:$0xff]   ;;  %v5647_v53 = vld [vmem:[#allocation22 + $0x94] ss:$8 sps:$4 sm:$0xff]  }
 0xacd   : > { %3413 = vmatprep.subr.bf16.mxu0 %v4938_v54  ;;  %3456 = vmatprep.subr.bf16.mxu1 %v4940_v55  ;;  %v5645_v54 = vld [vmem:[#allocation22 + $0x90] ss:$8 sps:$4 sm:$0xff]   ;;  %v5650_v55 = vld [vmem:[#allocation22 + $0xa4] ss:$8 sps:$4 sm:$0xff]  }
 0xad0   : > { %3414 = vmatpush1.bf16.msra.mxu0 %v4937_v8  ;;  %3457 = vmatpush1.bf16.msra.mxu1 %v4939_v61  ;;  %v5654_v8 = vld [vmem:[#allocation22 + $0xc0] ss:$8 sps:$4 sm:$0xff]   ;;  %v5659_v61 = vld [vmem:[#allocation22 + $0xd4] ss:$8 sps:$4 sm:$0xff]  }
 0xad1   : > { %3415 = vmatprep.subr.bf16.mxu0 %v4946_v1  ;;  %3458 = vmatprep.subr.bf16.mxu1 %v4948_v3  ;;  %v5657_v1 = vld [vmem:[#allocation22 + $0xd0] ss:$8 sps:$4 sm:$0xff]   ;;  %v5662_v3 = vld [vmem:[#allocation22 + $0xe4] ss:$8 sps:$4 sm:$0xff]  }
 0xad4   : > { %3416 = vmatpush1.bf16.msra.mxu0 %v4945_v5  ;;  %3459 = vmatpush1.bf16.msra.mxu1 %v4947_v6  ;;  %v7044_v5 = vld [vmem:[%s7214_s10] sm:$0xff]  ;;  %s4462_s10 = scalar_lea.sflag [#allocation4], %s6793_s21 }
 0xad5   : > { %3417 = vmatprep.subr.bf16.mxu0 %v4954_v7  ;;  %3460 = vmatprep.subr.bf16.mxu1 %v4956_v9  ;;  %v2628_v6 = vrot.slane %v7044_v5, %v6855_v37  ;;  %v2636_v7 = vrot.slane %v7044_v5, %v791_v62  ;;  %v2632_v9 = vrot.slane %v7044_v5, %v6858_v41 }
 0xad6   : > { %v2640_v11 = vrot.slane %v7044_v5, %v795_v63 }
 0xad8   : > { %3418 = vmatpush1.bf16.msra.mxu0 %v4953_v17  ;;  %3461 = vmatpush1.bf16.msra.mxu1 %v4955_v28 }
 0xad9   : > { %3419 = vmatprep.subr.bf16.mxu0 %v4962_v23  ;;  %3462 = vmatprep.subr.bf16.mxu1 %v4964_v25 }
 0xadc   : > { %3420 = vmatpush1.bf16.msra.mxu0 %v4961_v59  ;;  %3463 = vmatpush1.bf16.msra.mxu1 %v4963_v21 }
 0xadd   : > { %3421 = vmatprep.subr.bf16.mxu0 %v4970_v33  ;;  %3464 = vmatprep.subr.bf16.mxu1 %v4972_v35 }
 0xae0   : > { %3422 = vmatpush1.bf16.msra.mxu0 %v4969_v0  ;;  %3465 = vmatpush1.bf16.msra.mxu1 %v4971_v36 }
 0xae1   : > { %4281 = vmatprep.subr.bf16.mxu0 %v5620_v2 }
 0xae3   : > { %3424 = vmatmul.mubr.bf16.vlgmr.msra.gmra.mrb[20].mxu0 %v7035_v29  ;;  %3467 = vmatmul.mubr.bf16.vlgmr.msra.gmra.mrb[36].mxu1 %v7035_v29  ;;  %v5638_v29 = vld [vmem:[#allocation22 + $0x64] ss:$8 sps:$4 sm:$0xff]  }
 0xae4   : > { %4282 = vmatpush1.bf16.msra.mxu0 %v5618_v38 }
 0xae5   : > { %4283 = vmatprep.subr.bf16.mxu0 %v5623_v39 }
 0xae8   : > { %4284 = vmatpush1.bf16.msra.mxu0 %v5621_v40 }
 0xae9   : > { %4285 = vmatprep.subr.bf16.mxu0 %v5626_v42 }
 0xaec   : > { %4286 = vmatpush1.bf16.msra.mxu0 %v5624_v43 }
 0xaed   : > { %4287 = vmatprep.subr.bf16.mxu0 %v5629_v10 }
 0xaf0   : > { %4288 = vmatpush1.bf16.msra.mxu0 %v5627_v44 }
 0xaf1   : > { %4289 = vmatprep.subr.bf16.mxu0 %v5632_v57 }
 0xaf4   : > { %4290 = vmatpush1.bf16.msra.mxu0 %v5630_v45  ;;  %v5666_v45 = vld [vmem:[#allocation22 + $0x100] ss:$8 sps:$4 sm:$0xff]  }
 0xaf5   : > { %4291 = vmatprep.subr.bf16.mxu0 %v5635_v46  ;;  %v5671_v46 = vld [vmem:[#allocation22 + $0x114] ss:$8 sps:$4 sm:$0xff]  }
 0xaf8   : > { %4292 = vmatpush1.bf16.msra.mxu0 %v5633_v47  ;;  %v5669_v47 = vld [vmem:[#allocation22 + $0x110] ss:$8 sps:$4 sm:$0xff]  }
 0xaf9   : > { %4293 = vmatprep.subr.bf16.mxu0 %v5638_v29  ;;  %v5674_v29 = vld [vmem:[#allocation22 + $0x124] ss:$8 sps:$4 sm:$0xff]  }
 0xafc   : > { %4294 = vmatpush1.bf16.msra.mxu0 %v5636_v48  ;;  %v5672_v48 = vld [vmem:[#allocation22 + $0x120] ss:$8 sps:$4 sm:$0xff]  }
 0xafd   : > { %4295 = vmatprep.subr.bf16.mxu0 %v5641_v49  ;;  %v5677_v49 = vld [vmem:[#allocation22 + $0x134] ss:$8 sps:$4 sm:$0xff]  }
 0xb00   : > { %4296 = vmatpush1.bf16.msra.mxu0 %v5639_v50  ;;  %v5675_v50 = vld [vmem:[#allocation22 + $0x130] ss:$8 sps:$4 sm:$0xff]  }
 0xb01   : > { %4297 = vmatprep.subr.bf16.mxu0 %v5644_v51  ;;  %v5680_v51 = vld [vmem:[#allocation22 + $0x144] ss:$8 sps:$4 sm:$0xff]  }
 0xb04   : > { %4298 = vmatpush1.bf16.msra.mxu0 %v5642_v52  ;;  %v5678_v52 = vld [vmem:[#allocation22 + $0x140] ss:$8 sps:$4 sm:$0xff]  }
 0xb05   : > { %4299 = vmatprep.subr.bf16.mxu0 %v5647_v53  ;;  %v5683_v53 = vld [vmem:[#allocation22 + $0x154] ss:$8 sps:$4 sm:$0xff]  }
 0xb08   : > { %4300 = vmatpush1.bf16.msra.mxu0 %v5645_v54  ;;  %v5681_v54 = vld [vmem:[#allocation22 + $0x150] ss:$8 sps:$4 sm:$0xff]  }
 0xb09   : > { %4301 = vmatprep.subr.bf16.mxu0 %v5650_v55  ;;  %v5686_v55 = vld [vmem:[#allocation22 + $0x164] ss:$8 sps:$4 sm:$0xff]  }
 0xb0c   : > { %4302 = vmatpush1.bf16.msra.mxu0 %v5648_v56  ;;  %v5684_v56 = vld [vmem:[#allocation22 + $0x160] ss:$8 sps:$4 sm:$0xff]  }
 0xb0d   : > { %4303 = vmatprep.subr.bf16.mxu0 %v5653_v58  ;;  %v5689_v58 = vld [vmem:[#allocation22 + $0x174] ss:$8 sps:$4 sm:$0xff]  }
 0xb10   : > { %4304 = vmatpush1.bf16.msra.mxu0 %v5651_v60  ;;  %v5687_v60 = vld [vmem:[#allocation22 + $0x170] ss:$8 sps:$4 sm:$0xff]  }
 0xb11   : > { %4305 = vmatprep.subr.bf16.mxu0 %v5656_v20  ;;  %v5692_v20 = vld [vmem:[#allocation22 + $0x184] ss:$8 sps:$4 sm:$0xff]  }
 0xb14   : > { %4306 = vmatpush1.bf16.msra.mxu0 %v5654_v8  ;;  %v5690_v8 = vld [vmem:[#allocation22 + $0x180] ss:$8 sps:$4 sm:$0xff]  }
 0xb15   : > { %4307 = vmatprep.subr.bf16.mxu0 %v5659_v61  ;;  %v5695_v61 = vld [vmem:[#allocation22 + $0x194] ss:$8 sps:$4 sm:$0xff]  }
 0xb18   : > { %4308 = vmatpush1.bf16.msra.mxu0 %v5657_v1  ;;  %v5693_v1 = vld [vmem:[#allocation22 + $0x190] ss:$8 sps:$4 sm:$0xff]  }
 0xb19   : > { %4309 = vmatprep.subr.bf16.mxu0 %v5662_v3  ;;  %v5698_v3 = vld [vmem:[#allocation22 + $0x1a4] ss:$8 sps:$4 sm:$0xff]  }
 0xb1c   : > { %4310 = vmatpush1.bf16.msra.mxu0 %v5660_v31  ;;  %v5696_v31 = vld [vmem:[#allocation22 + $0x1a0] ss:$8 sps:$4 sm:$0xff]  }
 0xb1d   : > { %4311 = vmatprep.subr.bf16.mxu0 %v5665_v13  ;;  %v5701_v13 = vld [vmem:[#allocation22 + $0x1b4] ss:$8 sps:$4 sm:$0xff]  }
 0xb20   : > { %4312 = vmatpush1.bf16.msra.mxu0 %v5663_v14  ;;  %v5699_v14 = vld [vmem:[#allocation22 + $0x1b0] ss:$8 sps:$4 sm:$0xff]  }
 0xb21   : > { %4324 = vmatprep.subr.bf16.mxu0 %v5668_v4  ;;  %v5704_v4 = vld [vmem:[#allocation22 + $0x1c4] ss:$8 sps:$4 sm:$0xff]  }
 0xb76   : > { %v3339_v12 = vpop.f32.mrb[16].mxu0  ;;  %v3382_v15 = vpop.f32.mrb[32].mxu1 }
 0xb77   : > { %v3340_v16 = vadd.f32 %v3339_v12, %v2628_v6  ;;  %v3383_v17 = vadd.f32 %v3382_v15, %v2636_v7  ;;  %v3341_v28 = vpop.f32.mrb[17].mxu0  ;;  %v3384_v23 = vpop.f32.mrb[33].mxu1  ;;  %v2647_v12 = vsub.s32 5, %v6852_v34  ;;  %v2655_v15 = vsub.s32 7, %v6852_v34 }
 0xb78   : > { %v3342_v25 = vadd.f32 %v3341_v28, %v2632_v9  ;;  %v3385_v24 = vadd.f32 %v3384_v23, %v2640_v11  ;;  %v3343_v27 = vpop.f32.mrb[18].mxu0  ;;  %v3386_v30 = vpop.f32.mrb[34].mxu1  ;;  %v5710_v23 = vld [vmem:[#allocation22 + $0x1e4] ss:$8 sps:$4 sm:$0xff]  }
 0xb79   : > { %v3344_v32 = vadd.f32 %v3343_v27, %v2628_v6  ;;  %v3387_v59 = vadd.f32 %v3386_v30, %v2636_v7  ;;  %v3345_v62 = vpop.f32.mrb[19].mxu0  ;;  %v3388_v21 = vpop.f32.mrb[35].mxu1  ;;  %v3477_v0 = vmax.f32 %v3340_v16, 0.0  ;;  %v3479_v36 = vmax.f32 %v3383_v17, 0.0  ;;  %v5702_v6 = vld [vmem:[#allocation22 + $0x1c0] ss:$8 sps:$4 sm:$0xff]  }
 0xb7a   : > { %v3346_v33 = vadd.f32 %v3345_v62, %v2632_v9  ;;  %v3389_v35 = vadd.f32 %v3388_v21, %v2640_v11  ;;  %v3478_v38 = vmax.f32 %v3342_v25, 0.0  ;;  %v3480_v39 = vmax.f32 %v3385_v24, 0.0  ;;  %v5707_v7 = vld [vmem:[#allocation22 + $0x1d4] ss:$8 sps:$4 sm:$0xff]   ;;  %v5705_v16 = vld [vmem:[#allocation22 + $0x1d0] ss:$8 sps:$4 sm:$0xff]  }
 0xb7b   : > { %v3485_v2 = vmax.f32 %v3344_v32, 0.0  ;;  %v3487_v63 = vmax.f32 %v3387_v59, 0.0  ;;  %v2643_v9 = vsub.s32 4, %v6852_v34  ;;  %v2651_v11 = vsub.s32 6, %v6852_v34  ;;  %v5708_v32 = vld [vmem:[#allocation22 + $0x1e0] ss:$8 sps:$4 sm:$0xff]  }
 0xb7c   : > { %v3486_v40 = vmax.f32 %v3346_v33, 0.0  ;;  %v3488_v42 = vmax.f32 %v3389_v35, 0.0  ;;  %v2648_v25 = vrot.slane %v7044_v5, %v2647_v12  ;;  %v2656_v24 = vrot.slane %v7044_v5, %v2655_v15  ;;  %v5713_v33 = vld [vmem:[#allocation22 + $0x1f4] ss:$8 sps:$4 sm:$0xff]   ;;  %v5741_v12 = vld [vmem:[#allocation22 + $0x290] ss:$8 sps:$4 sm:$0xff]  }
 0xb7d   : > { %v3493_v43 = vpack.c.bf16 %v3485_v2, %v3477_v0  ;;  %v7056_v10 = vpack.c.bf16 %v3487_v63, %v3479_v36  ;;  %v2644_v17 = vrot.slane %v7044_v5, %v2643_v9  ;;  %v2652_v28 = vrot.slane %v7044_v5, %v2651_v11  ;;  %v5738_v9 = vld [vmem:[#allocation22 + $0x280] ss:$8 sps:$4 sm:$0xff]   ;;  %v5743_v11 = vld [vmem:[#allocation22 + $0x294] ss:$8 sps:$4 sm:$0xff]   ;;  %v5746_v15 = vld [vmem:[#allocation22 + $0x2a4] ss:$8 sps:$4 sm:$0xff]  }
 0xb7e   : > { %v3494_v44 = vpack.c.bf16 %v3486_v40, %v3478_v38  ;;  %v3496_v57 = vpack.c.bf16 %v3488_v42, %v3480_v39 }
 0xb80   : > { %4313 = vmatprep.mubr.bf16.mxu0 %v3494_v44 }
 0xb81   : > { %4314 = vmatmul.mubr.bf16.vlgmr.msra.gmra.mrb[24].mxu0 %v3493_v43  ;;  %v5711_v43 = vld [vmem:[#allocation22 + $0x1f0] ss:$8 sps:$4 sm:$0xff]  }
 0xb82   : > { %4325 = vmatpush1.bf16.msra.mxu0 %v5666_v45  ;;  %4356 = vmatprep.mubr.bf16.mxu0 %v3496_v57 }
 0xb83   : > { %4326 = vmatprep.subr.bf16.mxu0 %v5671_v46 }
 0xb86   : > { %4327 = vmatpush1.bf16.msra.mxu0 %v5669_v47  ;;  %v5716_v47 = vld [vmem:[#allocation22 + $0x204] ss:$8 sps:$4 sm:$0xff]  }
 0xb87   : > { %4328 = vmatprep.subr.bf16.mxu0 %v5674_v29 }
 0xb8a   : > { %4329 = vmatpush1.bf16.msra.mxu0 %v5672_v48 }
 0xb8b   : > { %4330 = vmatprep.subr.bf16.mxu0 %v5677_v49 }
 0xb8e   : > { %4331 = vmatpush1.bf16.msra.mxu0 %v5675_v50 }
 0xb8f   : > { %4332 = vmatprep.subr.bf16.mxu0 %v5680_v51 }
 0xb92   : > { %4333 = vmatpush1.bf16.msra.mxu0 %v5678_v52 }
 0xb93   : > { %4334 = vmatprep.subr.bf16.mxu0 %v5683_v53 }
 0xb96   : > { %4335 = vmatpush1.bf16.msra.mxu0 %v5681_v54 }
 0xb97   : > { %4336 = vmatprep.subr.bf16.mxu0 %v5686_v55  ;;  %v5714_v55 = vld [vmem:[#allocation22 + $0x200] ss:$8 sps:$4 sm:$0xff]  }
 0xb9a   : > { %4337 = vmatpush1.bf16.msra.mxu0 %v5684_v56  ;;  %v5719_v56 = vld [vmem:[#allocation22 + $0x214] ss:$8 sps:$4 sm:$0xff]  }
 0xb9b   : > { %4338 = vmatprep.subr.bf16.mxu0 %v5689_v58  ;;  %v5717_v58 = vld [vmem:[#allocation22 + $0x210] ss:$8 sps:$4 sm:$0xff]  }
 0xb9e   : > { %4339 = vmatpush1.bf16.msra.mxu0 %v5687_v60  ;;  %v5722_v60 = vld [vmem:[#allocation22 + $0x224] ss:$8 sps:$4 sm:$0xff]  }
 0xb9f   : > { %4340 = vmatprep.subr.bf16.mxu0 %v5692_v20  ;;  %v5720_v20 = vld [vmem:[#allocation22 + $0x220] ss:$8 sps:$4 sm:$0xff]  }
 0xba2   : > { %4341 = vmatpush1.bf16.msra.mxu0 %v5690_v8  ;;  %v5725_v8 = vld [vmem:[#allocation22 + $0x234] ss:$8 sps:$4 sm:$0xff]  }
 0xba3   : > { %4342 = vmatprep.subr.bf16.mxu0 %v5695_v61  ;;  %v5723_v61 = vld [vmem:[#allocation22 + $0x230] ss:$8 sps:$4 sm:$0xff]  }
 0xba6   : > { %4343 = vmatpush1.bf16.msra.mxu0 %v5693_v1  ;;  %v5728_v1 = vld [vmem:[#allocation22 + $0x244] ss:$8 sps:$4 sm:$0xff]  }
 0xba7   : > { %4344 = vmatprep.subr.bf16.mxu0 %v5698_v3  ;;  %v5726_v3 = vld [vmem:[#allocation22 + $0x240] ss:$8 sps:$4 sm:$0xff]  }
 0xbaa   : > { %4345 = vmatpush1.bf16.msra.mxu0 %v5696_v31  ;;  %v5731_v31 = vld [vmem:[#allocation22 + $0x254] ss:$8 sps:$4 sm:$0xff]  }
 0xbab   : > { %4346 = vmatprep.subr.bf16.mxu0 %v5701_v13  ;;  %v5729_v13 = vld [vmem:[#allocation22 + $0x250] ss:$8 sps:$4 sm:$0xff]  }
 0xbae   : > { %4347 = vmatpush1.bf16.msra.mxu0 %v5699_v14  ;;  %v5732_v14 = vld [vmem:[#allocation22 + $0x260] ss:$8 sps:$4 sm:$0xff]  }
 0xbaf   : > { %4348 = vmatprep.subr.bf16.mxu0 %v5704_v4  ;;  %v5737_v4 = vld [vmem:[#allocation22 + $0x274] ss:$8 sps:$4 sm:$0xff]  }
 0xbb2   : > { %4349 = vmatpush1.bf16.msra.mxu0 %v5702_v6  ;;  %v5735_v6 = vld [vmem:[#allocation22 + $0x270] ss:$8 sps:$4 sm:$0xff]  }
 0xbb3   : > { %4350 = vmatprep.subr.bf16.mxu0 %v5707_v7  ;;  %v5740_v7 = vld [vmem:[#allocation22 + $0x284] ss:$8 sps:$4 sm:$0xff]  }
 0xbb6   : > { %v3425_v27 = vpop.f32.mrb[20].mxu0  ;;  %v3468_v30 = vpop.f32.mrb[36].mxu1  ;;  %4351 = vmatpush1.bf16.msra.mxu0 %v5705_v16  ;;  %v5744_v16 = vld [vmem:[#allocation22 + $0x2a0] ss:$8 sps:$4 sm:$0xff]  }
 0xbb7   : > { %v3426_v59 = vadd.f32 %v3425_v27, %v2644_v17  ;;  %v3469_v62 = vadd.f32 %v3468_v30, %v2652_v28  ;;  %v3427_v21 = vpop.f32.mrb[21].mxu0  ;;  %v3470_v34 = vpop.f32.mrb[37].mxu1  ;;  %4352 = vmatprep.subr.bf16.mxu0 %v5710_v23  ;;  %v5752_v23 = vld [vmem:[#allocation22 + $0x2c4] ss:$8 sps:$4 sm:$0xff]   ;;  %v5753_v27 = vld [vmem:[#allocation22 + $0x2d0] ss:$8 sps:$4 sm:$0xff]  }
 0xbb8   : > { %v3428_v35 = vadd.f32 %v3427_v21, %v2648_v25  ;;  %v3471_v0 = vadd.f32 %v3470_v34, %v2656_v24  ;;  %v3429_v36 = vpop.f32.mrb[22].mxu0  ;;  %v3472_v2 = vpop.f32.mrb[38].mxu1  ;;  %v5758_v30 = vld [vmem:[#allocation22 + $0x2e4] ss:$8 sps:$4 sm:$0xff]   ;;  %v5762_v34 = vld [vmem:[#allocation22 + $0x300] ss:$8 sps:$4 sm:$0xff]  }
 0xbb9   : > { %v3430_v63 = vadd.f32 %v3429_v36, %v2644_v17  ;;  %v3473_v38 = vadd.f32 %v3472_v2, %v2652_v28  ;;  %v3431_v39 = vpop.f32.mrb[23].mxu0  ;;  %v3474_v40 = vpop.f32.mrb[39].mxu1  ;;  %v3481_v44 = vmax.f32 %v3426_v59, 0.0  ;;  %v3483_v57 = vmax.f32 %v3469_v62, 0.0  ;;  %v5749_v17 = vld [vmem:[#allocation22 + $0x2b4] ss:$8 sps:$4 sm:$0xff]  }
 0xbba   : > { %v3432_v42 = vadd.f32 %v3431_v39, %v2648_v25  ;;  %v3475_v5 = vadd.f32 %v3474_v40, %v2656_v24  ;;  %4353 = vmatpush1.bf16.msra.mxu0 %v5708_v32  ;;  %v3482_v29 = vmax.f32 %v3428_v35, 0.0  ;;  %v3484_v48 = vmax.f32 %v3471_v0, 0.0  ;;  %v5747_v28 = vld [vmem:[#allocation22 + $0x2b0] ss:$8 sps:$4 sm:$0xff]   ;;  %v5750_v25 = vld [vmem:[#allocation22 + $0x2c0] ss:$8 sps:$4 sm:$0xff]  }
 0xbbb   : > { %v3489_v45 = vmax.f32 %v3430_v63, 0.0  ;;  %v3491_v46 = vmax.f32 %v3473_v38, 0.0  ;;  %4354 = vmatprep.subr.bf16.mxu0 %v5713_v33  ;;  %v5755_v24 = vld [vmem:[#allocation22 + $0x2d4] ss:$8 sps:$4 sm:$0xff]   ;;  %v5756_v32 = vld [vmem:[#allocation22 + $0x2e0] ss:$8 sps:$4 sm:$0xff]  }
 0xbbc   : > { %v3490_v49 = vmax.f32 %v3432_v42, 0.0  ;;  %v3492_v50 = vmax.f32 %v3475_v5, 0.0  ;;  %v5761_v59 = vld [vmem:[#allocation22 + $0x2f4] ss:$8 sps:$4 sm:$0xff]   ;;  %v5759_v62 = vld [vmem:[#allocation22 + $0x2f0] ss:$8 sps:$4 sm:$0xff]  }
 0xbbd   : > { %v7066_v51 = vpack.c.bf16 %v3489_v45, %v3481_v44  ;;  %v7068_v52 = vpack.c.bf16 %v3491_v46, %v3483_v57  ;;  %v5764_v21 = vld [vmem:[#allocation22 + $0x304] ss:$8 sps:$4 sm:$0xff]   ;;  %v5767_v33 = vld [vmem:[#allocation22 + $0x314] ss:$8 sps:$4 sm:$0xff]   ;;  %v5765_v35 = vld [vmem:[#allocation22 + $0x310] ss:$8 sps:$4 sm:$0xff]  }
 0xbbe   : > { %v3498_v53 = vpack.c.bf16 %v3490_v49, %v3482_v29  ;;  %v7070_v54 = vpack.c.bf16 %v3492_v50, %v3484_v48  ;;  %4355 = vmatpush1.bf16.msra.mxu0 %v5711_v43  ;;  %v5770_v0 = vld [vmem:[#allocation22 + $0x324] ss:$8 sps:$4 sm:$0xff]   ;;  %v5768_v36 = vld [vmem:[#allocation22 + $0x320] ss:$8 sps:$4 sm:$0xff]   ;;  %v5773_v2 = vld [vmem:[#allocation22 + $0x334] ss:$8 sps:$4 sm:$0xff]  }
 0xbbf   : > { %4367 = vmatprep.subr.bf16.mxu0 %v5716_v47  ;;  %v5771_v63 = vld [vmem:[#allocation22 + $0x330] ss:$8 sps:$4 sm:$0xff]   ;;  %v5776_v38 = vld [vmem:[#allocation22 + $0x344] ss:$8 sps:$4 sm:$0xff]   ;;  %v5774_v39 = vld [vmem:[#allocation22 + $0x340] ss:$8 sps:$4 sm:$0xff]  }
 0xbc0   : > { %v5779_v40 = vld [vmem:[#allocation22 + $0x354] ss:$8 sps:$4 sm:$0xff]   ;;  %v5777_v42 = vld [vmem:[#allocation22 + $0x350] ss:$8 sps:$4 sm:$0xff]   ;;  %v5782_v5 = vld [vmem:[#allocation22 + $0x364] ss:$8 sps:$4 sm:$0xff]  }
 0xbc1   : > { %4357 = vmatmul.mubr.bf16.vlgmr.msra.gmra.mrb[24].mxu0 %v7056_v10  ;;  %v5734_v10 = vld [vmem:[#allocation22 + $0x264] ss:$8 sps:$4 sm:$0xff]   ;;  %v5780_v43 = vld [vmem:[#allocation22 + $0x360] ss:$8 sps:$4 sm:$0xff]   ;;  %v5785_v44 = vld [vmem:[#allocation22 + $0x374] ss:$8 sps:$4 sm:$0xff]  }
 0xbc2   : > { %4368 = vmatpush1.bf16.msra.mxu0 %v5714_v55  ;;  %4399 = vmatprep.mubr.bf16.mxu0 %v3498_v53  ;;  %v5783_v57 = vld [vmem:[#allocation22 + $0x370] ss:$8 sps:$4 sm:$0xff]   ;;  %v5788_v45 = vld [vmem:[#allocation22 + $0x384] ss:$8 sps:$4 sm:$0xff]   ;;  %v5786_v46 = vld [vmem:[#allocation22 + $0x380] ss:$8 sps:$4 sm:$0xff]  }
 0xbc3   : > { %4369 = vmatprep.subr.bf16.mxu0 %v5719_v56  ;;  %v5791_v47 = vld [vmem:[#allocation22 + $0x394] ss:$8 sps:$4 sm:$0xff]   ;;  %v5789_v29 = vld [vmem:[#allocation22 + $0x390] ss:$8 sps:$4 sm:$0xff]   ;;  %v5794_v48 = vld [vmem:[#allocation22 + $0x3a4] ss:$8 sps:$4 sm:$0xff]  }
 0xbc4   : > { %v5792_v49 = vld [vmem:[#allocation22 + $0x3a0] ss:$8 sps:$4 sm:$0xff]   ;;  %v5797_v50 = vld [vmem:[#allocation22 + $0x3b4] ss:$8 sps:$4 sm:$0xff]   ;;  %v5800_v53 = vld [vmem:[#allocation22 + $0x3c4] ss:$8 sps:$4 sm:$0xff]  }
 0xbc5   : > { %v5803_v55 = vld [vmem:[#allocation22 + $0x3d4] ss:$8 sps:$4 sm:$0xff]   ;;  %v5801_v56 = vld [vmem:[#allocation22 + $0x3d0] ss:$8 sps:$4 sm:$0xff]  }
 0xbc6   : > { %4370 = vmatpush1.bf16.msra.mxu0 %v5717_v58  ;;  %v5806_v58 = vld [vmem:[#allocation22 + $0x3e4] ss:$8 sps:$4 sm:$0xff]  }
 0xbc7   : > { %4371 = vmatprep.subr.bf16.mxu0 %v5722_v60  ;;  %v5804_v60 = vld [vmem:[#allocation22 + $0x3e0] ss:$8 sps:$4 sm:$0xff]  }
 0xbca   : > { %4372 = vmatpush1.bf16.msra.mxu0 %v5720_v20  ;;  %v5809_v20 = vld [vmem:[#allocation22 + $0x3f4] ss:$8 sps:$4 sm:$0xff]  }
 0xbcb   : > { %4373 = vmatprep.subr.bf16.mxu0 %v5725_v8  ;;  %v5807_v8 = vld [vmem:[#allocation22 + $0x3f0] ss:$8 sps:$4 sm:$0xff]  }
 0xbce   : > { %4374 = vmatpush1.bf16.msra.mxu0 %v5723_v61  ;;  %v3629_v61 = vld [vmem:[%s7215_s2] sm:$0x3]  ;;  %s6203_s2 = sshll.u32 %s6321_s20, 4  ;;  %s6204_s2 = int_to_ptr.vmem [resolvable:$false] %s6203_s2 }
 0xbcf   : > { %4375 = vmatprep.subr.bf16.mxu0 %v5728_v1  ;;  %v3634_v1 = vrot.slane %v3629_v61, %v6855_v37  ;;  %s6205_s26 = scalar_lea.vmem %s6204_s2, 1024  ;;  %p6206_p6 = scmp.lt.s32.totalorder %s7084_s27, %s6204_s2 }
 0xbd0   : > { %p6207_p13 = scmp.lt.s32.totalorder %s6205_s26, %s6199_s0 }
 0xbd2   : > { %4376 = vmatpush1.bf16.msra.mxu0 %v5726_v3  ;;  %v3638_v3 = vrot.slane %v3629_v61, %v6858_v41  ;;  %p6208_p7 = por %p6207_p13, %p6206_p6 }
 0xbd3   : > { %4377 = vmatprep.subr.bf16.mxu0 %v5731_v31 }
 0xbd4   : > { %p6209_p9 = pnand %p6208_p7, %p6202_p3 }
 0xbd6   : > { %4378 = vmatpush1.bf16.msra.mxu0 %v5729_v13 }
 0xbd7   : > { %4379 = vmatprep.subr.bf16.mxu0 %v5734_v10 }
 0xbda   : > { %4380 = vmatpush1.bf16.msra.mxu0 %v5732_v14 }
 0xbdb   : > { %4381 = vmatprep.subr.bf16.mxu0 %v5737_v4 }
 0xbde   : > { %4382 = vmatpush1.bf16.msra.mxu0 %v5735_v6 }
 0xbdf   : > { %4383 = vmatprep.subr.bf16.mxu0 %v5740_v7 }
 0xbe2   : > { %4384 = vmatpush1.bf16.msra.mxu0 %v5738_v9 }
 0xbe3   : > { %4385 = vmatprep.subr.bf16.mxu0 %v5743_v11 }
 0xbe6   : > { %4386 = vmatpush1.bf16.msra.mxu0 %v5741_v12 }
 0xbe7   : > { %4387 = vmatprep.subr.bf16.mxu0 %v5746_v15 }
 0xbea   : > { %4388 = vmatpush1.bf16.msra.mxu0 %v5744_v16 }
 0xbeb   : > { %4389 = vmatprep.subr.bf16.mxu0 %v5749_v17 }
 0xbee   : > { %4390 = vmatpush1.bf16.msra.mxu0 %v5747_v28 }
 0xbef   : > { %4391 = vmatprep.subr.bf16.mxu0 %v5752_v23 }
 0xbf2   : > { %4392 = vmatpush1.bf16.msra.mxu0 %v5750_v25 }
 0xbf3   : > { %4393 = vmatprep.subr.bf16.mxu0 %v5755_v24 }
 0xbf6   : > { %4394 = vmatpush1.bf16.msra.mxu0 %v5753_v27 }
 0xbf7   : > { %4395 = vmatprep.subr.bf16.mxu0 %v5758_v30 }
 0xbfa   : > { %4396 = vmatpush1.bf16.msra.mxu0 %v5756_v32 }
 0xbfb   : > { %4397 = vmatprep.subr.bf16.mxu0 %v5761_v59 }
 0xbfe   : > { %4398 = vmatpush1.bf16.msra.mxu0 %v5759_v62 }
 0xbff   : > { %4410 = vmatprep.subr.bf16.mxu0 %v5764_v21 }
 0xc01   : > { %4400 = vmatmul.mubr.bf16.vlgmr.msra.gmra.mrb[24].mxu0 %v7066_v51  ;;  %v5795_v51 = vld [vmem:[#allocation22 + $0x3b0] ss:$8 sps:$4 sm:$0xff]  }
 0xc02   : > { %4411 = vmatpush1.bf16.msra.mxu0 %v5762_v34  ;;  %4442 = vmatprep.mubr.bf16.mxu0 %v7070_v54  ;;  %v5798_v54 = vld [vmem:[#allocation22 + $0x3c0] ss:$8 sps:$4 sm:$0xff]  }
 0xc03   : > { %4412 = vmatprep.subr.bf16.mxu0 %v5767_v33 }
 0xc06   : > { %4413 = vmatpush1.bf16.msra.mxu0 %v5765_v35 }
 0xc07   : > { %4414 = vmatprep.subr.bf16.mxu0 %v5770_v0 }
 0xc0a   : > { %4415 = vmatpush1.bf16.msra.mxu0 %v5768_v36 }
 0xc0b   : > { %4416 = vmatprep.subr.bf16.mxu0 %v5773_v2 }
 0xc0e   : > { %4417 = vmatpush1.bf16.msra.mxu0 %v5771_v63 }
 0xc0f   : > { %4418 = vmatprep.subr.bf16.mxu0 %v5776_v38 }
 0xc12   : > { %4419 = vmatpush1.bf16.msra.mxu0 %v5774_v39 }
 0xc13   : > { %4420 = vmatprep.subr.bf16.mxu0 %v5779_v40 }
 0xc16   : > { %4421 = vmatpush1.bf16.msra.mxu0 %v5777_v42 }
 0xc17   : > { %4422 = vmatprep.subr.bf16.mxu0 %v5782_v5 }
 0xc1a   : > { %4423 = vmatpush1.bf16.msra.mxu0 %v5780_v43 }
 0xc1b   : > { %4424 = vmatprep.subr.bf16.mxu0 %v5785_v44 }
 0xc1e   : > { %4425 = vmatpush1.bf16.msra.mxu0 %v5783_v57 }
 0xc1f   : > { %4426 = vmatprep.subr.bf16.mxu0 %v5788_v45 }
 0xc22   : > { %4427 = vmatpush1.bf16.msra.mxu0 %v5786_v46 }
 0xc23   : > { %4428 = vmatprep.subr.bf16.mxu0 %v5791_v47 }
 0xc26   : > { %4429 = vmatpush1.bf16.msra.mxu0 %v5789_v29 }
 0xc27   : > { %4430 = vmatprep.subr.bf16.mxu0 %v5794_v48 }
 0xc2a   : > { %4431 = vmatpush1.bf16.msra.mxu0 %v5792_v49 }
 0xc2b   : > { %4432 = vmatprep.subr.bf16.mxu0 %v5797_v50 }
 0xc2e   : > { %4433 = vmatpush1.bf16.msra.mxu0 %v5795_v51 }
 0xc2f   : > { %4434 = vmatprep.subr.bf16.mxu0 %v5800_v53 }
 0xc32   : > { %4435 = vmatpush1.bf16.msra.mxu0 %v5798_v54 }
 0xc33   : > { %4436 = vmatprep.subr.bf16.mxu0 %v5803_v55 }
 0xc36   : > { %4437 = vmatpush1.bf16.msra.mxu0 %v5801_v56 }
 0xc37   : > { %4438 = vmatprep.subr.bf16.mxu0 %v5806_v58 }
 0xc3a   : > { %4439 = vmatpush1.bf16.msra.mxu0 %v5804_v60 }
 0xc3b   : > { %4440 = vmatprep.subr.bf16.mxu0 %v5809_v20 }
 0xc3e   : > { %4441 = vmatpush1.bf16.msra.mxu0 %v5807_v8 }
 0xc41   : > { %4443 = vmatmul.mubr.bf16.vlgmr.msra.gmra.mrb[24].mxu0 %v7068_v52 }
 0xd14   : > { %v4444_v31 = vpop.f32.mrb[24].mxu0 }
 0xd15   : > { %v5204_v13 = vadd.f32 %v4444_v31, %v3634_v1  ;;  %v4446_v10 = vpop.f32.mrb[25].mxu0 }
 0xd16   : > { %v5205_v14 = vadd.f32 %v4446_v10, %v3638_v3  ;;  %v4448_v4 = vpop.f32.mrb[26].mxu0 }
 0xd17   : > { %v4453_v52 = vadd.f32 %v5204_v13, %v7027_v22  ;;  %v5206_v6 = vadd.f32 %v4448_v4, %v3634_v1  ;;  %v4450_v7 = vpop.f32.mrb[27].mxu0 }
 0xd18   : > { %v4454_v37 = vadd.f32 %v5205_v14, %v7023_v18  ;;  %v5207_v41 = vadd.f32 %v4450_v7, %v3638_v3 }
 0xd19   : > { %4457 = vst [vmem:[%s707_s25] sm:$0xff] %v4453_v52  ;;  %v4455_v9 = vadd.f32 %v5206_v6, %v7029_v26 }
 0xd1a   : > { %4458 = vst [vmem:[%s707_s25 + $0x8] sm:$0xff] %v4454_v37  ;;  %v4456_v22 = vadd.f32 %v5207_v41, %v7025_v19 }
 0xd1b   : > { %4459 = vst [vmem:[%s707_s25 + $0x10] sm:$0xff] %v4455_v9 }
 0xd1c   : > { %4460 = vst [vmem:[%s707_s25 + $0x18] sm:$0xff] %v4456_v22 }
 0xd1d   : > { %6212 = shalt.err (!%p6209_p9)
}
 0xd1e   : > { %s6213_s25 = scalar_lea.hbm %s7091_s18, 512  ;;  %s6217_s19 = scalar_lea.hbm %s7216_s16, 1024 }
 0xd1f   : > { %p6214_p10 = scmp.ne.s32.totalorder %s7091_s18, %s6213_s25  ;;  %p6218_p8 = scmp.lt.u32.totalorder %s7091_s18, %s7216_s16 }
 0xd20   : > { %p6219_p0 = scmp.lt.u32.totalorder %s6217_s19, %s6213_s25  ;;  %p6221_p5 = scmp.lt.u32.totalorder %s6213_s25, %s7091_s18 }
 0xd21   : > { %p6215_p11 = pnand %p6214_p10, %p7217_p4 }
 0xd22   : > { %p6220_p2 = por %p6219_p0, %p6218_p8 }
 0xd23   : > { %p6216_p12 = pneg %p6215_p11 }
 0xd24   : > { %p6222_p1 = por %p6221_p5, %p6220_p2 }
 0xd26   : > { %p6223_p3 = pnand %p6222_p1, %p6216_p12 }
 0xd28   : > { %6226 = shalt.err (!%p6223_p3)
}
 0xd29   : > { %s6322_s0 = smov 256   ;;  %s6323_s26 = smov 16  }
 0xd2a   : > { %5286 = dma.vmem_to_hbm [thread:$0]  (%p7217_p4), %s7084_s27, 512, %s7091_s18, %s4462_s10, %s6322_s0, %s6322_s0, %s6323_s26  }
 0xd2b PF: > { %s7218_s3 = sld [smem:[#allocation35_spill]]  ;;  %p7219_p6 = scmp.ne.s32.totalorder %s7192_s30, 0 }
 0xd2c   : > { %p7220_p13 = scmp.ge.s32.totalorder %s6297_s24, 2 }
 0xd2e   : > { %p5330_p7 = pnand %p7220_p13, %p7219_p6 }
 0xd31   : > { %s4490_s13 = sand.u32 1, %s7218_s3  }
 0xd32   : > { %s4491_s25 = scalar_lea.sflag [#allocation4], %s4490_s13 }
 0xd33   : > { %6280 = dma.done.wait (!%p5330_p7), %s4491_s25, 512  }
 0xd34   : > { %6282 = vsyncadd (!%p5330_p7), %s4491_s25, 4294966784  ;;  %p36_p9 = scmp.ge.s32.totalorder %s6711_s1, 4   ;;  %s7221_s21 = smov %s6289_s22 }
 0xd35   : > { %s7222_s22 = smov %s6293_s23  ;;  %s7223_s23 = smov %s6722_s15 }
 0xd36   : > { %s7224_s24 = smov %s6711_s1  ;;  %38 = sbr.rel (!%p36_p9) target bundleno = 21 (0x15), region = 178 }
 0xd3d   :  { %4496 = vsyncpa [#allocation3], 1 }
 0xd3e   :  { %4498 = vsyncpa [#allocation3 + $0x1], 1 }
 0xd3f   :  { %4499 = vsyncpa [#allocation7], 1 }
 0xd40   :  { %4500 = vsyncpa [#allocation10], 1 }
 0xd41   :  { %4501 = vsyncpa [#allocation13], 1 }
 0xd42   :  { %4502 = vsyncpa [#allocation16], 1 }
 0xd43   :  { %4503 = vsyncpa [#allocation20], 1 }
 0xd44   :  { %4504 = vsyncpa [#allocation23], 1 }
 0xd45   :  { %4505 = vsyncpa [#allocation4], 1 }
 0xd46   :  { %4507 = vsyncpa [#allocation4 + $0x1], 1 }
 0xd47   :  { %4508 = vsyncpa [#allocation5], 1 }
 0xd48   :  { %4510 = vsyncpa [#allocation5 + $0x1], 1 }

</bundles_post_ra>
